<compile_context>
chip_gen: v5e
topology: v5e:2x2
jax: 0.10.0
libtpu: 0.0.40
codegen_flags: <defaults>
</compile_context>

<pallas_src>
import functools

import jax
import jax.numpy as jnp
from jax import lax
from jax.experimental import pallas as pl
from jax.experimental.pallas import tpu as pltpu


def _bottleneck_kernel(x_ref, w1_ref, s1_ref, b1_ref,
                       w2_ref, s2_ref, b2_ref,
                       w3_ref, s3_ref, b3_ref,
                       o_ref, y1pad_ref, *, H, W, P, CC):
    """One grid program processes one full image, NCHW (spatial flattened).

    x_ref:     (1, Cin, H*W)  input tile, f32 (also the residual)
    w1_ref:    (P, Cin)       1x1 conv, bf16, (out, in)
    w2_ref:    (9, P, P)      3x3 conv taps, bf16, (tap, in, out)
    w3_ref:    (4P, P)        1x1 conv, bf16, (out, in)
    s1/b1:     (P, 1)         folded BN (channel-major broadcast), f32
    s2/b2:     (1, P)         folded BN (HWC broadcast), f32
    s3/b3:     (4P, 1)        folded BN (channel-major broadcast), f32
    o_ref:     (1, 4P, H*W)   output tile (bf16 by default)
    y1pad_ref: (H+2, W+2, P)  VMEM scratch, bf16: zero-padded conv1 activation
    """
    f32 = jnp.float32
    bf16 = jnp.bfloat16
    HW = H * W
    Cout = o_ref.shape[1]

    # Zero only the halo border of the padded conv1 buffer; the interior is
    # fully overwritten below.  Re-done every grid step (cheap) so the batch
    # axis can be safely sharded across TensorCores.
    y1pad_ref[0:1, :, :] = jnp.zeros((1, W + 2, P), bf16)
    y1pad_ref[H + 1:H + 2, :, :] = jnp.zeros((1, W + 2, P), bf16)
    y1pad_ref[:, 0:1, :] = jnp.zeros((H + 2, 1, P), bf16)
    y1pad_ref[:, W + 1:W + 2, :] = jnp.zeros((H + 2, 1, P), bf16)

    # ---- conv1 (1x1) + bn1 + relu, channel-major: (P,Cin)@(Cin,HW) -> (P,HW)
    x_bf = x_ref[0].astype(bf16)
    y1 = jnp.dot(w1_ref[...], x_bf, preferred_element_type=f32)
    y1 = jnp.maximum(y1 * s1_ref[...] + b1_ref[...], 0.0)
    # Transpose only the narrow (P-wide) activation to HWC and scatter into
    # the zero-padded buffer; (HW,P)->(H,W,P) is a free leading-dim reshape.
    y1pad_ref[1:H + 1, 1:W + 1, :] = y1.T.reshape(H, W, P).astype(bf16)

    # ---- conv2 (3x3, stride=1, pad=1) + bn2 + relu ----
    # 9 accumulating MXU dots on shifted windows of the padded buffer
    # (no materialized im2col buffer, no bulk copy phase).
    acc = jnp.zeros((HW, P), f32)
    for t in range(9):
        dy, dx = t // 3, t % 3
        tap = y1pad_ref[dy:dy + H, dx:dx + W, :].reshape(HW, P)
        acc = acc + jnp.dot(tap, w2_ref[t], preferred_element_type=f32)
    y2 = jnp.maximum(acc * s2_ref[...] + b2_ref[...], 0.0)
    # Back to channel-major (again only the P-wide tensor is transposed).
    y2_cm = y2.T.astype(bf16)                                   # (P, HW)

    # ---- conv3 (1x1) + bn3 + residual + relu, chunked over output channels
    # Each chunk is stored immediately (bounds f32 temporaries; lane-dense
    # (CC, HW) stores straight into the NCHW output block).
    for c0 in range(0, Cout, CC):
        c1 = c0 + CC
        y3 = jnp.dot(w3_ref[c0:c1, :], y2_cm, preferred_element_type=f32)
        y3 = y3 * s3_ref[c0:c1, :] + b3_ref[c0:c1, :]
        res = x_ref[0, c0:c1, :]                                # f32 residual
        o_ref[0, c0:c1, :] = jnp.maximum(y3 + res, 0.0).astype(o_ref.dtype)


def _vmem_limit_bytes():
    """Generation-aware VMEM budget: ~75% of physical, clamped to [32,100] MiB."""
    cap = 128 * 1024 * 1024
    try:
        cap = int(getattr(pltpu.get_tpu_info(), "vmem_capacity_bytes", cap))
    except Exception:
        pass
    return max(32 * 1024 * 1024, min(int(cap * 0.75), 100 * 1024 * 1024))


def bottleneck_pallas(x_nchw, params, *, out_dtype=jnp.bfloat16):
    N, Cin, H, W = x_nchw.shape
    P = params["w1"].shape[1]
    assert Cin == 4 * P, "residual add requires inplanes == planes * expansion"
    HW = H * W
    Cout = 4 * P

    # NCHW stays NCHW: flattening (H, W) -> H*W is a free metadata reshape, so
    # there is no HBM transpose/relayout pass on either side of the kernel.
    x_flat = x_nchw.reshape(N, Cin, HW)

    # Weights in the orientation each stage consumes, cast once to bf16.
    w1_cm = params["w1"].T.astype(jnp.bfloat16)                  # (P, Cin)
    w2_taps = params["w2"].reshape(9, P, P).astype(jnp.bfloat16)  # (tap,in,out)
    w3_cm = params["w3"].T.astype(jnp.bfloat16)                  # (4P, P)

    # Folded BN params, oriented for the layout of the stage they feed.
    s1 = params["s1"].reshape(P, 1)
    b1 = params["b1"].reshape(P, 1)
    s2 = params["s2"].reshape(1, P)
    b2 = params["b2"].reshape(1, P)
    s3 = params["s3"].reshape(Cout, 1)
    b3 = params["b3"].reshape(Cout, 1)

    # Output-channel chunk for the conv3 epilogue (bounds f32 temporaries).
    CC = 128 if (Cout > 128 and Cout % 128 == 0) else Cout

    kernel = functools.partial(_bottleneck_kernel, H=H, W=W, P=P, CC=CC)

    out_flat = pl.pallas_call(
        kernel,
        out_shape=jax.ShapeDtypeStruct((N, Cout, HW), out_dtype),
        grid_spec=pltpu.PrefetchScalarGridSpec(
            num_scalar_prefetch=0,
            grid=(N,),
            in_specs=[
                pl.BlockSpec((1, Cin, HW), lambda n: (n, 0, 0)),
                pl.BlockSpec(w1_cm.shape, lambda n: (0, 0)),
                pl.BlockSpec(s1.shape, lambda n: (0, 0)),
                pl.BlockSpec(b1.shape, lambda n: (0, 0)),
                pl.BlockSpec(w2_taps.shape, lambda n: (0, 0, 0)),
                pl.BlockSpec(s2.shape, lambda n: (0, 0)),
                pl.BlockSpec(b2.shape, lambda n: (0, 0)),
                pl.BlockSpec(w3_cm.shape, lambda n: (0, 0)),
                pl.BlockSpec(s3.shape, lambda n: (0, 0)),
                pl.BlockSpec(b3.shape, lambda n: (0, 0)),
            ],
            out_specs=pl.BlockSpec((1, Cout, HW), lambda n: (n, 0, 0)),
            scratch_shapes=[
                pltpu.VMEM((H + 2, W + 2, P), jnp.bfloat16),  # padded conv1 act
            ],
        ),
        compiler_params=pltpu.CompilerParams(
            dimension_semantics=("parallel",),   # batch images are independent
            vmem_limit_bytes=_vmem_limit_bytes(),
        ),
    )(x_flat, w1_cm, s1, b1, w2_taps, s2, b2, w3_cm, s3, b3)

    return out_flat.reshape(N, Cout, H, W)


# ---------------------------------------------------------------------------
# Pure-JAX f32 reference (for correctness check) and deterministic params.
# ---------------------------------------------------------------------------
def _conv1x1(x, w):  # x NHWC, w (Cin, Cout)
    return lax.conv_general_dilated(
        x, w[None, None], (1, 1), "VALID",
        dimension_numbers=("NHWC", "HWIO", "NHWC"))


def _conv3x3(x, w):  # x NHWC, w (3,3,Cin,Cout)
    return lax.conv_general_dilated(
        x, w, (1, 1), ((1, 1), (1, 1)),
        dimension_numbers=("NHWC", "HWIO", "NHWC"))


def bottleneck_ref(x_nchw, p):
    x = jnp.transpose(x_nchw, (0, 2, 3, 1))
    y = jnp.maximum(_conv1x1(x, p["w1"]) * p["s1"] + p["b1"], 0.0)
    y = jnp.maximum(_conv3x3(y, p["w2"]) * p["s2"] + p["b2"], 0.0)
    y = _conv1x1(y, p["w3"]) * p["s3"] + p["b3"]
    y = jnp.maximum(y + x, 0.0)
    return jnp.transpose(y, (0, 3, 1, 2))


def make_params(key, inplanes, planes):
    P = planes
    ks = jax.random.split(key, 16)

    def bn_fold(kg, kb, km, kv, C, eps=1e-5):
        gamma = 1.0 + 0.1 * jax.random.normal(kg, (C,), jnp.float32)
        beta = 0.1 * jax.random.normal(kb, (C,), jnp.float32)
        mean = 0.1 * jax.random.normal(km, (C,), jnp.float32)
        var = jnp.abs(jax.random.normal(kv, (C,), jnp.float32)) + 0.5
        scale = gamma / jnp.sqrt(var + eps)
        bias = beta - mean * scale
        return scale.reshape(1, C), bias.reshape(1, C)

    s1, b1 = bn_fold(ks[3], ks[4], ks[5], ks[6], P)
    s2, b2 = bn_fold(ks[7], ks[8], ks[9], ks[10], P)
    s3, b3 = bn_fold(ks[11], ks[12], ks[13], ks[14], 4 * P)

    return dict(
        # PyTorch conv weight (out,in,kh,kw) stored here pre-transposed:
        w1=0.1 * jax.random.normal(ks[0], (inplanes, P), jnp.float32),   # (in,out)
        w2=0.1 * jax.random.normal(ks[1], (3, 3, P, P), jnp.float32),    # (kh,kw,in,out)
        w3=0.1 * jax.random.normal(ks[2], (P, 4 * P), jnp.float32),      # (in,out)
        s1=s1, b1=b1, s2=s2, b2=b2, s3=s3, b3=b3,
    )


if __name__ == "__main__":
    N, planes, HW = 2, 4, 16
    inplanes = planes * 4  # expansion = 4; residual path requires this
    # NOTE: the demo uses tiny channel counts (P=4); real ResNet/FPN blocks have
    # P >= 64 so the MXU contraction and lane axes are well utilized.

    key = jax.random.PRNGKey(0)
    kparam, kx = jax.random.split(key)
    params = make_params(kparam, inplanes, planes)
    x = jax.random.normal(kx, (N, inplanes, HW, HW), jnp.float32)  # NCHW like PyTorch

    out = bottleneck_pallas(x, params)          # bf16 output (HBM traffic halved)
    jax.block_until_ready(out)

    ref = bottleneck_ref(x, params)
    assert out.shape == (N, inplanes, HW, HW)
    # Tolerance relaxed modestly: kernel uses bf16 matmul inputs (f32 accumulate,
    # f32 BN/residual) and a bf16 output vs. the all-f32 reference.
    assert jnp.allclose(out.astype(jnp.float32), ref, atol=5e-2, rtol=5e-2), \
        "mismatch vs reference"

    print("KERNEL_OK")
</pallas_src>

<mosaic_0001>
module attributes {stable_mosaic.version = 11 : i64} {
  func.func @_bottleneck_kernel(%arg0: i32, %arg1: memref<1x16x256xf32, #tpu.memory_space<vmem>>, %arg2: memref<4x16xbf16, #tpu.memory_space<vmem>>, %arg3: memref<4x1xf32, #tpu.memory_space<vmem>>, %arg4: memref<4x1xf32, #tpu.memory_space<vmem>>, %arg5: memref<9x4x4xbf16, #tpu.memory_space<vmem>>, %arg6: memref<1x4xf32, #tpu.memory_space<vmem>>, %arg7: memref<1x4xf32, #tpu.memory_space<vmem>>, %arg8: memref<16x4xbf16, #tpu.memory_space<vmem>>, %arg9: memref<16x1xf32, #tpu.memory_space<vmem>>, %arg10: memref<16x1xf32, #tpu.memory_space<vmem>>, %arg11: memref<1x16x256xbf16, #tpu.memory_space<vmem>>, %arg12: memref<18x18x4xbf16, #tpu.memory_space<vmem>>) attributes {dimension_semantics = [#tpu.dimension_semantics<parallel>], iteration_bounds = array<i64: 2>, scalar_prefetch = 0 : i64, scratch_operands = 1 : i64, tpu.core_type = #tpu.core_type<tc>, window_params = [{transform_indices = @transform_0, window_bounds = array<i64: 1, 16, 256>}, {pipeline_mode = #tpu.pipeline_mode<synchronous>, transform_indices = @transform_1, window_bounds = array<i64: 4, 16>}, {pipeline_mode = #tpu.pipeline_mode<synchronous>, transform_indices = @transform_2, window_bounds = array<i64: 4, 1>}, {pipeline_mode = #tpu.pipeline_mode<synchronous>, transform_indices = @transform_3, window_bounds = array<i64: 4, 1>}, {pipeline_mode = #tpu.pipeline_mode<synchronous>, transform_indices = @transform_4, window_bounds = array<i64: 9, 4, 4>}, {pipeline_mode = #tpu.pipeline_mode<synchronous>, transform_indices = @transform_5, window_bounds = array<i64: 1, 4>}, {pipeline_mode = #tpu.pipeline_mode<synchronous>, transform_indices = @transform_6, window_bounds = array<i64: 1, 4>}, {pipeline_mode = #tpu.pipeline_mode<synchronous>, transform_indices = @transform_7, window_bounds = array<i64: 16, 4>}, {pipeline_mode = #tpu.pipeline_mode<synchronous>, transform_indices = @transform_8, window_bounds = array<i64: 16, 1>}, {pipeline_mode = #tpu.pipeline_mode<synchronous>, transform_indices = @transform_9, window_bounds = array<i64: 16, 1>}, {transform_indices = @transform_10, window_bounds = array<i64: 1, 16, 256>}]} {
    %cst = arith.constant 0.000000e+00 : bf16
    %0 = vector.broadcast %cst : bf16 to vector<1x18x4xbf16>
    %c0 = arith.constant 0 : index
    %c0_0 = arith.constant 0 : index
    %c0_1 = arith.constant 0 : index
    %1 = vector.load %arg12[%c0, %c0_0, %c0_1] : memref<18x18x4xbf16, #tpu.memory_space<vmem>>, vector<1x18x4xbf16>
    tpu.vector_store %arg12[%c0, %c0_0, %c0_1], %0 {strides = array<i32>} : memref<18x18x4xbf16, #tpu.memory_space<vmem>>, vector<1x18x4xbf16>,
    %cst_2 = arith.constant 0.000000e+00 : bf16
    %2 = vector.broadcast %cst_2 : bf16 to vector<1x18x4xbf16>
    %c17 = arith.constant 17 : index
    %c0_3 = arith.constant 0 : index
    %c0_4 = arith.constant 0 : index
    %3 = vector.load %arg12[%c17, %c0_3, %c0_4] : memref<18x18x4xbf16, #tpu.memory_space<vmem>>, vector<1x18x4xbf16>
    tpu.vector_store %arg12[%c17, %c0_3, %c0_4], %2 {strides = array<i32>} : memref<18x18x4xbf16, #tpu.memory_space<vmem>>, vector<1x18x4xbf16>,
    %cst_5 = arith.constant 0.000000e+00 : bf16
    %4 = vector.broadcast %cst_5 : bf16 to vector<18x1x4xbf16>
    %c0_6 = arith.constant 0 : index
    %c0_7 = arith.constant 0 : index
    %c0_8 = arith.constant 0 : index
    %5 = vector.load %arg12[%c0_6, %c0_7, %c0_8] : memref<18x18x4xbf16, #tpu.memory_space<vmem>>, vector<18x1x4xbf16>
    tpu.vector_store %arg12[%c0_6, %c0_7, %c0_8], %4 {strides = array<i32>} : memref<18x18x4xbf16, #tpu.memory_space<vmem>>, vector<18x1x4xbf16>,
    %cst_9 = arith.constant 0.000000e+00 : bf16
    %6 = vector.broadcast %cst_9 : bf16 to vector<18x1x4xbf16>
    %c0_10 = arith.constant 0 : index
    %c17_11 = arith.constant 17 : index
    %c0_12 = arith.constant 0 : index
    %7 = vector.load %arg12[%c0_10, %c17_11, %c0_12] : memref<18x18x4xbf16, #tpu.memory_space<vmem>>, vector<18x1x4xbf16>
    tpu.vector_store %arg12[%c0_10, %c17_11, %c0_12], %6 {strides = array<i32>} : memref<18x18x4xbf16, #tpu.memory_space<vmem>>, vector<18x1x4xbf16>,
    %c0_13 = arith.constant 0 : index
    %c0_14 = arith.constant 0 : index
    %c0_15 = arith.constant 0 : index
    %8 = vector.load %arg1[%c0_13, %c0_14, %c0_15] : memref<1x16x256xf32, #tpu.memory_space<vmem>>, vector<1x16x256xf32>
    %9 = vector.shape_cast %8 : vector<1x16x256xf32> to vector<16x256xf32>
    %10 = arith.truncf %9 : vector<16x256xf32> to vector<16x256xbf16>
    %c0_16 = arith.constant 0 : index
    %c0_17 = arith.constant 0 : index
    %11 = vector.load %arg2[%c0_16, %c0_17] : memref<4x16xbf16, #tpu.memory_space<vmem>>, vector<4x16xbf16>
    %cst_18 = arith.constant dense<0.000000e+00> : vector<4x256xf32>
    %12 = tpu.matmul %11, %10, %cst_18 {dimension_numbers = #tpu.dot_dimension_numbers<[1], [0], [0], [1], [0, 0, 1, 1], [], []>} : vector<4x16xbf16>, vector<16x256xbf16>, vector<4x256xf32> -> vector<4x256xf32>
    %c0_19 = arith.constant 0 : index
    %c0_20 = arith.constant 0 : index
    %13 = vector.load %arg3[%c0_19, %c0_20] : memref<4x1xf32, #tpu.memory_space<vmem>>, vector<4x1xf32>
    %14 = vector.broadcast %13 : vector<4x1xf32> to vector<4x256xf32>
    %15 = arith.mulf %12, %14 : vector<4x256xf32>
    %c0_21 = arith.constant 0 : index
    %c0_22 = arith.constant 0 : index
    %16 = vector.load %arg4[%c0_21, %c0_22] : memref<4x1xf32, #tpu.memory_space<vmem>>, vector<4x1xf32>
    %17 = vector.broadcast %16 : vector<4x1xf32> to vector<4x256xf32>
    %18 = arith.addf %15, %17 : vector<4x256xf32>
    %cst_23 = arith.constant 0.000000e+00 : f32
    %19 = vector.broadcast %cst_23 : f32 to vector<4x256xf32>
    %20 = arith.maximumf %18, %19 : vector<4x256xf32>
    %21 = tpu.transpose %20, [1, 0] : vector<4x256xf32> -> vector<256x4xf32>
    %22 = vector.shape_cast %21 : vector<256x4xf32> to vector<16x16x4xf32>
    %23 = arith.truncf %22 : vector<16x16x4xf32> to vector<16x16x4xbf16>
    %c1 = arith.constant 1 : index
    %c1_24 = arith.constant 1 : index
    %c0_25 = arith.constant 0 : index
    %24 = vector.load %arg12[%c1, %c1_24, %c0_25] : memref<18x18x4xbf16, #tpu.memory_space<vmem>>, vector<16x16x4xbf16>
    tpu.vector_store %arg12[%c1, %c1_24, %c0_25], %23 {strides = array<i32>} : memref<18x18x4xbf16, #tpu.memory_space<vmem>>, vector<16x16x4xbf16>,
    %cst_26 = arith.constant 0.000000e+00 : f32
    %25 = vector.broadcast %cst_26 : f32 to vector<256x4xf32>
    %c0_27 = arith.constant 0 : index
    %c0_28 = arith.constant 0 : index
    %c0_29 = arith.constant 0 : index
    %26 = vector.load %arg12[%c0_27, %c0_28, %c0_29] : memref<18x18x4xbf16, #tpu.memory_space<vmem>>, vector<16x16x4xbf16>
    %27 = vector.shape_cast %26 : vector<16x16x4xbf16> to vector<256x4xbf16>
    %c0_30 = arith.constant 0 : index
    %c0_31 = arith.constant 0 : index
    %c0_32 = arith.constant 0 : index
    %28 = vector.load %arg5[%c0_30, %c0_31, %c0_32] : memref<9x4x4xbf16, #tpu.memory_space<vmem>>, vector<1x4x4xbf16>
    %29 = vector.shape_cast %28 : vector<1x4x4xbf16> to vector<4x4xbf16>
    %cst_33 = arith.constant dense<0.000000e+00> : vector<256x4xf32>
    %30 = tpu.matmul %27, %29, %cst_33 {dimension_numbers = #tpu.dot_dimension_numbers<[1], [0], [0], [1], [0, 0, 1, 1], [], []>} : vector<256x4xbf16>, vector<4x4xbf16>, vector<256x4xf32> -> vector<256x4xf32>
    %31 = arith.addf %25, %30 : vector<256x4xf32>
    %c0_34 = arith.constant 0 : index
    %c1_35 = arith.constant 1 : index
    %c0_36 = arith.constant 0 : index
    %32 = vector.load %arg12[%c0_34, %c1_35, %c0_36] : memref<18x18x4xbf16, #tpu.memory_space<vmem>>, vector<16x16x4xbf16>
    %33 = vector.shape_cast %32 : vector<16x16x4xbf16> to vector<256x4xbf16>
    %c1_37 = arith.constant 1 : index
    %c0_38 = arith.constant 0 : index
    %c0_39 = arith.constant 0 : index
    %34 = vector.load %arg5[%c1_37, %c0_38, %c0_39] : memref<9x4x4xbf16, #tpu.memory_space<vmem>>, vector<1x4x4xbf16>
    %35 = vector.shape_cast %34 : vector<1x4x4xbf16> to vector<4x4xbf16>
    %cst_40 = arith.constant dense<0.000000e+00> : vector<256x4xf32>
    %36 = tpu.matmul %33, %35, %cst_40 {dimension_numbers = #tpu.dot_dimension_numbers<[1], [0], [0], [1], [0, 0, 1, 1], [], []>} : vector<256x4xbf16>, vector<4x4xbf16>, vector<256x4xf32> -> vector<256x4xf32>
    %37 = arith.addf %31, %36 : vector<256x4xf32>
    %c0_41 = arith.constant 0 : index
    %c2 = arith.constant 2 : index
    %c0_42 = arith.constant 0 : index
    %38 = vector.load %arg12[%c0_41, %c2, %c0_42] : memref<18x18x4xbf16, #tpu.memory_space<vmem>>, vector<16x16x4xbf16>
    %39 = vector.shape_cast %38 : vector<16x16x4xbf16> to vector<256x4xbf16>
    %c2_43 = arith.constant 2 : index
    %c0_44 = arith.constant 0 : index
    %c0_45 = arith.constant 0 : index
    %40 = vector.load %arg5[%c2_43, %c0_44, %c0_45] : memref<9x4x4xbf16, #tpu.memory_space<vmem>>, vector<1x4x4xbf16>
    %41 = vector.shape_cast %40 : vector<1x4x4xbf16> to vector<4x4xbf16>
    %cst_46 = arith.constant dense<0.000000e+00> : vector<256x4xf32>
    %42 = tpu.matmul %39, %41, %cst_46 {dimension_numbers = #tpu.dot_dimension_numbers<[1], [0], [0], [1], [0, 0, 1, 1], [], []>} : vector<256x4xbf16>, vector<4x4xbf16>, vector<256x4xf32> -> vector<256x4xf32>
    %43 = arith.addf %37, %42 : vector<256x4xf32>
    %c1_47 = arith.constant 1 : index
    %c0_48 = arith.constant 0 : index
    %c0_49 = arith.constant 0 : index
    %44 = vector.load %arg12[%c1_47, %c0_48, %c0_49] : memref<18x18x4xbf16, #tpu.memory_space<vmem>>, vector<16x16x4xbf16>
    %45 = vector.shape_cast %44 : vector<16x16x4xbf16> to vector<256x4xbf16>
    %c3 = arith.constant 3 : index
    %c0_50 = arith.constant 0 : index
    %c0_51 = arith.constant 0 : index
    %46 = vector.load %arg5[%c3, %c0_50, %c0_51] : memref<9x4x4xbf16, #tpu.memory_space<vmem>>, vector<1x4x4xbf16>
    %47 = vector.shape_cast %46 : vector<1x4x4xbf16> to vector<4x4xbf16>
    %cst_52 = arith.constant dense<0.000000e+00> : vector<256x4xf32>
    %48 = tpu.matmul %45, %47, %cst_52 {dimension_numbers = #tpu.dot_dimension_numbers<[1], [0], [0], [1], [0, 0, 1, 1], [], []>} : vector<256x4xbf16>, vector<4x4xbf16>, vector<256x4xf32> -> vector<256x4xf32>
    %49 = arith.addf %43, %48 : vector<256x4xf32>
    %c1_53 = arith.constant 1 : index
    %c1_54 = arith.constant 1 : index
    %c0_55 = arith.constant 0 : index
    %50 = vector.load %arg12[%c1_53, %c1_54, %c0_55] : memref<18x18x4xbf16, #tpu.memory_space<vmem>>, vector<16x16x4xbf16>
    %51 = vector.shape_cast %50 : vector<16x16x4xbf16> to vector<256x4xbf16>
    %c4 = arith.constant 4 : index
    %c0_56 = arith.constant 0 : index
    %c0_57 = arith.constant 0 : index
    %52 = vector.load %arg5[%c4, %c0_56, %c0_57] : memref<9x4x4xbf16, #tpu.memory_space<vmem>>, vector<1x4x4xbf16>
    %53 = vector.shape_cast %52 : vector<1x4x4xbf16> to vector<4x4xbf16>
    %cst_58 = arith.constant dense<0.000000e+00> : vector<256x4xf32>
    %54 = tpu.matmul %51, %53, %cst_58 {dimension_numbers = #tpu.dot_dimension_numbers<[1], [0], [0], [1], [0, 0, 1, 1], [], []>} : vector<256x4xbf16>, vector<4x4xbf16>, vector<256x4xf32> -> vector<256x4xf32>
    %55 = arith.addf %49, %54 : vector<256x4xf32>
    %c1_59 = arith.constant 1 : index
    %c2_60 = arith.constant 2 : index
    %c0_61 = arith.constant 0 : index
    %56 = vector.load %arg12[%c1_59, %c2_60, %c0_61] : memref<18x18x4xbf16, #tpu.memory_space<vmem>>, vector<16x16x4xbf16>
    %57 = vector.shape_cast %56 : vector<16x16x4xbf16> to vector<256x4xbf16>
    %c5 = arith.constant 5 : index
    %c0_62 = arith.constant 0 : index
    %c0_63 = arith.constant 0 : index
    %58 = vector.load %arg5[%c5, %c0_62, %c0_63] : memref<9x4x4xbf16, #tpu.memory_space<vmem>>, vector<1x4x4xbf16>
    %59 = vector.shape_cast %58 : vector<1x4x4xbf16> to vector<4x4xbf16>
    %cst_64 = arith.constant dense<0.000000e+00> : vector<256x4xf32>
    %60 = tpu.matmul %57, %59, %cst_64 {dimension_numbers = #tpu.dot_dimension_numbers<[1], [0], [0], [1], [0, 0, 1, 1], [], []>} : vector<256x4xbf16>, vector<4x4xbf16>, vector<256x4xf32> -> vector<256x4xf32>
    %61 = arith.addf %55, %60 : vector<256x4xf32>
    %c2_65 = arith.constant 2 : index
    %c0_66 = arith.constant 0 : index
    %c0_67 = arith.constant 0 : index
    %62 = vector.load %arg12[%c2_65, %c0_66, %c0_67] : memref<18x18x4xbf16, #tpu.memory_space<vmem>>, vector<16x16x4xbf16>
    %63 = vector.shape_cast %62 : vector<16x16x4xbf16> to vector<256x4xbf16>
    %c6 = arith.constant 6 : index
    %c0_68 = arith.constant 0 : index
    %c0_69 = arith.constant 0 : index
    %64 = vector.load %arg5[%c6, %c0_68, %c0_69] : memref<9x4x4xbf16, #tpu.memory_space<vmem>>, vector<1x4x4xbf16>
    %65 = vector.shape_cast %64 : vector<1x4x4xbf16> to vector<4x4xbf16>
    %cst_70 = arith.constant dense<0.000000e+00> : vector<256x4xf32>
    %66 = tpu.matmul %63, %65, %cst_70 {dimension_numbers = #tpu.dot_dimension_numbers<[1], [0], [0], [1], [0, 0, 1, 1], [], []>} : vector<256x4xbf16>, vector<4x4xbf16>, vector<256x4xf32> -> vector<256x4xf32>
    %67 = arith.addf %61, %66 : vector<256x4xf32>
    %c2_71 = arith.constant 2 : index
    %c1_72 = arith.constant 1 : index
    %c0_73 = arith.constant 0 : index
    %68 = vector.load %arg12[%c2_71, %c1_72, %c0_73] : memref<18x18x4xbf16, #tpu.memory_space<vmem>>, vector<16x16x4xbf16>
    %69 = vector.shape_cast %68 : vector<16x16x4xbf16> to vector<256x4xbf16>
    %c7 = arith.constant 7 : index
    %c0_74 = arith.constant 0 : index
    %c0_75 = arith.constant 0 : index
    %70 = vector.load %arg5[%c7, %c0_74, %c0_75] : memref<9x4x4xbf16, #tpu.memory_space<vmem>>, vector<1x4x4xbf16>
    %71 = vector.shape_cast %70 : vector<1x4x4xbf16> to vector<4x4xbf16>
    %cst_76 = arith.constant dense<0.000000e+00> : vector<256x4xf32>
    %72 = tpu.matmul %69, %71, %cst_76 {dimension_numbers = #tpu.dot_dimension_numbers<[1], [0], [0], [1], [0, 0, 1, 1], [], []>} : vector<256x4xbf16>, vector<4x4xbf16>, vector<256x4xf32> -> vector<256x4xf32>
    %73 = arith.addf %67, %72 : vector<256x4xf32>
    %c2_77 = arith.constant 2 : index
    %c2_78 = arith.constant 2 : index
    %c0_79 = arith.constant 0 : index
    %74 = vector.load %arg12[%c2_77, %c2_78, %c0_79] : memref<18x18x4xbf16, #tpu.memory_space<vmem>>, vector<16x16x4xbf16>
    %75 = vector.shape_cast %74 : vector<16x16x4xbf16> to vector<256x4xbf16>
    %c8 = arith.constant 8 : index
    %c0_80 = arith.constant 0 : index
    %c0_81 = arith.constant 0 : index
    %76 = vector.load %arg5[%c8, %c0_80, %c0_81] : memref<9x4x4xbf16, #tpu.memory_space<vmem>>, vector<1x4x4xbf16>
    %77 = vector.shape_cast %76 : vector<1x4x4xbf16> to vector<4x4xbf16>
    %cst_82 = arith.constant dense<0.000000e+00> : vector<256x4xf32>
    %78 = tpu.matmul %75, %77, %cst_82 {dimension_numbers = #tpu.dot_dimension_numbers<[1], [0], [0], [1], [0, 0, 1, 1], [], []>} : vector<256x4xbf16>, vector<4x4xbf16>, vector<256x4xf32> -> vector<256x4xf32>
    %79 = arith.addf %73, %78 : vector<256x4xf32>
    %c0_83 = arith.constant 0 : index
    %c0_84 = arith.constant 0 : index
    %80 = vector.load %arg6[%c0_83, %c0_84] : memref<1x4xf32, #tpu.memory_space<vmem>>, vector<1x4xf32>
    %81 = vector.broadcast %80 : vector<1x4xf32> to vector<256x4xf32>
    %82 = arith.mulf %79, %81 : vector<256x4xf32>
    %c0_85 = arith.constant 0 : index
    %c0_86 = arith.constant 0 : index
    %83 = vector.load %arg7[%c0_85, %c0_86] : memref<1x4xf32, #tpu.memory_space<vmem>>, vector<1x4xf32>
    %84 = vector.broadcast %83 : vector<1x4xf32> to vector<256x4xf32>
    %85 = arith.addf %82, %84 : vector<256x4xf32>
    %cst_87 = arith.constant 0.000000e+00 : f32
    %86 = vector.broadcast %cst_87 : f32 to vector<256x4xf32>
    %87 = arith.maximumf %85, %86 : vector<256x4xf32>
    %88 = tpu.transpose %87, [1, 0] : vector<256x4xf32> -> vector<4x256xf32>
    %89 = arith.truncf %88 : vector<4x256xf32> to vector<4x256xbf16>
    %c0_88 = arith.constant 0 : index
    %c0_89 = arith.constant 0 : index
    %90 = vector.load %arg8[%c0_88, %c0_89] : memref<16x4xbf16, #tpu.memory_space<vmem>>, vector<16x4xbf16>
    %cst_90 = arith.constant dense<0.000000e+00> : vector<16x256xf32>
    %91 = tpu.matmul %90, %89, %cst_90 {dimension_numbers = #tpu.dot_dimension_numbers<[1], [0], [0], [1], [0, 0, 1, 1], [], []>} : vector<16x4xbf16>, vector<4x256xbf16>, vector<16x256xf32> -> vector<16x256xf32>
    %c0_91 = arith.constant 0 : index
    %c0_92 = arith.constant 0 : index
    %92 = vector.load %arg9[%c0_91, %c0_92] : memref<16x1xf32, #tpu.memory_space<vmem>>, vector<16x1xf32>
    %93 = vector.broadcast %92 : vector<16x1xf32> to vector<16x256xf32>
    %94 = arith.mulf %91, %93 : vector<16x256xf32>
    %c0_93 = arith.constant 0 : index
    %c0_94 = arith.constant 0 : index
    %95 = vector.load %arg10[%c0_93, %c0_94] : memref<16x1xf32, #tpu.memory_space<vmem>>, vector<16x1xf32>
    %96 = vector.broadcast %95 : vector<16x1xf32> to vector<16x256xf32>
    %97 = arith.addf %94, %96 : vector<16x256xf32>
    %c0_95 = arith.constant 0 : index
    %c0_96 = arith.constant 0 : index
    %c0_97 = arith.constant 0 : index
    %98 = vector.load %arg1[%c0_95, %c0_96, %c0_97] : memref<1x16x256xf32, #tpu.memory_space<vmem>>, vector<1x16x256xf32>
    %99 = vector.shape_cast %98 : vector<1x16x256xf32> to vector<16x256xf32>
    %100 = arith.addf %97, %99 : vector<16x256xf32>
    %cst_98 = arith.constant 0.000000e+00 : f32
    %101 = vector.broadcast %cst_98 : f32 to vector<16x256xf32>
    %102 = arith.maximumf %100, %101 : vector<16x256xf32>
    %103 = arith.truncf %102 : vector<16x256xf32> to vector<16x256xbf16>
    %c0_99 = arith.constant 0 : index
    %c0_100 = arith.constant 0 : index
    %c0_101 = arith.constant 0 : index
    %104 = vector.load %arg11[%c0_99, %c0_100, %c0_101] : memref<1x16x256xbf16, #tpu.memory_space<vmem>>, vector<1x16x256xbf16>
    %105 = vector.shape_cast %104 : vector<1x16x256xbf16> to vector<16x256xbf16>
    %106 = vector.shape_cast %103 : vector<16x256xbf16> to vector<1x16x256xbf16>
    tpu.vector_store %arg11[%c0_99, %c0_100, %c0_101], %106 {strides = array<i32>} : memref<1x16x256xbf16, #tpu.memory_space<vmem>>, vector<1x16x256xbf16>,
    return
  }
  func.func @transform_0(%arg0: i32) -> (i32, i32, i32) {
    %c0_i32 = arith.constant 0 : i32
    %c0_i32_0 = arith.constant 0 : i32
    %c0_i32_1 = arith.constant 0 : i32
    return %arg0, %c0_i32, %c0_i32_0 : i32, i32, i32
  }
  func.func @transform_1(%arg0: i32) -> (i32, i32) {
    %c0_i32 = arith.constant 0 : i32
    %c0_i32_0 = arith.constant 0 : i32
    %c0_i32_1 = arith.constant 0 : i32
    return %c0_i32, %c0_i32_0 : i32, i32
  }
  func.func @transform_2(%arg0: i32) -> (i32, i32) {
    %c0_i32 = arith.constant 0 : i32
    %c0_i32_0 = arith.constant 0 : i32
    %c0_i32_1 = arith.constant 0 : i32
    return %c0_i32, %c0_i32_0 : i32, i32
  }
  func.func @transform_3(%arg0: i32) -> (i32, i32) {
    %c0_i32 = arith.constant 0 : i32
    %c0_i32_0 = arith.constant 0 : i32
    %c0_i32_1 = arith.constant 0 : i32
    return %c0_i32, %c0_i32_0 : i32, i32
  }
  func.func @transform_4(%arg0: i32) -> (i32, i32, i32) {
    %c0_i32 = arith.constant 0 : i32
    %c0_i32_0 = arith.constant 0 : i32
    %c0_i32_1 = arith.constant 0 : i32
    %c0_i32_2 = arith.constant 0 : i32
    return %c0_i32, %c0_i32_0, %c0_i32_1 : i32, i32, i32
  }
  func.func @transform_5(%arg0: i32) -> (i32, i32) {
    %c0_i32 = arith.constant 0 : i32
    %c0_i32_0 = arith.constant 0 : i32
    %c0_i32_1 = arith.constant 0 : i32
    return %c0_i32, %c0_i32_0 : i32, i32
  }
  func.func @transform_6(%arg0: i32) -> (i32, i32) {
    %c0_i32 = arith.constant 0 : i32
    %c0_i32_0 = arith.constant 0 : i32
    %c0_i32_1 = arith.constant 0 : i32
    return %c0_i32, %c0_i32_0 : i32, i32
  }
  func.func @transform_7(%arg0: i32) -> (i32, i32) {
    %c0_i32 = arith.constant 0 : i32
    %c0_i32_0 = arith.constant 0 : i32
    %c0_i32_1 = arith.constant 0 : i32
    return %c0_i32, %c0_i32_0 : i32, i32
  }
  func.func @transform_8(%arg0: i32) -> (i32, i32) {
    %c0_i32 = arith.constant 0 : i32
    %c0_i32_0 = arith.constant 0 : i32
    %c0_i32_1 = arith.constant 0 : i32
    return %c0_i32, %c0_i32_0 : i32, i32
  }
  func.func @transform_9(%arg0: i32) -> (i32, i32) {
    %c0_i32 = arith.constant 0 : i32
    %c0_i32_0 = arith.constant 0 : i32
    %c0_i32_1 = arith.constant 0 : i32
    return %c0_i32, %c0_i32_0 : i32, i32
  }
  func.func @transform_10(%arg0: i32) -> (i32, i32, i32) {
    %c0_i32 = arith.constant 0 : i32
    %c0_i32_0 = arith.constant 0 : i32
    %c0_i32_1 = arith.constant 0 : i32
    return %arg0, %c0_i32, %c0_i32_0 : i32, i32, i32
  }
}

</mosaic_0001>

<bundles_post_ra>
// kernel: tpu_custom_call.1
= control target key start
LH: loop header
LB: loop body
LE: loop exit
PB: predicated region body
PF: predicated region fallthrough
CT: control target
= control target key end

     0   :  { %15 = vsyncpa [#allocation4], 0  ;;  %s8329_s0 = inlined_call_operand.hbm [shape: f32[2,16,256], index: 0, kind: input, shape index: {}]   ;;  %s8330_s1 = inlined_call_operand.vmem [shape: bf16[4,16], index: 1, kind: input, shape index: {}]   ;;  %s8331_s2 = inlined_call_operand.vmem [shape: f32[4,1], index: 2, kind: input, shape index: {}]   ;;  %s8332_s3 = inlined_call_operand.vmem [shape: f32[4,1], index: 3, kind: input, shape index: {}]   ;;  %s8333_s4 = inlined_call_operand.vmem [shape: bf16[9,4,4], index: 4, kind: input, shape index: {}]   ;;  %s8334_s5 = inlined_call_operand.vmem [shape: f32[1,4], index: 5, kind: input, shape index: {}]   ;;  %s8335_s6 = inlined_call_operand.vmem [shape: f32[1,4], index: 6, kind: input, shape index: {}]   ;;  %s8336_s7 = inlined_call_operand.vmem [shape: bf16[16,4], index: 7, kind: input, shape index: {}]   ;;  %s8337_s8 = inlined_call_operand.vmem [shape: f32[16,1], index: 8, kind: input, shape index: {}]   ;;  %s8338_s9 = inlined_call_operand.vmem [shape: f32[16,1], index: 9, kind: input, shape index: {}]   ;;  %s8339_s10 = inlined_call_operand.hbm [shape: bf16[2,16,256], index: 10, kind: output, shape index: {}]  }
   0x1   :  { %17 = vsyncpa [#allocation4 + $0x1], 0 }
   0x2   :  { %18 = vsyncpa [#allocation5], 0 }
   0x3   :  { %20 = vsyncpa [#allocation5 + $0x1], 0  ;;  %s6203_s13 = smov 0   ;;  %s6205_s14 = smov 0  }
   0x4   :  { %s6207_s15 = smov 0   ;;  %s6209_s16 = smov 0  }
   0x5 LB: > { %8345 = sst [smem:[#allocation9_spill]] %s6137_s15  ;;  %s6224_s17 = sadd.s32 4294967295, %s6141_s16   ;;  %s6141_s16 = sphi %s6209_s16, %s8470_s16   ;;  %s6137_s15 = sphi %s6207_s15, %s8472_s15   ;;  %s6133_s14 = sphi %s6205_s14, %s8474_s14   ;;  %s6129_s13 = sphi %s6203_s13, %s8473_s13  }
   0x6   : > { %s5352_s18 = sadd.s32 4294967294, %s6141_s16   ;;  %s6228_s19 = sadd.s32 1, %s6141_s16  }
   0x7   : > { %8346 = sst [smem:[#allocation10_spill]] %s6228_s19  ;;  %s33_s20 = sadd.s32 1, %s6137_s15 }
   0x8   : > { %s30_s21 = ssub.s32 %s6141_s16, %s6228_s19  ;;  %p40_p0 = scmp.ne.s32.totalorder %s6137_s15, %s6133_s14 }
   0x9   : > { %p31_p1 = scmp.eq.s32.totalorder %s30_s21, 0  ;;  %p41_p2 = scmp.eq.s32.totalorder %s6141_s16, 0 }
   0xa   : > { %p46_p3 = scmp.ne.s32.totalorder %s6133_s14, %s6129_s13  ;;  %p47_p4 = scmp.eq.s32.totalorder %s6224_s17, 0 }
   0xb   : > { %s6240_s22 = scalar_select %p31_p1, %s6137_s15, %s33_s20  }
   0xc   : > { %p6242_p5 = por %p41_p2, %p40_p0  ;;  %p6246_p6 = por %p47_p4, %p46_p3 }
   0xd   : > { %8347 = sst [smem:[#allocation11_spill]] %s6240_s22  ;;  %p259_p7 = scmp.eq.s32.totalorder %s6224_s17, 1 }
   0xe   : > { %p265_p8 = scmp.eq.s32.totalorder %s5352_s18, 1  ;;  %p5832_p10 = scmp.lt.s32.totalorder %s6141_s16, 2 }
   0xf   : > { %p6253_p11 = por %p259_p7, %p40_p0  ;;  %s312_s27 = sand.u32 1, %s6137_s15  }
  0x10   : > { %p6257_p12 = por %p265_p8, %p46_p3  ;;  %s5766_s28 = sshll.u32 %s6141_s16, 5 }
  0x11   : > { %s5355_s29 = sshll.u32 %s312_s27, 5  ;;  %s321_s12 = scalar_lea.hbm %s8329_s0, %s5766_s28 }
  0x12   : > { %s8351_s26 = scalar_select %p6257_p12, 1, 0 }
  0x13   : > { %s322_s20 = sshll.u32 %s321_s12, 4  ;;  %s316_s18 = scalar_lea.vmem [#allocation3], %s5355_s29  ;;  %s323_s20 = int_to_ptr.hbm [resolvable:$true] %s322_s20 }
  0x14   : > { %8352 = sst [smem:[#allocation12_spill]] %s8351_s26  ;;  %s324_s21 = sshll.u32 %s316_s18, 4  ;;  %s325_s21 = int_to_ptr.vmem [resolvable:$true] %s324_s21 }
  0x15   : > { %p6268_p13 = pnand %p5832_p10, %p6242_p5  ;;  %p5358_p0 = scmp.ge.s32.totalorder %s6141_s16, 1 }
  0x16   : > { %p332_p1 = scmp.lt.s32.totalorder %s6141_s16, 3  ;;  %s313_s15 = scalar_lea.sflag [#allocation4], %s312_s27 }
  0x17   : > { %s6045_s19 = sshra.s32 %s323_s20, 4  ;;  %p6049_p3 = pneg %p6268_p13  ;;  %s6046_s19 = int_to_ptr.hbm [resolvable:$true] %s6045_s19 }
  0x18   : > { %s6047_s26 = scalar_lea.hbm %s6046_s19, 32  ;;  %s6052_s23 = scalar_lea.hbm %s8329_s0, 64 }
  0x19   : > { %p6048_p2 = scmp.ne.s32.totalorder %s6046_s19, %s6047_s26  ;;  %p6053_p5 = scmp.lt.s32.totalorder %s6046_s19, %s8329_s0 }
  0x1a   : > { %p6054_p8 = scmp.lt.s32.totalorder %s6052_s23, %s6047_s26 }
  0x1b   : > { %p6050_p4 = pnand %p6049_p3, %p6048_p2 }
  0x1c   : > { %p6055_p10 = por %p6054_p8, %p6053_p5 }
  0x1d   : > { %p6051_p7 = pneg %p6050_p4 }
  0x1f   : > { %p6056_p9 = pnand %p6055_p10, %p6051_p7 }
  0x21   : > { %6059 = shalt.err (!%p6056_p9)
}
  0x22   : > { %s6143_s27 = smov 256   ;;  %s6144_s12 = smov 16  }
  0x23   : > { %5827 = dma.hbm_to_vmem [thread:$0]  (!%p6268_p13), %s323_s20, 512, %s325_s21, %s313_s15, %s6143_s27, %s6143_s27, %s6144_s12  }
  0x24   : > { %p333_p2 = pnand %p5358_p0, %p332_p1 }
  0x26   : > { %336 = sbr.rel (%p333_p2) target bundleno = 1443 (0x5a3), region = 60 }
  0x2b   : > { %s6289_s18 = sand.u32 1, %s6133_s14  }
  0x2c   : > { %s5359_s19 = sshll.u32 %s6289_s18, 5  ;;  %s339_s26 = scalar_lea.sflag [#allocation4], %s6289_s18 }
  0x2d   : > { %s6293_s28 = scalar_lea.vmem [#allocation3], %s5359_s19 }
  0x2e   : > { %6120 = dma.done.wait (%p6246_p6), %s339_s26, 512  }
  0x2f   : > { %6122 = vsyncadd (%p6246_p6), %s339_s26, 4294966784  ;;  %vm384_vm0 = vcmask 24576   ;;  %vm381_vm1 = vcmask 27648   ;;  %v6145_v0 = vmov 0   ;;  %vm391_vm2 = vsmask.f32 256 }
  0x30   : > { %5872 = vset.pattern.permute.xlu0 %v6145_v0  ;;  %382 = vst.msk [vmem:[#allocation2] sm:$0xf] %vm381_vm1, %v6145_v0  ;;  %5992 = vset.pattern.permute.xlu2 %v6145_v0  ;;  %vm447_vm3 = vsmask.f32 7938  ;;  %vm6303_vm4 = vmand %vm384_vm0, %vm391_vm2  ;;  %v540_v3 = vld [vmem:[%s8331_s2] sm:$0xf] }
  0x31   : > { %383 = vst.msk [vmem:[#allocation2 + $0x4] sm:$0xf] %vm381_vm1, %v6145_v0  ;;  %vm6309_vm5 = vmand %vm384_vm0, %vm447_vm3  ;;  %v503_v4 = vld [vmem:[%s6293_s28] sm:$0xff]  ;;  %v505_v5 = vld [vmem:[%s6293_s28 + $0x10] sm:$0xff]  ;;  %543 = vperm.xlu0 %5872, %v540_v3   ;;  %vm510_vm6 = vcmask 130048   ;;  %vm1626_vm10 = vcmask 1041408  }
  0x32   : > { %385 = vst.msk [vmem:[#allocation2 + $0x8] sm:$0x1] %vm384_vm0, %v6145_v0  ;;  %v507_v7 = vpack.c.bf16 %v505_v5, %v503_v4  ;;  %v504_v8 = vld [vmem:[%s6293_s28 + $0x8] sm:$0xff]  ;;  %v506_v9 = vld [vmem:[%s6293_s28 + $0x18] sm:$0xff]  ;;  %v396_v34 = vld [vmem:[#allocation2 + $0xc] sm:$0x1] }
  0x33   : > { %387 = vst.msk [vmem:[#allocation2 + $0xcc] sm:$0xf] %vm381_vm1, %v6145_v0  ;;  %v508_v11 = vpack.c.bf16 %v506_v9, %v504_v8  ;;  %v509_v12 = vld [vmem:[%s8330_s1] sm:$0x3]  ;;  %v420_v35 = vld [vmem:[#allocation2 + $0x6c] sm:$0x1]  ;;  %vm6377_vm12 = vmand %vm381_vm1, %vm447_vm3 }
  0x34   : > { %388 = vst.msk [vmem:[#allocation2 + $0xd0] sm:$0xf] %vm381_vm1, %v6145_v0  ;;  %521 = vmatpush.bf16.msra.mxu0 %v507_v7  ;;  %v548_v18 = vld [vmem:[%s8332_s3] sm:$0xf]  ;;  %v397_v36 = vsel %vm6303_vm4, 0, %v396_v34  ;;  %v421_v37 = vsel %vm6303_vm4, 0, %v420_v35 }
  0x35   : > { %389 = vst.msk [vmem:[#allocation2 + $0xd4] sm:$0x1] %vm384_vm0, %v6145_v0  ;;  %534 = vmatpush.bf16.msra.mxu1 %v508_v11  ;;  %v5231_v20 = vld [vmem:[%s8338_s9] sm:$0xff]  ;;  %v452_v38 = vld [vmem:[#allocation2 + $0x14] sm:$0x1]  ;;  %vm1577_vm11 = vcmask 31744  }
  0x36   : > { %398 = vst [vmem:[#allocation2 + $0xc] sm:$0x1] %v397_v36  ;;  %v476_v39 = vld [vmem:[#allocation2 + $0x74] sm:$0x1]  ;;  %v453_v40 = vsel %vm6309_vm5, 0, %v452_v38  ;;  %vm1987_vm15 = vcmask 1042432  }
  0x37   : > { %v393_v6 = vld [vmem:[#allocation2] sm:$0x1]  ;;  %5361 = vmatmul.msk.bf16.vlgmr.msra.gmra.mxu0 %vm510_vm6, %v509_v12  ;;  %422 = vst [vmem:[#allocation2 + $0x6c] sm:$0x1] %v421_v37  ;;  %v477_v41 = vsel %vm6309_vm5, 0, %v476_v39  ;;  %vm1988_vm0 = vcmask 1046532  }
  0x38   : > { %v394_v10 = vsel %vm6303_vm4, 0, %v393_v6  ;;  %5362 = vmatmul.msk.bf16.vlgmr.msra.gmra.mxu1 %vm510_vm6, %v509_v12  ;;  %454 = vst [vmem:[#allocation2 + $0x14] sm:$0x1] %v453_v40  ;;  %v6345_v43 = vld [vmem:[#allocation2 + $0x4] sm:$0xf]  ;;  %s5360_s26 = sshll.u32 %s6289_s18, 4 }
  0x39   : > { %395 = vst [vmem:[#allocation2] sm:$0x1] %v394_v10  ;;  %v449_v13 = vld [vmem:[#allocation2 + $0x8] sm:$0x1]  ;;  %551 = vperm.xlu0 %5872, %v548_v18   ;;  %v1153_v46 = vshll.u32 %v6345_v43, 16  ;;  %v1157_v47 = vshrl.u32 %v6345_v43, 16 }
  0x3a   : > { %v444_v14 = vld [vmem:[#allocation2 + $0xcc] sm:$0x1]  ;;  %v450_v15 = vsel %vm6309_vm5, 0, %v449_v13  ;;  %478 = vst [vmem:[#allocation2 + $0x74] sm:$0x1] %v477_v41  ;;  %s379_s15 = scalar_lea.vmem [#allocation6], %s5360_s26 }
  0x3b   : > { %v445_v16 = vsel %vm6303_vm4, 0, %v444_v14  ;;  %451 = vst [vmem:[#allocation2 + $0x8] sm:$0x1] %v450_v15  ;;  %v1155_v50 = vrot.slane %v1153_v46, 5  ;;  %v1159_v51 = vrot.slane %v1157_v47, 4  ;;  %s5816_s22 = sshll.u32 %s6224_s17, 4 }
  0x3c   : > { %446 = vst [vmem:[#allocation2 + $0xcc] sm:$0x1] %v445_v16  ;;  %v500_v17 = vld [vmem:[#allocation2 + $0xd4] sm:$0x1]  ;;  %v399_v56 = vld [vmem:[#allocation2 + $0x18] sm:$0x1]  ;;  %s5275_s21 = scalar_lea.hbm %s8339_s10, %s5816_s22 }
  0x3d   : > { %v501_v19 = vsel %vm6309_vm5, 0, %v500_v17  ;;  %v1160_v54 = vor.u32 %v1159_v51, %v1155_v50  ;;  %v423_v57 = vld [vmem:[#allocation2 + $0x78] sm:$0x1]  ;;  %v400_v58 = vsel %vm6303_vm4, 0, %v399_v56  ;;  %vm1140_vm7 = vsmask.f32 3328 }
  0x3e   : > { %502 = vst [vmem:[#allocation2 + $0xd4] sm:$0x1] %v501_v19  ;;  %v424_v59 = vsel %vm6303_vm4, 0, %v423_v57  ;;  %vm1141_vm8 = vsmask.f32 7440  ;;  %s5276_s29 = sshll.u32 %s379_s15, 4  ;;  %s5277_s29 = int_to_ptr.vmem [resolvable:$true] %s5276_s29 }
  0x3f   : > { %401 = vst [vmem:[#allocation2 + $0x18] sm:$0x1] %v400_v58  ;;  %vm6356_vm9 = vmor %vm1140_vm7, %vm1141_vm8  ;;  %v1161_v62 = vrot.slane %v1160_v54, 4  ;;  %v5363_v0 = vld [vmem:[%s8333_s4 + $0x2] sm:$0x3]  ;;  %s5278_s23 = sshll.u32 %s5275_s21, 4  ;;  %s5279_s23 = int_to_ptr.hbm [resolvable:$true] %s5278_s23 }
  0x40   : > { %v1091_v42 = vld [vmem:[#allocation2] sm:$0xf]  ;;  %425 = vst [vmem:[#allocation2 + $0x78] sm:$0x1] %v424_v59  ;;  %v1628_v3 = vsel %vm1626_vm10, %v5363_v0, 0  ;;  %s5264_s17 = scalar_lea.sflag [#allocation5], %s6289_s18 }
  0x41   : > { %5235 = vperm.xlu0 %5872, %v5231_v20   ;;  %v1144_v44 = vshrl.u32 %v1091_v42, 16  ;;  %v1147_v45 = vshll.u32 %v1091_v42, 16  ;;  %1637 = vmatpush.bf16.msrb.mxu0 %v1628_v3  ;;  %v455_v9 = vld [vmem:[#allocation2 + $0x20] sm:$0x1]  ;;  %v402_v20 = vld [vmem:[#allocation2 + $0x24] sm:$0x1] }
  0x42   : > { %v6349_v52 = vld [vmem:[#allocation2 + $0x8] sm:$0x1]  ;;  %5817 = vmatpush.bf16.msrb.mxu1 %v1628_v3  ;;  %5819 = vmatpush.bf16.msra.mxu3 %v1628_v3  ;;  %v479_v10 = vld [vmem:[#allocation2 + $0x80] sm:$0x1]  ;;  %v456_v11 = vsel %vm6309_vm5, 0, %v455_v9  ;;  %s6095_s12 = scalar_lea.hbm %s8339_s10, 32 }
  0x43   : > { %v1146_v48 = vrot.slane %v1144_v44, 4  ;;  %v1149_v49 = vrot.slane %v1147_v45, 5  ;;  %v1163_v55 = vshll.u32 %v6349_v52, 16  ;;  %5818 = vmatpush.bf16.msra.mxu2 %v1628_v3  ;;  %v480_v12 = vsel %vm6309_vm5, 0, %v479_v10  ;;  %457 = vst [vmem:[#allocation2 + $0x20] sm:$0x1] %v456_v11 }
  0x44   : > { %481 = vst [vmem:[#allocation2 + $0x80] sm:$0x1] %v480_v12  ;;  %v458_v40 = vld [vmem:[#allocation2 + $0x2c] sm:$0x1]  ;;  %vm654_vm13 = vsmask.f32 4368 }
  0x45   : > { %v1150_v53 = vor.u32 %v1149_v49, %v1146_v48  ;;  %v1165_v63 = vrot.slane %v1163_v55, 5  ;;  %v482_v41 = vld [vmem:[#allocation2 + $0x8c] sm:$0x1]  ;;  %v459_v47 = vsel %vm6309_vm5, 0, %v458_v40  ;;  %vm6392_vm14 = vmor %vm391_vm2, %vm654_vm13  ;;  %v983_v56 = vld [vmem:[#allocation2 + $0x14] sm:$0x1] }
  0x46   : > { %v483_v48 = vsel %vm6309_vm5, 0, %v482_v41  ;;  %460 = vst [vmem:[#allocation2 + $0x2c] sm:$0x1] %v459_v47  ;;  %v1039_v0 = vld [vmem:[#allocation2 + $0x74] sm:$0x1]  ;;  %vm6529_vm2 = vmor %vm1987_vm15, %vm1988_vm0 }
  0x47   : > { %v1151_v61 = vrot.slane %v1150_v53, 4  ;;  %v1166_v5 = vsel %vm6356_vm9, %v1161_v62, %v1165_v63  ;;  %484 = vst [vmem:[#allocation2 + $0x8c] sm:$0x1] %v483_v48  ;;  %v5493_v55 = vld [vmem:[%s8333_s4 + $0x6] sm:$0x3] }
  0x48   : > { %v1530_v7 = vunpack.c.l.b16 %v1166_v5 }
  0x49   : > { %v1156_v4 = vsel %vm6356_vm9, %v1151_v61, %v1155_v50 }
  0x4a   : > { %v1529_v6 = vunpack.c.l.b16 %v1156_v4 }
  0x4c   : > { %v1561_v8 = vpack.c.b16 %v1530_v7, %v1529_v6 }
  0x4e   : > { %5364 = vmatmul.msk.bf16.vlgmr.msrb.gmra.mxu0 %vm1577_vm11, %v1561_v8 }
  0xa3   : > { %v544_v21 = vpop.permute.xlu0 %543 }
  0xab   : > { %v552_v25 = vpop.permute.xlu0 %551 }
  0xb4   : > { %v523_v22 = vpop.f32.mrf.mxu0 }
  0xb5   : > { %v546_v23 = vmul.f32 %v544_v21, %v523_v22  ;;  %v536_v24 = vpop.f32.mrf.mxu1  ;;  %v426_v22 = vld [vmem:[#allocation2 + $0x84] sm:$0x1] }
  0xb6   : > { %v547_v26 = vmul.f32 %v544_v21, %v536_v24  ;;  %v403_v21 = vsel %vm6303_vm4, 0, %v402_v20 }
  0xb7   : > { %v554_v27 = vadd.f32 %v552_v25, %v546_v23  ;;  %404 = vst [vmem:[#allocation2 + $0x24] sm:$0x1] %v403_v21 }
  0xb8   : > { %v555_v28 = vadd.f32 %v552_v25, %v547_v26 }
  0xb9   : > { %v556_v29 = vmax.f32 %v554_v27, 0.0 }
  0xba   : > { %v557_v30 = vmax.f32 %v555_v28, 0.0  ;;  %v979_v28 = vld [vmem:[#allocation2 + $0xc] sm:$0xf] }
  0xbc   : > { %v525_v31 = vpop.f32.mrf.mxu0  ;;  %v5873_v32 = vpack.i.bf16 %v557_v30, %v556_v29  ;;  %v1035_v29 = vld [vmem:[#allocation2 + $0x6c] sm:$0xf] }
  0xbd   : > { %v538_v33 = vpop.f32.mrf.mxu1  ;;  %v427_v31 = vsel %vm6303_vm4, 0, %v426_v22 }
  0xbe   : > { %5874 = vxpose.xlu1.b32.start.end [1/1] (short) %v5873_v32, 128  ;;  %428 = vst [vmem:[#allocation2 + $0x84] sm:$0x1] %v427_v31 }
 0x162   : > { %v5875_v13 = vpop.trf.xlu1 }
 0x163   : > { %v5879_v14 = vunpack.i.h.bf16 %v5875_v13  ;;  %v5876_v15 = vunpack.i.l.bf16 %v5875_v13 }
 0x165   : > { %v638_v16 = vpack.c.bf16 %v5879_v14, %v5879_v14  ;;  %v622_v17 = vpack.c.bf16 %v5876_v15, %v5876_v15 }
 0x167   : > { %v793_v18 = vshrl.u32 %v638_v16, 16  ;;  %v657_v19 = vshrl.u32 %v622_v17, 16  ;;  %v796_v24 = vshll.u32 %v638_v16, 16  ;;  %v660_v26 = vshll.u32 %v622_v17, 16 }
 0x169   : > { %v795_v23 = vrot.slane %v793_v18, 7  ;;  %v659_v25 = vrot.slane %v657_v19, 7  ;;  %v986_v18 = vld [vmem:[#allocation2 + $0x18] sm:$0xf] }
 0x16a   : > { %v5880_v30 = vpop.trf.xlu1  ;;  %v1042_v19 = vld [vmem:[#allocation2 + $0x78] sm:$0xf] }
 0x16b   : > { %v798_v32 = vor.u32 %v796_v24, %v795_v23  ;;  %v662_v33 = vor.u32 %v660_v26, %v659_v25  ;;  %v5884_v34 = vunpack.i.h.bf16 %v5880_v30  ;;  %v5881_v35 = vunpack.i.l.bf16 %v5880_v30  ;;  %v405_v24 = vld [vmem:[#allocation2 + $0x30] sm:$0x1] }
 0x16c   : > { %v799_v45 = vrot.slane %v795_v23, 4  ;;  %v663_v46 = vrot.slane %v659_v25, 4  ;;  %v429_v25 = vld [vmem:[#allocation2 + $0x90] sm:$0x1] }
 0x16d   : > { %v980_v36 = vsel %vm6377_vm12, %v662_v33, %v979_v28  ;;  %v1036_v37 = vsel %vm6377_vm12, %v798_v32, %v1035_v29  ;;  %v639_v38 = vpack.c.bf16 %v5884_v34, %v5884_v34  ;;  %v623_v39 = vpack.c.bf16 %v5881_v35, %v5881_v35 }
 0x16e   : > { %981 = vst [vmem:[#allocation2 + $0xc] sm:$0xf] %v980_v36  ;;  %v406_v32 = vsel %vm6303_vm4, 0, %v405_v24 }
 0x16f   : > { %1037 = vst [vmem:[#allocation2 + $0x6c] sm:$0xf] %v1036_v37  ;;  %v801_v42 = vshrl.u32 %v639_v38, 16  ;;  %v665_v44 = vshrl.u32 %v623_v39, 16  ;;  %v804_v50 = vshll.u32 %v639_v38, 16  ;;  %v668_v53 = vshll.u32 %v623_v39, 16 }
 0x170   : > { %v430_v37 = vsel %vm6303_vm4, 0, %v429_v25  ;;  %v1995_v38 = vrot.slane %v6349_v52, 5  ;;  %407 = vst [vmem:[#allocation2 + $0x30] sm:$0x1] %v406_v32 }
 0x171   : > { %v803_v49 = vrot.slane %v801_v42, 7  ;;  %v667_v51 = vrot.slane %v665_v44, 7  ;;  %431 = vst [vmem:[#allocation2 + $0x90] sm:$0x1] %v430_v37 }
 0x172   : > { %v5885_v54 = vpop.trf.xlu1 }
 0x173   : > { %v5889_v57 = vunpack.i.h.bf16 %v5885_v54  ;;  %v5886_v58 = vunpack.i.l.bf16 %v5885_v54  ;;  %v806_v59 = vor.u32 %v804_v50, %v803_v49  ;;  %v808_v61 = vrot.slane %v803_v49, 4 }
 0x174   : > { %v670_v62 = vor.u32 %v668_v53, %v667_v51  ;;  %v672_v63 = vrot.slane %v667_v51, 4 }
 0x175   : > { %v640_v3 = vpack.c.bf16 %v5889_v57, %v5889_v57  ;;  %v624_v4 = vpack.c.bf16 %v5886_v58, %v5886_v58  ;;  %v1093_v5 = vld [vmem:[#allocation2 + $0xc] sm:$0xf]  ;;  %v807_v7 = vsel %vm6392_vm14, %v799_v45, %v806_v59  ;;  %v1040_v9 = vsel %vm6303_vm4, %v808_v61, %v1039_v0  ;;  %v990_v57 = vld [vmem:[#allocation2 + $0x20] sm:$0x1] }
 0x176   : > { %v671_v6 = vsel %vm6392_vm14, %v663_v46, %v670_v62  ;;  %v984_v8 = vsel %vm6303_vm4, %v672_v63, %v983_v56  ;;  %v1168_v13 = vshrl.u32 %v1093_v5, 16  ;;  %1038 = vst.msk [vmem:[#allocation2 + $0x70] sm:$0xf] %vm381_vm1, %v807_v7  ;;  %v1171_v17 = vshll.u32 %v1093_v5, 16  ;;  %v6412_v33 = vld [vmem:[#allocation2 + $0xc] sm:$0xe] }
 0x177   : > { %982 = vst.msk [vmem:[#allocation2 + $0x10] sm:$0xf] %vm381_vm1, %v671_v6  ;;  %v810_v10 = vshrl.u32 %v640_v3, 16  ;;  %v674_v11 = vshrl.u32 %v624_v4, 16  ;;  %v813_v12 = vshll.u32 %v640_v3, 16  ;;  %v677_v16 = vshll.u32 %v624_v4, 16 }
 0x178   : > { %985 = vst [vmem:[#allocation2 + $0x14] sm:$0x1] %v984_v8  ;;  %v1170_v23 = vrot.slane %v1168_v13, 4  ;;  %v1173_v31 = vrot.slane %v1171_v17, 5  ;;  %v5461_v44 = vrot.slane %v6412_v33, 9 }
 0x179   : > { %v812_v14 = vrot.slane %v810_v10, 7  ;;  %v676_v15 = vrot.slane %v674_v11, 7  ;;  %1041 = vst [vmem:[#allocation2 + $0x74] sm:$0x1] %v1040_v9  ;;  %v1046_v3 = vld [vmem:[#allocation2 + $0x80] sm:$0x1] }
 0x17a   : > { %v5890_v20 = vpop.trf.xlu1  ;;  %v1174_v47 = vor.u32 %v1173_v31, %v1170_v23  ;;  %v461_v8 = vld [vmem:[#allocation2 + $0x38] sm:$0x1] }
 0x17b   : > { %v815_v21 = vor.u32 %v813_v12, %v812_v14  ;;  %v679_v22 = vor.u32 %v677_v16, %v676_v15  ;;  %v5894_v26 = vunpack.i.h.bf16 %v5890_v20  ;;  %v5891_v28 = vunpack.i.l.bf16 %v5890_v20  ;;  %v485_v13 = vld [vmem:[#allocation2 + $0x98] sm:$0x1]  ;;  %v1049_v20 = vld [vmem:[#allocation2 + $0x84] sm:$0xf] }
 0x17c   : > { %v816_v40 = vrot.slane %v812_v14, 4  ;;  %v680_v45 = vrot.slane %v676_v15, 4  ;;  %v1175_v12 = vrot.slane %v1174_v47, 4  ;;  %v462_v23 = vsel %vm6309_vm5, 0, %v461_v8 }
 0x17d   : > { %v987_v29 = vsel %vm6377_vm12, %v679_v22, %v986_v18  ;;  %v1043_v30 = vsel %vm6377_vm12, %v815_v21, %v1042_v19  ;;  %v641_v34 = vpack.c.bf16 %v5894_v26, %v5894_v26  ;;  %v625_v35 = vpack.c.bf16 %v5891_v28, %v5891_v28  ;;  %v993_v19 = vld [vmem:[#allocation2 + $0x24] sm:$0xf]  ;;  %463 = vst [vmem:[#allocation2 + $0x38] sm:$0x1] %v462_v23 }
 0x17e   : > { %988 = vst [vmem:[#allocation2 + $0x18] sm:$0xf] %v987_v29  ;;  %v6414_v36 = vld [vmem:[#allocation2 + $0x10] sm:$0xf]  ;;  %v486_v31 = vsel %vm6309_vm5, 0, %v485_v13 }
 0x17f   : > { %1044 = vst [vmem:[#allocation2 + $0x78] sm:$0xf] %v1043_v30  ;;  %v1177_v39 = vshll.u32 %v6414_v36, 16  ;;  %v818_v41 = vshrl.u32 %v641_v34, 16  ;;  %v682_v42 = vshrl.u32 %v625_v35, 16  ;;  %v821_v46 = vshll.u32 %v641_v34, 16 }
 0x180   : > { %v1181_v48 = vshrl.u32 %v6414_v36, 16  ;;  %v685_v51 = vshll.u32 %v625_v35, 16  ;;  %v6422_v54 = vld [vmem:[#allocation2 + $0x14] sm:$0x1]  ;;  %487 = vst [vmem:[#allocation2 + $0x98] sm:$0x1] %v486_v31 }
 0x181   : > { %v820_v49 = vrot.slane %v818_v41, 7  ;;  %v684_v50 = vrot.slane %v682_v42, 7  ;;  %v1179_v56 = vrot.slane %v1177_v39, 5  ;;  %v1187_v7 = vshll.u32 %v6422_v54, 16 }
 0x182   : > { %v5895_v53 = vpop.trf.xlu1  ;;  %v1183_v6 = vrot.slane %v1181_v48, 4 }
 0x183   : > { %v5899_v58 = vunpack.i.h.bf16 %v5895_v53  ;;  %v5896_v59 = vunpack.i.l.bf16 %v5895_v53  ;;  %v823_v61 = vor.u32 %v821_v46, %v820_v49  ;;  %v825_v62 = vrot.slane %v820_v49, 4  ;;  %v408_v49 = vld [vmem:[#allocation2 + $0x3c] sm:$0x1] }
 0x184   : > { %v687_v63 = vor.u32 %v685_v51, %v684_v50  ;;  %v689_v0 = vrot.slane %v684_v50, 4  ;;  %v1180_v21 = vsel %vm6356_vm9, %v1175_v12, %v1179_v56  ;;  %v1184_v22 = vor.u32 %v1183_v6, %v1179_v56 }
 0x185   : > { %v642_v4 = vpack.c.bf16 %v5899_v58, %v5899_v58  ;;  %v626_v5 = vpack.c.bf16 %v5896_v59, %v5896_v59  ;;  %v824_v10 = vsel %vm6392_vm14, %v816_v40, %v823_v61  ;;  %v1047_v14 = vsel %vm6303_vm4, %v825_v62, %v1046_v3  ;;  %v1095_v17 = vld [vmem:[#allocation2 + $0x18] sm:$0xf] }
 0x186   : > { %v688_v9 = vsel %vm6392_vm14, %v680_v45, %v687_v63  ;;  %v991_v11 = vsel %vm6303_vm4, %v689_v0, %v990_v57  ;;  %1045 = vst.msk [vmem:[#allocation2 + $0x7c] sm:$0xf] %vm381_vm1, %v824_v10  ;;  %v1189_v28 = vrot.slane %v1187_v7, 5  ;;  %v1185_v30 = vrot.slane %v1184_v22, 4 }
 0x187   : > { %989 = vst.msk [vmem:[#allocation2 + $0x1c] sm:$0xf] %vm381_vm1, %v688_v9  ;;  %v827_v15 = vshrl.u32 %v642_v4, 16  ;;  %v691_v16 = vshrl.u32 %v626_v5, 16  ;;  %v830_v18 = vshll.u32 %v642_v4, 16  ;;  %v694_v26 = vshll.u32 %v626_v5, 16 }
 0x188   : > { %992 = vst [vmem:[#allocation2 + $0x20] sm:$0x1] %v991_v11  ;;  %v1192_v32 = vshrl.u32 %v1095_v17, 16  ;;  %v1195_v34 = vshll.u32 %v1095_v17, 16  ;;  %v1190_v47 = vsel %vm6356_vm9, %v1185_v30, %v1189_v28  ;;  %v1531_v58 = vunpack.c.l.b16 %v1180_v21  ;;  %v1053_v21 = vld [vmem:[#allocation2 + $0x8c] sm:$0x1] }
 0x189   : > { %v6439_v24 = vrot.slane %v827_v15, 7  ;;  %v6441_v25 = vrot.slane %v691_v16, 7  ;;  %1048 = vst [vmem:[#allocation2 + $0x80] sm:$0x1] %v1047_v14  ;;  %v1532_v53 = vunpack.c.l.b16 %v1190_v47  ;;  %v409_v13 = vsel %vm6303_vm4, 0, %v408_v49 }
 0x18a   : > { %v5900_v29 = vpop.trf.xlu1  ;;  %v1194_v48 = vrot.slane %v1192_v32, 4  ;;  %v1197_v57 = vrot.slane %v1195_v34, 5  ;;  %v997_v14 = vld [vmem:[#allocation2 + $0x2c] sm:$0x1]  ;;  %410 = vst [vmem:[#allocation2 + $0x3c] sm:$0x1] %v409_v13 }
 0x18b   : > { %v832_v35 = vor.u32 %v830_v18, %v6439_v24  ;;  %v833_v37 = vrot.slane %v6439_v24, 4  ;;  %v696_v39 = vor.u32 %v694_v26, %v6441_v25  ;;  %v697_v40 = vrot.slane %v6441_v25, 4  ;;  %v432_v25 = vld [vmem:[#allocation2 + $0x9c] sm:$0x1]  ;;  %v5476_v26 = vld [vmem:[%s8333_s4 + $0x4] sm:$0x3] }
 0x18c   : > { %v5904_v41 = vunpack.i.h.bf16 %v5900_v29  ;;  %v5901_v42 = vunpack.i.l.bf16 %v5900_v29  ;;  %v1562_v5 = vpack.c.b16 %v1532_v53, %v1531_v58  ;;  %v1198_v6 = vor.u32 %v1197_v57, %v1194_v48  ;;  %v464_v34 = vld [vmem:[#allocation2 + $0x44] sm:$0x1] }
 0x18d   : > { %v994_v45 = vsel %vm6377_vm12, %v696_v39, %v993_v19  ;;  %v1050_v46 = vsel %vm6377_vm12, %v832_v35, %v1049_v20  ;;  %v1999_v28 = vrot.slane %v6414_v36, 5  ;;  %v488_v35 = vld [vmem:[#allocation2 + $0xa4] sm:$0x1]  ;;  %v433_v49 = vsel %vm6303_vm4, 0, %v432_v25 }
 0x18e   : > { %995 = vst [vmem:[#allocation2 + $0x24] sm:$0xf] %v994_v45  ;;  %v643_v50 = vpack.c.bf16 %v5904_v41, %v5904_v41  ;;  %v627_v51 = vpack.c.bf16 %v5901_v42, %v5901_v42  ;;  %v6455_v56 = vld [vmem:[#allocation2 + $0x1c] sm:$0xf]  ;;  %5365 = vmatmul.msk.bf16.gmra.mxu0 %vm1577_vm11, %v1562_v5  ;;  %v1199_v32 = vrot.slane %v1198_v6, 4  ;;  %v2201_v57 = vsel %vm1626_vm10, %v5476_v26, 0 }
 0x18f   : > { %1051 = vst [vmem:[#allocation2 + $0x84] sm:$0xf] %v1050_v46  ;;  %v6457_v59 = vld [vmem:[#allocation2 + $0x20] sm:$0x1]  ;;  %v1201_v61 = vshll.u32 %v6455_v56, 16  ;;  %v1205_v62 = vshrl.u32 %v6455_v56, 16  ;;  %2210 = vmatpush.bf16.msra.mxu0 %v2201_v57 }
 0x190   : > { %v835_v63 = vshrl.u32 %v643_v50, 16  ;;  %v838_v0 = vshll.u32 %v643_v50, 16  ;;  %v699_v3 = vshrl.u32 %v627_v51, 16  ;;  %v702_v4 = vshll.u32 %v627_v51, 16  ;;  %v1000_v46 = vld [vmem:[#allocation2 + $0x30] sm:$0xf] }
 0x191   : > { %v1203_v7 = vrot.slane %v1201_v61, 5  ;;  %v1207_v8 = vrot.slane %v1205_v62, 4  ;;  %v1211_v12 = vshll.u32 %v6457_v59, 16  ;;  %v465_v62 = vsel %vm6309_vm5, 0, %v464_v34  ;;  %434 = vst [vmem:[#allocation2 + $0x9c] sm:$0x1] %v433_v49 }
 0x192   : > { %v837_v9 = vrot.slane %v835_v63, 7  ;;  %v701_v10 = vrot.slane %v699_v3, 7  ;;  %v5905_v11 = vpop.trf.xlu1  ;;  %v489_v63 = vsel %vm6309_vm5, 0, %v488_v35  ;;  %466 = vst [vmem:[#allocation2 + $0x44] sm:$0x1] %v465_v62 }
 0x193   : > { %v5909_v15 = vunpack.i.h.bf16 %v5905_v11  ;;  %v5906_v16 = vunpack.i.l.bf16 %v5905_v11  ;;  %v1208_v24 = vor.u32 %v1207_v8, %v1203_v7  ;;  %v1213_v48 = vrot.slane %v1211_v12, 5  ;;  %490 = vst [vmem:[#allocation2 + $0xa4] sm:$0x1] %v489_v63 }
 0x194   : > { %v840_v17 = vor.u32 %v838_v0, %v837_v9  ;;  %v842_v18 = vrot.slane %v837_v9, 4  ;;  %v704_v19 = vor.u32 %v702_v4, %v701_v10  ;;  %v706_v20 = vrot.slane %v701_v10, 4  ;;  %v6497_v9 = vld [vmem:[#allocation2] sm:$0xe] }
 0x195   : > { %v644_v22 = vpack.c.bf16 %v5909_v15, %v5909_v15  ;;  %v628_v23 = vpack.c.bf16 %v5906_v16, %v5906_v16  ;;  %v1209_v47 = vrot.slane %v1208_v24, 4  ;;  %v1097_v0 = vld [vmem:[#allocation2 + $0x24] sm:$0xf] }
 0x196   : > { %v705_v29 = vsel %vm6392_vm14, %v697_v40, %v704_v19  ;;  %v841_v30 = vsel %vm6392_vm14, %v833_v37, %v840_v17  ;;  %v998_v31 = vsel %vm6303_vm4, %v706_v20, %v997_v14  ;;  %v1054_v39 = vsel %vm6303_vm4, %v842_v18, %v1053_v21  ;;  %v1056_v40 = vld [vmem:[#allocation2 + $0x90] sm:$0xf]  ;;  %v411_v14 = vld [vmem:[#allocation2 + $0x48] sm:$0x1] }
 0x197   : > { %996 = vst.msk [vmem:[#allocation2 + $0x28] sm:$0xf] %vm381_vm1, %v705_v29  ;;  %v844_v41 = vshrl.u32 %v644_v22, 16  ;;  %v847_v42 = vshll.u32 %v644_v22, 16  ;;  %v708_v45 = vshrl.u32 %v628_v23, 16  ;;  %v1204_v37 = vsel %vm6356_vm9, %v1199_v32, %v1203_v7 }
 0x198   : > { %999 = vst [vmem:[#allocation2 + $0x2c] sm:$0x1] %v998_v31  ;;  %v711_v53 = vshll.u32 %v628_v23, 16  ;;  %v1214_v61 = vsel %vm6356_vm9, %v1209_v47, %v1213_v48  ;;  %v1533_v6 = vunpack.c.l.b16 %v1204_v37  ;;  %v1216_v13 = vshrl.u32 %v1097_v0, 16 }
 0x199   : > { %1052 = vst.msk [vmem:[#allocation2 + $0x88] sm:$0xf] %vm381_vm1, %v841_v30  ;;  %v6483_v50 = vrot.slane %v844_v41, 7  ;;  %v6485_v51 = vrot.slane %v708_v45, 7  ;;  %v1534_v12 = vunpack.c.l.b16 %v1214_v61  ;;  %v1219_v19 = vshll.u32 %v1097_v0, 16 }
 0x19a   : > { %1055 = vst [vmem:[#allocation2 + $0x8c] sm:$0x1] %v1054_v39  ;;  %v5910_v58 = vpop.trf.xlu1  ;;  %v5460_v23 = vrot.slane %v6497_v9, 9  ;;  %v1218_v29 = vrot.slane %v1216_v13, 4  ;;  %v412_v45 = vsel %vm6303_vm4, 0, %v411_v14 }
 0x19b   : > { %v849_v3 = vor.u32 %v847_v42, %v6483_v50  ;;  %v850_v4 = vrot.slane %v6483_v50, 4  ;;  %v713_v5 = vor.u32 %v711_v53, %v6485_v51  ;;  %v5914_v7 = vunpack.i.h.bf16 %v5910_v58  ;;  %413 = vst [vmem:[#allocation2 + $0x48] sm:$0x1] %v412_v45  ;;  %v435_v9 = vld [vmem:[#allocation2 + $0xa8] sm:$0x1] }
 0x19c   : > { %v5911_v8 = vunpack.i.l.bf16 %v5910_v58  ;;  %v714_v15 = vrot.slane %v6485_v51, 4  ;;  %v1563_v20 = vpack.c.b16 %v1534_v12, %v1533_v6  ;;  %v1221_v31 = vrot.slane %v1219_v19, 5  ;;  %v1060_v51 = vld [vmem:[#allocation2 + $0x98] sm:$0x1]  ;;  %v1063_v12 = vld [vmem:[#allocation2 + $0x9c] sm:$0xf] }
 0x19d   : > { %v1001_v10 = vsel %vm6377_vm12, %v713_v5, %v1000_v46  ;;  %v1057_v11 = vsel %vm6377_vm12, %v849_v3, %v1056_v40  ;;  %v645_v16 = vpack.c.bf16 %v5914_v7, %v5914_v7  ;;  %v1004_v46 = vld [vmem:[#allocation2 + $0x38] sm:$0x1]  ;;  %v1992_v3 = vrot.slane %v6345_v43, 5 }
 0x19e   : > { %1002 = vst [vmem:[#allocation2 + $0x30] sm:$0xf] %v1001_v10  ;;  %v629_v17 = vpack.c.bf16 %v5911_v8, %v5911_v8  ;;  %v6504_v18 = vld [vmem:[#allocation2 + $0x28] sm:$0xf]  ;;  %5366 = vmatmul.msk.bf16.gmra.mxu0 %vm1577_vm11, %v1563_v20  ;;  %v1222_v58 = vor.u32 %v1221_v31, %v1218_v29 }
 0x19f   : > { %1058 = vst [vmem:[#allocation2 + $0x90] sm:$0xf] %v1057_v11  ;;  %v6506_v21 = vld [vmem:[#allocation2 + $0x2c] sm:$0x1]  ;;  %v1225_v22 = vshll.u32 %v6504_v18, 16  ;;  %v852_v24 = vshrl.u32 %v645_v16, 16  ;;  %v1993_v13 = vsel %vm6529_vm2, %v5460_v23, %v1992_v3 }
 0x1a0   : > { %v855_v25 = vshll.u32 %v645_v16, 16  ;;  %v716_v26 = vshrl.u32 %v629_v17, 16  ;;  %v719_v30 = vshll.u32 %v629_v17, 16  ;;  %v1229_v34 = vshrl.u32 %v6504_v18, 16  ;;  %v1007_v11 = vld [vmem:[#allocation2 + $0x3c] sm:$0xf] }
 0x1a1   : > { %v6510_v32 = vrot.slane %v1225_v22, 5  ;;  %v854_v35 = vrot.slane %v852_v24, 7  ;;  %v1235_v42 = vshll.u32 %v6506_v21, 16  ;;  %v1223_v16 = vrot.slane %v1222_v58, 4 }
 0x1a2   : > { %v718_v39 = vrot.slane %v716_v26, 7  ;;  %v5915_v41 = vpop.trf.xlu1  ;;  %v1231_v61 = vrot.slane %v1229_v34, 4  ;;  %v1994_v22 = vrot.slane %v1992_v3, 4  ;;  %v2104_v24 = vunpack.c.l.b16 %v1993_v13 }
 0x1a3   : > { %v5919_v40 = vunpack.i.h.bf16 %v5915_v41  ;;  %v5916_v37 = vunpack.i.l.bf16 %v5915_v41  ;;  %v857_v47 = vor.u32 %v855_v25, %v854_v35  ;;  %v859_v48 = vrot.slane %v854_v35, 4  ;;  %v467_v35 = vld [vmem:[#allocation2 + $0x50] sm:$0x1] }
 0x1a4   : > { %v721_v49 = vor.u32 %v719_v30, %v718_v39  ;;  %v723_v50 = vrot.slane %v718_v39, 4  ;;  %v1232_v43 = vor.u32 %v1231_v61, %v6510_v32  ;;  %v1237_v17 = vrot.slane %v1235_v42, 5  ;;  %v491_v39 = vld [vmem:[#allocation2 + $0xb0] sm:$0x1] }
 0x1a5   : > { %v646_v53 = vpack.c.bf16 %v5919_v40, %v5919_v40  ;;  %v630_v57 = vpack.c.bf16 %v5916_v37, %v5916_v37  ;;  %v858_v63 = vsel %vm6392_vm14, %v850_v4, %v857_v47  ;;  %v1061_v5 = vsel %vm6303_vm4, %v859_v48, %v1060_v51  ;;  %v1099_v48 = vld [vmem:[#allocation2 + $0x30] sm:$0xf] }
 0x1a6   : > { %v722_v62 = vsel %vm6392_vm14, %v714_v15, %v721_v49  ;;  %v1005_v0 = vsel %vm6303_vm4, %v723_v50, %v1004_v46  ;;  %1059 = vst.msk [vmem:[#allocation2 + $0x94] sm:$0xf] %vm381_vm1, %v858_v63  ;;  %v1233_v20 = vrot.slane %v1232_v43, 4  ;;  %v436_v25 = vsel %vm6303_vm4, 0, %v435_v9 }
 0x1a7   : > { %1003 = vst.msk [vmem:[#allocation2 + $0x34] sm:$0xf] %vm381_vm1, %v722_v62  ;;  %v861_v6 = vshrl.u32 %v646_v53, 16  ;;  %v725_v7 = vshrl.u32 %v630_v57, 16  ;;  %v864_v4 = vshll.u32 %v646_v53, 16  ;;  %v728_v10 = vshll.u32 %v630_v57, 16 }
 0x1a8   : > { %1006 = vst [vmem:[#allocation2 + $0x38] sm:$0x1] %v1005_v0  ;;  %v1228_v30 = vsel %vm6356_vm9, %v1223_v16, %v6510_v32  ;;  %v1238_v46 = vsel %vm6356_vm9, %v1233_v20, %v1237_v17  ;;  %v1996_v47 = vsel %vm6529_vm2, %v1994_v22, %v1995_v38  ;;  %v468_v51 = vsel %vm6309_vm5, 0, %v467_v35  ;;  %v1067_v16 = vld [vmem:[#allocation2 + $0xa4] sm:$0x1] }
 0x1a9   : > { %v6537_v14 = vrot.slane %v861_v6, 7  ;;  %v6539_v15 = vrot.slane %v725_v7, 7  ;;  %1062 = vst [vmem:[#allocation2 + $0x98] sm:$0x1] %v1061_v5  ;;  %v1536_v32 = vunpack.c.l.b16 %v1238_v46  ;;  %v1535_v49 = vunpack.c.l.b16 %v1228_v30 }
 0x1aa   : > { %v5920_v19 = vpop.trf.xlu1  ;;  %437 = vst [vmem:[#allocation2 + $0xa8] sm:$0x1] %v436_v25  ;;  %v2105_v50 = vunpack.c.l.b16 %v1996_v47  ;;  %v492_v53 = vsel %vm6309_vm5, 0, %v491_v39  ;;  %v1240_v38 = vshrl.u32 %v1099_v48, 16  ;;  %v1243_v3 = vshll.u32 %v1099_v48, 16 }
 0x1ab   : > { %v866_v26 = vor.u32 %v864_v4, %v6537_v14  ;;  %v867_v23 = vrot.slane %v6537_v14, 4  ;;  %v730_v29 = vor.u32 %v728_v10, %v6539_v15  ;;  %v5924_v31 = vunpack.i.h.bf16 %v5920_v19  ;;  %469 = vst [vmem:[#allocation2 + $0x50] sm:$0x1] %v468_v51  ;;  %v1011_v10 = vld [vmem:[#allocation2 + $0x44] sm:$0x1] }
 0x1ac   : > { %v5921_v34 = vunpack.i.l.bf16 %v5920_v19  ;;  %v731_v41 = vrot.slane %v6539_v15, 4  ;;  %v1564_v52 = vpack.c.b16 %v1536_v32, %v1535_v49  ;;  %v2136_v0 = vpack.c.b16 %v2105_v50, %v2104_v24  ;;  %493 = vst [vmem:[#allocation2 + $0xb0] sm:$0x1] %v492_v53 }
 0x1ad   : > { %v1008_v42 = vsel %vm6377_vm12, %v730_v29, %v1007_v11  ;;  %v1064_v45 = vsel %vm6377_vm12, %v866_v26, %v1063_v12  ;;  %v647_v40 = vpack.c.bf16 %v5924_v31, %v5924_v31  ;;  %v1242_v20 = vrot.slane %v1240_v38, 4  ;;  %v1115_v29 = vld [vmem:[#allocation2 + $0x90] sm:$0xf] }
 0x1ae   : > { %1009 = vst [vmem:[#allocation2 + $0x3c] sm:$0xf] %v1008_v42  ;;  %v631_v37 = vpack.c.bf16 %v5921_v34, %v5921_v34  ;;  %v6564_v57 = vld [vmem:[#allocation2 + $0x34] sm:$0xf]  ;;  %5367 = vmatmul.msk.bf16.vlgmr.msrb.gmra.mxu1 %vm1577_vm11, %v1564_v52  ;;  %5477 = vmatmul.msk.bf16.vlgmr.msra.gmra.mxu0 %vm1577_vm11, %v2136_v0  ;;  %v1245_v22 = vrot.slane %v1243_v3, 5  ;;  %v2013_v1 = vrot.slane %v6504_v18, 5 }
 0x1af   : > { %1065 = vst [vmem:[#allocation2 + $0x9c] sm:$0xf] %v1064_v45  ;;  %v869_v58 = vshrl.u32 %v647_v40, 16  ;;  %v872_v61 = vshll.u32 %v647_v40, 16  ;;  %v1249_v9 = vshll.u32 %v6564_v57, 16  ;;  %v1253_v4 = vshrl.u32 %v6564_v57, 16 }
 0x1b0   : > { %v733_v62 = vshrl.u32 %v631_v37, 16  ;;  %v736_v63 = vshll.u32 %v631_v37, 16  ;;  %v6579_v35 = vld [vmem:[#allocation2 + $0x38] sm:$0x1]  ;;  %v1014_v42 = vld [vmem:[#allocation2 + $0x48] sm:$0xf]  ;;  %v1246_v46 = vor.u32 %v1245_v22, %v1242_v20 }
 0x1b1   : > { %v871_v5 = vrot.slane %v869_v58, 7  ;;  %v1070_v45 = vld [vmem:[#allocation2 + $0xa8] sm:$0xf]  ;;  %v1251_v32 = vrot.slane %v1249_v9, 5  ;;  %v1255_v47 = vrot.slane %v1253_v4, 4  ;;  %v1259_v49 = vshll.u32 %v6579_v35, 16 }
 0x1b2   : > { %v735_v6 = vrot.slane %v733_v62, 7  ;;  %v5925_v7 = vpop.trf.xlu1  ;;  %v1247_v33 = vrot.slane %v1246_v46, 4  ;;  %v1116_v52 = vld [vmem:[#allocation2 + $0x94] sm:$0xf]  ;;  %v2001_v46 = vrot.slane %v1999_v28, 4 }
 0x1b3   : > { %v5929_v11 = vunpack.i.h.bf16 %v5925_v7  ;;  %v5926_v12 = vunpack.i.l.bf16 %v5925_v7  ;;  %v874_v43 = vor.u32 %v872_v61, %v871_v5  ;;  %v876_v13 = vrot.slane %v871_v5, 4 }
 0x1b4   : > { %v738_v14 = vor.u32 %v736_v63, %v735_v6  ;;  %v740_v15 = vrot.slane %v735_v6, 4  ;;  %v1435_v61 = vshll.u32 %v1115_v29, 16  ;;  %v1256_v5 = vor.u32 %v1255_v47, %v1251_v32 }
 0x1b5   : > { %v648_v17 = vpack.c.bf16 %v5929_v11, %v5929_v11  ;;  %v632_v19 = vpack.c.bf16 %v5926_v12, %v5926_v12  ;;  %v875_v25 = vsel %vm6392_vm14, %v867_v23, %v874_v43  ;;  %v1068_v30 = vsel %vm6303_vm4, %v876_v13, %v1067_v16 }
 0x1b6   : > { %v739_v24 = vsel %vm6392_vm14, %v731_v41, %v738_v14  ;;  %v1012_v26 = vsel %vm6303_vm4, %v740_v15, %v1011_v10  ;;  %v6587_v23 = vsel %vm6529_vm2, %v5461_v44, %v1999_v28  ;;  %1066 = vst.msk [vmem:[#allocation2 + $0xa0] sm:$0xf] %vm381_vm1, %v875_v25  ;;  %v1432_v44 = vshrl.u32 %v1115_v29, 16  ;;  %v1136_v10 = vld [vmem:[#allocation2 + $0x98] sm:$0x1] }
 0x1b7   : > { %1010 = vst.msk [vmem:[#allocation2 + $0x40] sm:$0xf] %vm381_vm1, %v739_v24  ;;  %v878_v31 = vshrl.u32 %v648_v17, 16  ;;  %v742_v34 = vshrl.u32 %v632_v19, 16  ;;  %v881_v39 = vshll.u32 %v648_v17, 16  ;;  %v745_v41 = vshll.u32 %v632_v19, 16 }
 0x1b8   : > { %1013 = vst [vmem:[#allocation2 + $0x44] sm:$0x1] %v1012_v26  ;;  %v2106_v50 = vunpack.c.l.b16 %v6587_v23  ;;  %v1252_v9 = vsel %vm6356_vm9, %v1247_v33, %v1251_v32  ;;  %v1261_v4 = vrot.slane %v1259_v49, 5  ;;  %v1257_v11 = vrot.slane %v1256_v5, 4  ;;  %v1018_v29 = vld [vmem:[#allocation2 + $0x50] sm:$0x1] }
 0x1b9   : > { %v6590_v40 = vrot.slane %v878_v31, 7  ;;  %v744_v37 = vrot.slane %v742_v34, 7  ;;  %1069 = vst [vmem:[#allocation2 + $0xa4] sm:$0x1] %v1068_v30  ;;  %v1434_v12 = vrot.slane %v1432_v44, 4  ;;  %v1437_v43 = vrot.slane %v1435_v61, 5 }
 0x1ba   : > { %v5930_v48 = vpop.trf.xlu1  ;;  %v1441_v13 = vshll.u32 %v1116_v52, 16  ;;  %v1262_v19 = vsel %vm6356_vm9, %v1257_v11, %v1261_v4  ;;  %v1445_v24 = vshrl.u32 %v1116_v52, 16  ;;  %v1451_v31 = vshll.u32 %v1136_v10, 16 }
 0x1bb   : > { %v883_v51 = vor.u32 %v881_v39, %v6590_v40  ;;  %v884_v53 = vrot.slane %v6590_v40, 4  ;;  %v747_v58 = vor.u32 %v745_v41, %v744_v37  ;;  %v5934_v62 = vunpack.i.h.bf16 %v5930_v48  ;;  %v1074_v39 = vld [vmem:[#allocation2 + $0xb0] sm:$0x1] }
 0x1bc   : > { %v5931_v63 = vunpack.i.l.bf16 %v5930_v48  ;;  %v748_v0 = vrot.slane %v744_v37, 4  ;;  %v1438_v20 = vor.u32 %v1437_v43, %v1434_v12  ;;  %v1443_v22 = vrot.slane %v1441_v13, 5  ;;  %v494_v13 = vld [vmem:[#allocation2 + $0xbc] sm:$0x1] }
 0x1bd   : > { %v1015_v38 = vsel %vm6377_vm12, %v747_v58, %v1014_v42  ;;  %v1071_v3 = vsel %vm6377_vm12, %v883_v51, %v1070_v45  ;;  %v649_v6 = vpack.c.bf16 %v5934_v62, %v5934_v62  ;;  %v1538_v30 = vunpack.c.l.b16 %v1262_v19  ;;  %v414_v51 = vld [vmem:[#allocation2 + $0x54] sm:$0x1] }
 0x1be   : > { %1016 = vst [vmem:[#allocation2 + $0x48] sm:$0xf] %v1015_v38  ;;  %v633_v7 = vpack.c.bf16 %v5931_v63, %v5931_v63  ;;  %v1537_v41 = vunpack.c.l.b16 %v1252_v9  ;;  %v1439_v42 = vrot.slane %v1438_v20, 4  ;;  %v1447_v45 = vrot.slane %v1445_v24, 4  ;;  %v438_v62 = vld [vmem:[#allocation2 + $0xb4] sm:$0x1] }
 0x1bf   : > { %1072 = vst [vmem:[#allocation2 + $0xa8] sm:$0xf] %v1071_v3  ;;  %v886_v14 = vshrl.u32 %v649_v6, 16  ;;  %v889_v15 = vshll.u32 %v649_v6, 16  ;;  %v1453_v44 = vrot.slane %v1451_v31, 5  ;;  %v2002_v38 = vrot.slane %v6422_v54, 5 }
 0x1c0   : > { %v750_v16 = vshrl.u32 %v633_v7, 16  ;;  %v753_v17 = vshll.u32 %v633_v7, 16  ;;  %v1565_v48 = vpack.c.b16 %v1538_v30, %v1537_v41  ;;  %v1444_v33 = vsel %vm6356_vm9, %v1439_v42, %v1443_v22  ;;  %v6634_v31 = vld [vmem:[#allocation2 + $0x44] sm:$0x1]  ;;  %v1117_v41 = vld [vmem:[#allocation2 + $0x9c] sm:$0xf] }
 0x1c1   : > { %v888_v25 = vrot.slane %v886_v14, 7  ;;  %v1448_v49 = vor.u32 %v1447_v45, %v1443_v22  ;;  %v1553_v52 = vunpack.c.l.b16 %v1444_v33  ;;  %v2003_v7 = vsel %vm6529_vm2, %v2001_v46, %v2002_v38 }
 0x1c2   : > { %v752_v26 = vrot.slane %v750_v16, 7  ;;  %v5935_v34 = vpop.trf.xlu1  ;;  %5368 = vmatmul.msk.bf16.gmra.mxu1 %vm1577_vm11, %v1565_v48  ;;  %v439_v4 = vsel %vm6303_vm4, 0, %v438_v62  ;;  %v2107_v10 = vunpack.c.l.b16 %v2003_v7  ;;  %v495_v23 = vsel %vm6309_vm5, 0, %v494_v13 }
 0x1c3   : > { %v891_v40 = vor.u32 %v889_v15, %v888_v25  ;;  %v893_v37 = vrot.slane %v888_v25, 4  ;;  %v1449_v63 = vrot.slane %v1448_v49, 4  ;;  %v5939_v3 = vunpack.i.h.bf16 %v5935_v34  ;;  %440 = vst [vmem:[#allocation2 + $0xb4] sm:$0x1] %v439_v4  ;;  %v6632_v25 = vld [vmem:[#allocation2 + $0x40] sm:$0xf] }
 0x1c4   : > { %v755_v32 = vor.u32 %v753_v17, %v752_v26  ;;  %v757_v47 = vrot.slane %v752_v26, 4  ;;  %v5936_v5 = vunpack.i.l.bf16 %v5935_v34  ;;  %v1101_v17 = vld [vmem:[#allocation2 + $0x3c] sm:$0xf]  ;;  %v2137_v20 = vpack.c.b16 %v2107_v10, %v2106_v50  ;;  %496 = vst [vmem:[#allocation2 + $0xbc] sm:$0x1] %v495_v23 }
 0x1c5   : > { %v892_v61 = vsel %vm6392_vm14, %v884_v53, %v891_v40  ;;  %v1075_v28 = vsel %vm6303_vm4, %v893_v37, %v1074_v39  ;;  %v415_v53 = vsel %vm6303_vm4, 0, %v414_v51  ;;  %v1454_v6 = vsel %vm6356_vm9, %v1449_v63, %v1453_v44 }
 0x1c6   : > { %v756_v58 = vsel %vm6392_vm14, %v748_v0, %v755_v32  ;;  %v1019_v36 = vsel %vm6303_vm4, %v757_v47, %v1018_v29  ;;  %v470_v0 = vld [vmem:[#allocation2 + $0x5c] sm:$0x1]  ;;  %1073 = vst.msk [vmem:[#allocation2 + $0xac] sm:$0xf] %vm381_vm1, %v892_v61  ;;  %v650_v9 = vpack.c.bf16 %v5939_v3, %v5939_v3  ;;  %v1554_v54 = vunpack.c.l.b16 %v1454_v6  ;;  %5478 = vmatmul.msk.bf16.gmra.mxu0 %vm1577_vm11, %v2137_v20 }
 0x1c7   : > { %1017 = vst.msk [vmem:[#allocation2 + $0x4c] sm:$0xf] %vm381_vm1, %v756_v58  ;;  %v634_v11 = vpack.c.bf16 %v5936_v5, %v5936_v5  ;;  %v471_v43 = vsel %vm6309_vm5, 0, %v470_v0  ;;  %v1264_v50 = vshrl.u32 %v1101_v17, 16  ;;  %v1267_v39 = vshll.u32 %v1101_v17, 16 }
 0x1c8   : > { %1020 = vst [vmem:[#allocation2 + $0x50] sm:$0x1] %v1019_v36  ;;  %v895_v14 = vshrl.u32 %v650_v9, 16  ;;  %v898_v15 = vshll.u32 %v650_v9, 16  ;;  %v1573_v19 = vpack.c.b16 %v1554_v54, %v1553_v52  ;;  %v1273_v44 = vshll.u32 %v6632_v25, 16 }
 0x1c9   : > { %1076 = vst [vmem:[#allocation2 + $0xb0] sm:$0x1] %v1075_v28  ;;  %v759_v22 = vshrl.u32 %v634_v11, 16  ;;  %v762_v24 = vshll.u32 %v634_v11, 16  ;;  %v1266_v48 = vrot.slane %v1264_v50, 4  ;;  %v1269_v49 = vrot.slane %v1267_v39, 5 }
 0x1ca   : > { %v5940_v12 = vpop.trf.xlu1  ;;  %416 = vst [vmem:[#allocation2 + $0x54] sm:$0x1] %v415_v53  ;;  %v897_v26 = vrot.slane %v895_v14, 7  ;;  %5376 = vmatmul.msk.bf16.vlgmr.msra.gmra.mxu3 %vm1577_vm11, %v1573_v19  ;;  %v1277_v51 = vshrl.u32 %v6632_v25, 16  ;;  %v1283_v28 = vshll.u32 %v6634_v31, 16  ;;  %v1456_v62 = vshrl.u32 %v1117_v41, 16 }
 0x1cb   : > { %v5944_v16 = vunpack.i.h.bf16 %v5940_v12  ;;  %v5941_v30 = vunpack.i.l.bf16 %v5940_v12  ;;  %472 = vst [vmem:[#allocation2 + $0x5c] sm:$0x1] %v471_v43  ;;  %v761_v34 = vrot.slane %v759_v22, 7  ;;  %v1077_v38 = vld [vmem:[#allocation2 + $0xb4] sm:$0xf]  ;;  %v1270_v5 = vor.u32 %v1269_v49, %v1266_v48 }
 0x1cc   : > { %v900_v42 = vor.u32 %v898_v15, %v897_v26  ;;  %v901_v45 = vrot.slane %v897_v26, 4  ;;  %v1118_v53 = vld [vmem:[#allocation2 + $0xa0] sm:$0xf]  ;;  %v1275_v4 = vrot.slane %v1273_v44, 5  ;;  %v1137_v54 = vld [vmem:[#allocation2 + $0xa4] sm:$0x1] }
 0x1cd   : > { %v651_v29 = vpack.c.bf16 %v5944_v16, %v5944_v16  ;;  %v764_v37 = vor.u32 %v762_v24, %v761_v34  ;;  %v765_v32 = vrot.slane %v761_v34, 4  ;;  %v635_v47 = vpack.c.bf16 %v5941_v30, %v5941_v30  ;;  %v1081_v16 = vld [vmem:[#allocation2 + $0xbc] sm:$0x1]  ;;  %v1941_v26 = vld [vmem:[#allocation2 + $0x18] sm:$0xe] }
 0x1ce   : > { %v1078_v6 = vsel %vm6377_vm12, %v900_v42, %v1077_v38  ;;  %v1271_v12 = vrot.slane %v1270_v5, 4  ;;  %v1279_v43 = vrot.slane %v1277_v51, 4  ;;  %v1285_v13 = vrot.slane %v1283_v28, 5 }
 0x1cf   : > { %v903_v46 = vshrl.u32 %v651_v29, 16  ;;  %v906_v40 = vshll.u32 %v651_v29, 16  ;;  %v767_v61 = vshrl.u32 %v635_v47, 16  ;;  %v770_v36 = vshll.u32 %v635_v47, 16  ;;  %1079 = vst [vmem:[#allocation2 + $0xb4] sm:$0xf] %v1078_v6 }
 0x1d0   : > { %v1458_v17 = vrot.slane %v1456_v62, 4  ;;  %v1276_v20 = vsel %vm6356_vm9, %v1271_v12, %v1275_v4  ;;  %v1280_v22 = vor.u32 %v1279_v43, %v1275_v4  ;;  %v1459_v24 = vshll.u32 %v1117_v41, 16 }
 0x1d1   : > { %v905_v33 = vrot.slane %v903_v46, 7  ;;  %v1021_v58 = vld [vmem:[#allocation2 + $0x54] sm:$0xf]  ;;  %v769_v7 = vrot.slane %v767_v61, 7  ;;  %v1465_v34 = vshll.u32 %v1118_v53, 16  ;;  %v1469_v42 = vshrl.u32 %v1118_v53, 16 }
 0x1d2   : > { %v6643_v63 = vpop.trf.xlu1  ;;  %v1022_v52 = vsel %vm6377_vm12, %v764_v37, %v1021_v58  ;;  %v1025_v9 = vld [vmem:[#allocation2 + $0x5c] sm:$0x1]  ;;  %v1281_v50 = vrot.slane %v1280_v22, 4  ;;  %v1461_v39 = vrot.slane %v1459_v24, 5  ;;  %v1539_v46 = vunpack.c.l.b16 %v1276_v20  ;;  %v6687_v24 = vld [vmem:[#allocation2 + $0x4c] sm:$0xf] }
 0x1d3   : > { %v908_v3 = vor.u32 %v906_v40, %v905_v33  ;;  %v910_v0 = vrot.slane %v905_v33, 4  ;;  %1023 = vst [vmem:[#allocation2 + $0x54] sm:$0xf] %v1022_v52  ;;  %v5949_v10 = vunpack.i.h.bf16 %v6643_v63  ;;  %v772_v14 = vor.u32 %v770_v36, %v769_v7  ;;  %v417_v52 = vld [vmem:[#allocation2 + $0x60] sm:$0x1] }
 0x1d4   : > { %v774_v15 = vrot.slane %v769_v7, 4  ;;  %v1467_v40 = vrot.slane %v1465_v34, 5  ;;  %v5462_v41 = vrot.slane %v1941_v26, 9  ;;  %v2006_v37 = vrot.slane %v6455_v56, 5  ;;  %v441_v7 = vld [vmem:[#allocation2 + $0xc0] sm:$0x1] }
 0x1d5   : > { %v909_v11 = vsel %vm6392_vm14, %v901_v45, %v908_v3  ;;  %v1082_v19 = vsel %vm6303_vm4, %v910_v0, %v1081_v16  ;;  %v773_v29 = vsel %vm6392_vm14, %v765_v32, %v772_v14  ;;  %v652_v23 = vpack.c.bf16 %v5949_v10, %v5949_v10  ;;  %v473_v10 = vld [vmem:[#allocation2 + $0x68] sm:$0x1] }
 0x1d6   : > { %1080 = vst.msk [vmem:[#allocation2 + $0xb8] sm:$0xf] %vm381_vm1, %v909_v11  ;;  %v1026_v30 = vsel %vm6303_vm4, %v774_v15, %v1025_v9  ;;  %v1475_v45 = vshll.u32 %v1137_v54, 16  ;;  %v1286_v32 = vsel %vm6356_vm9, %v1281_v50, %v1285_v13  ;;  %v1462_v47 = vor.u32 %v1461_v39, %v1458_v17  ;;  %v6691_v39 = vld [vmem:[#allocation2 + $0x50] sm:$0x1] }
 0x1d7   : > { %1083 = vst [vmem:[#allocation2 + $0xbc] sm:$0x1] %v1082_v19  ;;  %v1471_v48 = vrot.slane %v1469_v42, 4  ;;  %v1540_v49 = vunpack.c.l.b16 %v1286_v32  ;;  %v2007_v44 = vsel %vm6529_vm2, %v5462_v41, %v2006_v37  ;;  %v2008_v51 = vrot.slane %v2006_v37, 4  ;;  %v1103_v19 = vld [vmem:[#allocation2 + $0x48] sm:$0xf] }
 0x1d8   : > { %1024 = vst.msk [vmem:[#allocation2 + $0x58] sm:$0xf] %vm381_vm1, %v773_v29  ;;  %v1477_v33 = vrot.slane %v1475_v45, 5  ;;  %v2009_v58 = vrot.slane %v6457_v59, 5  ;;  %v1463_v61 = vrot.slane %v1462_v47, 4  ;;  %v2108_v28 = vunpack.c.l.b16 %v2007_v44 }
 0x1d9   : > { %1027 = vst [vmem:[#allocation2 + $0x5c] sm:$0x1] %v1026_v30  ;;  %v1472_v36 = vor.u32 %v1471_v48, %v1467_v40  ;;  %v912_v62 = vshrl.u32 %v652_v23, 16  ;;  %v1566_v38 = vpack.c.b16 %v1540_v49, %v1539_v46  ;;  %v915_v3 = vshll.u32 %v652_v23, 16  ;;  %v1119_v49 = vld [vmem:[#allocation2 + $0xa8] sm:$0xf] }
 0x1da   : > { %v2010_v56 = vsel %vm6529_vm2, %v2008_v51, %v2009_v58  ;;  %v1468_v0 = vsel %vm6356_vm9, %v1463_v61, %v1467_v40  ;;  %v5950_v9 = vpop.trf.xlu1  ;;  %v5946_v4 = vunpack.i.l.bf16 %v6643_v63  ;;  %v418_v54 = vsel %vm6303_vm4, 0, %v417_v52  ;;  %v497_v63 = vld [vmem:[#allocation2 + $0xc8] sm:$0x1] }
 0x1db   : > { %v1473_v5 = vrot.slane %v1472_v36, 4  ;;  %v2109_v53 = vunpack.c.l.b16 %v2010_v56  ;;  %v6672_v6 = vrot.slane %v912_v62, 7  ;;  %5369 = vmatmul.msk.bf16.gmra.mxu1 %vm1577_vm11, %v1566_v38  ;;  %v1555_v59 = vunpack.c.l.b16 %v1468_v0  ;;  %419 = vst [vmem:[#allocation2 + $0x60] sm:$0x1] %v418_v54  ;;  %v1942_v54 = vld [vmem:[#allocation2 + $0x24] sm:$0xe] }
 0x1dc   : > { %v442_v15 = vsel %vm6303_vm4, 0, %v441_v7  ;;  %v636_v16 = vpack.c.bf16 %v5946_v4, %v5946_v4  ;;  %v5954_v17 = vunpack.i.h.bf16 %v5950_v9  ;;  %v5951_v20 = vunpack.i.l.bf16 %v5950_v9 }
 0x1dd   : > { %v1478_v11 = vsel %vm6356_vm9, %v1473_v5, %v1477_v33  ;;  %v2138_v12 = vpack.c.b16 %v2109_v53, %v2108_v28  ;;  %v917_v43 = vor.u32 %v915_v3, %v6672_v6  ;;  %v918_v13 = vrot.slane %v6672_v6, 4  ;;  %443 = vst [vmem:[#allocation2 + $0xc0] sm:$0x1] %v442_v15  ;;  %v1120_v5 = vld [vmem:[#allocation2 + $0xac] sm:$0xf] }
 0x1de   : > { %v1556_v14 = vunpack.c.l.b16 %v1478_v11  ;;  %v474_v22 = vsel %vm6309_vm5, 0, %v473_v10  ;;  %v776_v29 = vshrl.u32 %v636_v16, 16  ;;  %v779_v30 = vshll.u32 %v636_v16, 16 }
 0x1df   : > { %5479 = vmatmul.msk.bf16.gmra.mxu0 %vm1577_vm11, %v2138_v12  ;;  %v653_v34 = vpack.c.bf16 %v5954_v17, %v5954_v17  ;;  %475 = vst [vmem:[#allocation2 + $0x68] sm:$0x1] %v474_v22  ;;  %v498_v23 = vsel %vm6309_vm5, 0, %v497_v63  ;;  %v637_v50 = vpack.c.bf16 %v5951_v20, %v5951_v20  ;;  %v1288_v42 = vshrl.u32 %v1103_v19, 16  ;;  %v1138_v12 = vld [vmem:[#allocation2 + $0xb0] sm:$0x1] }
 0x1e0   : > { %v1574_v26 = vpack.c.b16 %v1556_v14, %v1555_v59  ;;  %v1291_v45 = vshll.u32 %v1103_v19, 16  ;;  %v778_v46 = vrot.slane %v776_v29, 7  ;;  %499 = vst [vmem:[#allocation2 + $0xc8] sm:$0x1] %v498_v23  ;;  %v1297_v37 = vshll.u32 %v6687_v24, 16 }
 0x1e1   : > { %v920_v40 = vshrl.u32 %v653_v34, 16  ;;  %v923_v41 = vshll.u32 %v653_v34, 16  ;;  %v784_v32 = vshrl.u32 %v637_v50, 16  ;;  %v787_v47 = vshll.u32 %v637_v50, 16  ;;  %v1105_v34 = vld [vmem:[#allocation2 + $0x54] sm:$0xf] }
 0x1e2   : > { %5377 = vmatmul.msk.bf16.gmra.mxu3 %vm1577_vm11, %v1574_v26  ;;  %v1290_v48 = vrot.slane %v1288_v42, 4  ;;  %v1293_v33 = vrot.slane %v1291_v45, 5  ;;  %v781_v2 = vor.u32 %v779_v30, %v778_v46  ;;  %v782_v44 = vrot.slane %v778_v46, 4  ;;  %v1028_v51 = vld [vmem:[#allocation2 + $0x60] sm:$0xf] }
 0x1e3   : > { %v922_v58 = vrot.slane %v920_v40, 7  ;;  %v1299_v61 = vrot.slane %v1297_v37, 5  ;;  %v786_v36 = vrot.slane %v784_v32, 7  ;;  %v1301_v62 = vshrl.u32 %v6687_v24, 16  ;;  %v6718_v37 = vld [vmem:[#allocation2 + $0x58] sm:$0xf] }
 0x1e4   : > { %v1294_v28 = vor.u32 %v1293_v33, %v1290_v48  ;;  %v1307_v52 = vshll.u32 %v6691_v39, 16  ;;  %v1029_v38 = vsel %vm6377_vm12, %v781_v2, %v1028_v51  ;;  %v1084_v56 = vld [vmem:[#allocation2 + $0xc0] sm:$0xf]  ;;  %v1480_v53 = vshrl.u32 %v1119_v49, 16 }
 0x1e5   : > { %v925_v3 = vor.u32 %v923_v41, %v922_v58  ;;  %v927_v0 = vrot.slane %v922_v58, 4  ;;  %1030 = vst [vmem:[#allocation2 + $0x60] sm:$0xf] %v1029_v38  ;;  %v1085_v6 = vsel %vm6377_vm12, %v917_v43, %v1084_v56  ;;  %v789_v7 = vor.u32 %v787_v47, %v786_v36  ;;  %v1121_v56 = vld [vmem:[#allocation2 + $0xb4] sm:$0xf] }
 0x1e6   : > { %v791_v9 = vrot.slane %v786_v36, 4  ;;  %v1032_v59 = vld [vmem:[#allocation2 + $0x68] sm:$0x1]  ;;  %v1295_v4 = vrot.slane %v1294_v28, 4  ;;  %1086 = vst [vmem:[#allocation2 + $0xc0] sm:$0xf] %v1085_v6 }
 0x1e7   : > { %v926_v10 = vsel %vm6392_vm14, %v918_v13, %v925_v3  ;;  %v1303_v11 = vrot.slane %v1301_v62, 4  ;;  %v1482_v14 = vrot.slane %v1480_v53, 4  ;;  %v790_v15 = vsel %vm6392_vm14, %v782_v44, %v789_v7  ;;  %v1088_v27 = vld [vmem:[#allocation2 + $0xc8] sm:$0x1]  ;;  %v1122_v6 = vld [vmem:[#allocation2 + $0xb8] sm:$0xf] }
 0x1e8   : > { %v1033_v16 = vsel %vm6303_vm4, %v791_v9, %v1032_v59  ;;  %1087 = vst.msk [vmem:[#allocation2 + $0xc4] sm:$0xf] %vm381_vm1, %v926_v10  ;;  %v1300_v43 = vsel %vm6356_vm9, %v1295_v4, %v1299_v61  ;;  %v1483_v17 = vshll.u32 %v1119_v49, 16  ;;  %v1089_v13 = vsel %vm6303_vm4, %v927_v0, %v1088_v27 }
 0x1e9   : > { %1031 = vst.msk [vmem:[#allocation2 + $0x64] sm:$0xf] %vm381_vm1, %v790_v15  ;;  %v1304_v63 = vor.u32 %v1303_v11, %v1299_v61  ;;  %v1309_v19 = vrot.slane %v1307_v52, 5  ;;  %v1489_v20 = vshll.u32 %v1120_v5, 16  ;;  %v1541_v22 = vunpack.c.l.b16 %v1300_v43  ;;  %v1139_v11 = vld [vmem:[#allocation2 + $0xbc] sm:$0x1] }
 0x1ea   : > { %1034 = vst [vmem:[#allocation2 + $0x68] sm:$0x1] %v1033_v16  ;;  %v1485_v26 = vrot.slane %v1483_v17, 5  ;;  %v1493_v29 = vshrl.u32 %v1120_v5, 16  ;;  %v1499_v30 = vshll.u32 %v1138_v12, 16  ;;  %v5463_v42 = vrot.slane %v1942_v54, 9 }
 0x1eb   : > { %1090 = vst [vmem:[#allocation2 + $0xc8] sm:$0x1] %v1089_v13  ;;  %v1305_v23 = vrot.slane %v1304_v63, 4  ;;  %v1491_v50 = vrot.slane %v1489_v20, 5  ;;  %v2016_v41 = vrot.slane %v6506_v21, 5  ;;  %v2015_v48 = vrot.slane %v2013_v1, 4 }
 0x1ec   : > { %v1486_v45 = vor.u32 %v1485_v26, %v1482_v14  ;;  %v1495_v46 = vrot.slane %v1493_v29, 4  ;;  %v1501_v40 = vrot.slane %v1499_v30, 5  ;;  %v2014_v47 = vsel %vm6529_vm2, %v5463_v42, %v2013_v1  ;;  %v6727_v21 = vld [vmem:[#allocation2 + $0x5c] sm:$0x1]  ;;  %v1123_v29 = vld [vmem:[%s8333_s4] sm:$0x3] }
 0x1ed   : > { %v1310_v32 = vsel %vm6356_vm9, %v1305_v23, %v1309_v19  ;;  %v2487_v33 = vsel %vm1626_vm10, %v5493_v55, 0  ;;  %v2110_v18 = vunpack.c.l.b16 %v2014_v47  ;;  %v2017_v51 = vsel %vm6529_vm2, %v2015_v48, %v2016_v41  ;;  %v1943_v19 = vld [vmem:[#allocation2 + $0x30] sm:$0xe]  ;;  %v6745_v41 = vpop.f32.mrf.mxu0 }
 0x1ee   : > { %v1542_v49 = vunpack.c.l.b16 %v1310_v32  ;;  %v1487_v2 = vrot.slane %v1486_v45, 4  ;;  %v1496_v44 = vor.u32 %v1495_v46, %v1491_v50  ;;  %2496 = vmatpush.bf16.msra.mxu1 %v2487_v33  ;;  %v1312_v58 = vshrl.u32 %v1105_v34, 16 }
 0x1ef   : > { %v1315_v61 = vshll.u32 %v1105_v34, 16  ;;  %v1321_v36 = vshll.u32 %v6718_v37, 16  ;;  %v2111_v38 = vunpack.c.l.b16 %v2017_v51  ;;  %v1325_v59 = vshrl.u32 %v6718_v37, 16  ;;  %v1107_v34 = vld [vmem:[#allocation2 + $0x60] sm:$0xf] }
 0x1f0   : > { %v1567_v28 = vpack.c.b16 %v1542_v49, %v1541_v22  ;;  %v1492_v62 = vsel %vm6356_vm9, %v1487_v2, %v1491_v50  ;;  %v1497_v52 = vrot.slane %v1496_v44, 4  ;;  %v1314_v0 = vrot.slane %v1312_v58, 4  ;;  %v6751_v58 = vld [vmem:[#allocation2 + $0x64] sm:$0xf] }
 0x1f1   : > { %v1557_v3 = vunpack.c.l.b16 %v1492_v62  ;;  %v1317_v5 = vrot.slane %v1315_v61, 5  ;;  %v1323_v53 = vrot.slane %v1321_v36, 5  ;;  %v2139_v9 = vpack.c.b16 %v2111_v38, %v2110_v18  ;;  %v6759_v38 = vld [vmem:[#allocation2 + $0x68] sm:$0x1] }
 0x1f2   : > { %5370 = vmatmul.msk.bf16.gmra.mxu1 %vm1577_vm11, %v1567_v28  ;;  %v1502_v7 = vsel %vm6356_vm9, %v1497_v52, %v1501_v40  ;;  %v1331_v4 = vshll.u32 %v6727_v21, 16  ;;  %v1504_v12 = vshrl.u32 %v1121_v56, 16  ;;  %v1507_v14 = vshll.u32 %v1121_v56, 16 }
 0x1f3   : > { %v1558_v54 = vunpack.c.l.b16 %v1502_v7  ;;  %v1318_v10 = vor.u32 %v1317_v5, %v1314_v0  ;;  %5480 = vmatmul.msk.bf16.gmra.mxu0 %vm1577_vm11, %v2139_v9  ;;  %v1327_v15 = vrot.slane %v1325_v59, 4  ;;  %v1513_v16 = vshll.u32 %v1122_v6, 16  ;;  %v5783_v7 = vld [vmem:[#allocation2 + $0xc] sm:$0xff] }
 0x1f4   : > { %v1517_v27 = vshrl.u32 %v1122_v6, 16  ;;  %v1506_v13 = vrot.slane %v1504_v12, 4  ;;  %v1509_v63 = vrot.slane %v1507_v14, 5  ;;  %v1523_v26 = vshll.u32 %v1139_v11, 16 }
 0x1f5   : > { %v1575_v43 = vpack.c.b16 %v1558_v54, %v1557_v3  ;;  %v1319_v17 = vrot.slane %v1318_v10, 4  ;;  %v1328_v20 = vor.u32 %v1327_v15, %v1323_v53  ;;  %v1515_v55 = vrot.slane %v1513_v16, 5  ;;  %v6769_v16 = vpop.f32.mrf.mxu0 }
 0x1f6   : > { %v1519_v22 = vrot.slane %v1517_v27, 4  ;;  %v1333_v30 = vrot.slane %v1331_v4, 5  ;;  %v1510_v42 = vor.u32 %v1509_v63, %v1506_v13  ;;  %v1525_v45 = vrot.slane %v1523_v26, 5  ;;  %v6771_v27 = vld [vmem:[#allocation2 + $0x70] sm:$0xf] }
 0x1f7   : > { %5378 = vmatmul.msk.bf16.gmra.mxu3 %vm1577_vm11, %v1575_v43  ;;  %v1324_v23 = vsel %vm6356_vm9, %v1319_v17, %v1323_v53  ;;  %v1329_v50 = vrot.slane %v1328_v20, 4  ;;  %v5464_v46 = vrot.slane %v1943_v19, 9  ;;  %v2020_v40 = vrot.slane %v6564_v57, 5  ;;  %v1109_v26 = vld [vmem:[#allocation2 + $0x6c] sm:$0xf] }
 0x1f8   : > { %v1520_v1 = vor.u32 %v1519_v22, %v1515_v55  ;;  %v1848_v32 = vsel %vm1626_vm10, %v1123_v29, 0  ;;  %v1336_v33 = vshrl.u32 %v1107_v34, 16  ;;  %v1339_v49 = vshll.u32 %v1107_v34, 16  ;;  %v1944_v29 = vld [vmem:[#allocation2 + $0x3c] sm:$0xe] }
 0x1f9   : > { %v1334_v47 = vsel %vm6356_vm9, %v1329_v50, %v1333_v30  ;;  %1857 = vmatpush.bf16.msrb.mxu3 %v1848_v32  ;;  %v1543_v2 = vunpack.c.l.b16 %v1324_v23  ;;  %v2022_v18 = vrot.slane %v2020_v40, 4  ;;  %v2023_v51 = vrot.slane %v6579_v35, 5 }
 0x1fa   : > { %v1521_v48 = vrot.slane %v1520_v1, 4  ;;  %v1544_v44 = vunpack.c.l.b16 %v1334_v47  ;;  %v1511_v61 = vrot.slane %v1510_v42, 4  ;;  %v2021_v36 = vsel %vm6529_vm2, %v5464_v46, %v2020_v40 }
 0x1fb   : > { %v1338_v28 = vrot.slane %v1336_v33, 4  ;;  %v2024_v52 = vsel %vm6529_vm2, %v2022_v18, %v2023_v51  ;;  %v1341_v56 = vrot.slane %v1339_v49, 5  ;;  %v1345_v0 = vshll.u32 %v6751_v58, 16  ;;  %v5784_v18 = vld [vmem:[#allocation2 + $0x18] sm:$0xff] }
 0x1fc   : > { %v1526_v57 = vsel %vm6356_vm9, %v1521_v48, %v1525_v45  ;;  %v1568_v62 = vpack.c.b16 %v1544_v44, %v1543_v2  ;;  %v1516_v35 = vsel %vm6356_vm9, %v1511_v61, %v1515_v55  ;;  %v2113_v3 = vunpack.c.l.b16 %v2024_v52  ;;  %v6788_v48 = vld [vmem:[#allocation2 + $0x74] sm:$0x1]  ;;  %v6794_v52 = vld [vmem:[#allocation2 + $0x7c] sm:$0xf] }
 0x1fd   : > { %v1349_v5 = vshrl.u32 %v6751_v58, 16  ;;  %v1560_v53 = vunpack.c.l.b16 %v1526_v57  ;;  %v2112_v6 = vunpack.c.l.b16 %v2021_v36  ;;  %v1342_v9 = vor.u32 %v1341_v56, %v1338_v28  ;;  %v5767_v28 = vld [vmem:[#allocation2] sm:$0xff] }
 0x1fe   : > { %5371 = vmatmul.msk.bf16.vlgmr.msra.gmra.mxu2 %vm1577_vm11, %v1568_v62  ;;  %v1347_v59 = vrot.slane %v1345_v0, 5  ;;  %v1355_v54 = vshll.u32 %v6759_v38, 16  ;;  %v1559_v10 = vunpack.c.l.b16 %v1516_v35  ;;  %v2027_v15 = vrot.slane %v6632_v25, 5 }
 0x1ff   : > { %v1351_v4 = vrot.slane %v1349_v5, 4  ;;  %v2140_v11 = vpack.c.b16 %v2113_v3, %v2112_v6  ;;  %v1343_v43 = vrot.slane %v1342_v9, 4  ;;  %v1369_v20 = vshll.u32 %v6771_v27, 16  ;;  %v1945_v9 = vld [vmem:[#allocation2 + $0x48] sm:$0xe] }
 0x200   : > { %v1576_v14 = vpack.c.b16 %v1560_v53, %v1559_v10  ;;  %v1357_v13 = vrot.slane %v1355_v54, 5  ;;  %v1373_v55 = vshrl.u32 %v6771_v27, 16  ;;  %v2029_v22 = vrot.slane %v2027_v15, 4 }
 0x201   : > { %v1352_v12 = vor.u32 %v1351_v4, %v1347_v59  ;;  %v1348_v63 = vsel %vm6356_vm9, %v1343_v43, %v1347_v59  ;;  %v2030_v34 = vrot.slane %v6634_v31, 5  ;;  %v1360_v23 = vshrl.u32 %v1109_v26, 16 }
 0x202   : > { %5558 = vmatmul.msk.bf16.vlgmr.msra.gmra.mxu1 %vm1577_vm11, %v5783_v7  ;;  %v1545_v30 = vunpack.c.l.b16 %v1348_v63  ;;  %v1363_v50 = vshll.u32 %v1109_v26, 16  ;;  %v1371_v42 = vrot.slane %v1369_v20, 5  ;;  %v1375_v1 = vrot.slane %v1373_v55, 4  ;;  %v1111_v7 = vld [vmem:[#allocation2 + $0x78] sm:$0xf] }
 0x203   : > { %5481 = vmatmul.msk.bf16.gmra.mxu0 %vm1577_vm11, %v2140_v11  ;;  %v1353_v17 = vrot.slane %v1352_v12, 4  ;;  %v5465_v46 = vrot.slane %v1944_v29, 9  ;;  %v2031_v40 = vsel %vm6529_vm2, %v2029_v22, %v2030_v34  ;;  %v1362_v49 = vrot.slane %v1360_v23, 4  ;;  %v6811_v63 = vld [vmem:[#allocation2 + $0x80] sm:$0x1]  ;;  %v5785_v22 = vld [vmem:[#allocation2 + $0x24] sm:$0xff] }
 0x204   : > { %v2115_v33 = vunpack.c.l.b16 %v2031_v40  ;;  %v1365_v2 = vrot.slane %v1363_v50, 5  ;;  %v1376_v31 = vor.u32 %v1375_v1, %v1371_v42  ;;  %v1379_v51 = vshll.u32 %v6788_v48, 16 }
 0x205   : > { %v1358_v19 = vsel %vm6356_vm9, %v1353_v17, %v1357_v13  ;;  %v2028_v32 = vsel %vm6529_vm2, %v5465_v46, %v2027_v15  ;;  %v2034_v62 = vrot.slane %v6687_v24, 5  ;;  %v1393_v0 = vshll.u32 %v6794_v52, 16 }
 0x206   : > { %v1546_v25 = vunpack.c.l.b16 %v1358_v19  ;;  %v2114_v44 = vunpack.c.l.b16 %v2028_v32  ;;  %v1366_v57 = vor.u32 %v1365_v2, %v1362_v49  ;;  %v1377_v36 = vrot.slane %v1376_v31, 4  ;;  %v1113_v2 = vld [vmem:[#allocation2 + $0x84] sm:$0xf] }
 0x207   : > { %5379 = vmatmul.msk.bf16.gmra.mxu3 %vm1577_vm11, %v1576_v14  ;;  %v1381_v56 = vrot.slane %v1379_v51, 5  ;;  %v1397_v5 = vshrl.u32 %v6794_v52, 16  ;;  %v2036_v53 = vrot.slane %v2034_v62, 4  ;;  %v2037_v4 = vrot.slane %v6691_v39, 5 }
 0x208   : > { %v1569_v45 = vpack.c.b16 %v1546_v25, %v1545_v30  ;;  %v2141_v61 = vpack.c.b16 %v2115_v33, %v2114_v44  ;;  %v1367_v35 = vrot.slane %v1366_v57, 4  ;;  %v1384_v54 = vshrl.u32 %v1111_v7, 16  ;;  %v1946_v44 = vld [vmem:[#allocation2 + $0x54] sm:$0xe] }
 0x209   : > { %v1382_v3 = vsel %vm6356_vm9, %v1377_v36, %v1381_v56  ;;  %v1387_v10 = vshll.u32 %v1111_v7, 16  ;;  %v1395_v11 = vrot.slane %v1393_v0, 5  ;;  %v1399_v12 = vrot.slane %v1397_v5, 4  ;;  %v6840_v7 = vld [vmem:[#allocation2 + $0x8c] sm:$0x1] }
 0x20a   : > { %v1372_v24 = vsel %vm6356_vm9, %v1367_v35, %v1371_v42  ;;  %v1548_v59 = vunpack.c.l.b16 %v1382_v3  ;;  %v5466_v15 = vrot.slane %v1945_v9, 9  ;;  %v2038_v43 = vsel %vm6529_vm2, %v2036_v53, %v2037_v4  ;;  %v6819_v42 = vld [vmem:[#allocation2 + $0x88] sm:$0xf] }
 0x20b   : > { %v6786_v47 = vpop.f32.mrf.mxu0  ;;  %v1547_v14 = vunpack.c.l.b16 %v1372_v24  ;;  %v2117_v19 = vunpack.c.l.b16 %v2038_v43  ;;  %v1386_v20 = vrot.slane %v1384_v54, 4  ;;  %v1389_v55 = vrot.slane %v1387_v10, 5  ;;  %v5786_v54 = vld [vmem:[#allocation2 + $0x30] sm:$0xff] }
 0x20c   : > { %v2035_v13 = vsel %vm6529_vm2, %v5466_v15, %v2034_v62  ;;  %v1400_v25 = vor.u32 %v1399_v12, %v1395_v11  ;;  %v1403_v26 = vshll.u32 %v6811_v63, 16  ;;  %v2041_v50 = vrot.slane %v6718_v37, 5  ;;  %v5574_v37 = vld [vmem:[%s8333_s4 + $0x8] sm:$0x3] }
 0x20d   : > { %v1570_v17 = vpack.c.b16 %v1548_v59, %v1547_v14  ;;  %v2116_v39 = vunpack.c.l.b16 %v2035_v13  ;;  %v1390_v34 = vor.u32 %v1389_v55, %v1386_v20  ;;  %v1417_v32 = vshll.u32 %v6819_v42, 16 }
 0x20e   : > { %5372 = vmatmul.msk.bf16.gmra.mxu2 %vm1577_vm11, %v1569_v45  ;;  %v1401_v23 = vrot.slane %v1400_v25, 4  ;;  %v1405_v1 = vrot.slane %v1403_v26, 5  ;;  %v5768_v45 = vld [vmem:[#allocation2 + $0xc] sm:$0xff]  ;;  %v1421_v33 = vshrl.u32 %v6819_v42, 16  ;;  %v2043_v49 = vrot.slane %v2041_v50, 4 }
 0x20f   : > { %v2142_v30 = vpack.c.b16 %v2117_v19, %v2116_v39  ;;  %v1391_v46 = vrot.slane %v1390_v34, 4  ;;  %v1408_v57 = vshrl.u32 %v1113_v2, 16  ;;  %v1411_v36 = vshll.u32 %v1113_v2, 16  ;;  %v5769_v19 = vld [vmem:[#allocation2 + $0x18] sm:$0xff]  ;;  %v1947_v34 = vld [vmem:[#allocation2 + $0x60] sm:$0xe] }
 0x210   : > { %v1406_v40 = vsel %vm6356_vm9, %v1401_v23, %v1405_v1  ;;  %v1423_v62 = vrot.slane %v1421_v33, 4  ;;  %v5467_v35 = vrot.slane %v1946_v44, 9  ;;  %v1427_v10 = vshll.u32 %v6840_v7, 16  ;;  %v2612_v44 = vld [vmem:[#allocation2 + $0x14] sm:$0x1] }
 0x211   : > { %v1396_v31 = vsel %vm6356_vm9, %v1391_v46, %v1395_v11  ;;  %v1550_v51 = vunpack.c.l.b16 %v1406_v40  ;;  %v1413_v9 = vrot.slane %v1411_v36, 5  ;;  %v2048_v43 = vrot.slane %v6751_v58, 5  ;;  %v2610_v58 = vld [vmem:[#allocation2 + $0xc] sm:$0xf] }
 0x212   : > { %5559 = vmatmul.msk.bf16.gmra.mxu1 %vm1577_vm11, %v5784_v18  ;;  %v3141_v18 = vsel %vm1626_vm10, %v5574_v37, 0  ;;  %v1549_v56 = vunpack.c.l.b16 %v1396_v31  ;;  %v2042_v53 = vsel %vm6529_vm2, %v5467_v35, %v2041_v50  ;;  %v1429_v13 = vrot.slane %v1427_v10, 5  ;;  %v2613_v10 = vld [vmem:[#allocation2 + $0x18] sm:$0xf] }
 0x213   : > { %5482 = vmatmul.msk.bf16.gmra.mxu0 %vm1577_vm11, %v2141_v61  ;;  %v6802_v6 = vpop.f32.mrf.mxu0  ;;  %v2044_v61 = vrot.slane %v6727_v21, 5  ;;  %3150 = vmatpush.bf16.msrb.mxu2 %v3141_v18  ;;  %v1410_v21 = vrot.slane %v1408_v57, 4  ;;  %v2118_v4 = vunpack.c.l.b16 %v2042_v53  ;;  %v2050_v26 = vrot.slane %v2048_v43, 4  ;;  %v2614_v53 = vld [vmem:[#allocation2 + $0x1c] sm:$0xf] }
 0x214   : > { %v1571_v5 = vpack.c.b16 %v1550_v51, %v1549_v56  ;;  %v2051_v23 = vrot.slane %v6759_v38, 5  ;;  %v2659_v1 = vshrl.u32 %v2610_v58, 16  ;;  %v5468_v33 = vrot.slane %v1947_v34, 9 }
 0x215   : > { %v2045_v3 = vsel %vm6529_vm2, %v2043_v49, %v2044_v61  ;;  %v1414_v12 = vor.u32 %v1413_v9, %v1410_v21  ;;  %v2055_v56 = vrot.slane %v6771_v27, 5  ;;  %v5770_v21 = vld [vmem:[#allocation2 + $0x24] sm:$0xff]  ;;  %v2696_v27 = vshrl.u32 %v2614_v53, 16 }
 0x216   : > { %v2119_v24 = vunpack.c.l.b16 %v2045_v3  ;;  %v2052_v49 = vsel %vm6529_vm2, %v2050_v26, %v2051_v23  ;;  %v2049_v37 = vsel %vm6529_vm2, %v5468_v33, %v2048_v43  ;;  %v2661_v51 = vrot.slane %v2659_v1, 4  ;;  %v1948_v43 = vld [vmem:[#allocation2 + $0x6c] sm:$0xe] }
 0x217   : > { %5444 = vmatmul.msk.bf16.vlgmr.msrb.gmra.mxu3 %vm1577_vm11, %v5767_v28  ;;  %v1419_v28 = vrot.slane %v1417_v32, 5  ;;  %v1415_v55 = vrot.slane %v1414_v12, 4  ;;  %v2121_v18 = vunpack.c.l.b16 %v2052_v49  ;;  %v2120_v36 = vunpack.c.l.b16 %v2049_v37  ;;  %v5788_v37 = vld [vmem:[#allocation2 + $0x48] sm:$0xff] }
 0x218   : > { %v2143_v11 = vpack.c.b16 %v2119_v24, %v2118_v4  ;;  %v2057_v9 = vrot.slane %v2055_v56, 4  ;;  %v2058_v12 = vrot.slane %v6788_v48, 5  ;;  %v2686_v26 = vshll.u32 %v2613_v10, 16 }
 0x219   : > { %v1424_v59 = vor.u32 %v1423_v62, %v1419_v28  ;;  %v2678_v62 = vshll.u32 %v2612_v44, 16  ;;  %v2144_v35 = vpack.c.b16 %v2121_v18, %v2120_v36  ;;  %v3333_v23 = vrot.slane %v2612_v44, 5 }
 0x21b   : > { %v6815_v29 = vpop.f32.mrf.mxu0  ;;  %v1425_v14 = vrot.slane %v1424_v59, 4  ;;  %v2680_v24 = vrot.slane %v2678_v62, 5  ;;  %v2062_v62 = vrot.slane %v6794_v52, 5  ;;  %v2065_v52 = vrot.slane %v6811_v63, 5 }
 0x21d   : > { %v1430_v25 = vsel %vm6356_vm9, %v1425_v14, %v1429_v13 }
 0x21e   : > { %5373 = vmatmul.msk.bf16.gmra.mxu2 %vm1577_vm11, %v1570_v17  ;;  %v6848_v17 = vld [vmem:[#allocation2 + $0x10] sm:$0xf]  ;;  %v1552_v50 = vunpack.c.l.b16 %v1430_v25 }
 0x21f   : > { %v2668_v39 = vshll.u32 %v6848_v17, 16  ;;  %v3330_v59 = vrot.slane %v6848_v17, 5 }
 0x221   : > { %v2670_v46 = vrot.slane %v2668_v39, 5  ;;  %v2683_v39 = vshrl.u32 %v2613_v10, 16 }
 0x222   : > { %5560 = vmatmul.msk.bf16.gmra.mxu1 %vm1577_vm11, %v5785_v22  ;;  %v2672_v22 = vshrl.u32 %v6848_v17, 16 }
 0x223   : > { %5483 = vmatmul.msk.bf16.gmra.mxu0 %vm1577_vm11, %v2142_v30  ;;  %v6836_v0 = vpop.f32.mrf.mxu0  ;;  %v1420_v30 = vsel %vm6356_vm9, %v1415_v55, %v1419_v28  ;;  %v5787_v28 = vld [vmem:[#allocation2 + $0x3c] sm:$0xff]  ;;  %v2059_v55 = vsel %vm6529_vm2, %v2057_v9, %v2058_v12 }
 0x224   : > { %v2674_v40 = vrot.slane %v2672_v22, 4  ;;  %v1551_v32 = vunpack.c.l.b16 %v1420_v30  ;;  %v3332_v22 = vrot.slane %v3330_v59, 4  ;;  %v5469_v30 = vrot.slane %v1948_v43, 9 }
 0x225   : > { %v2123_v1 = vunpack.c.l.b16 %v2059_v55 }
 0x226   : > { %v1572_v2 = vpack.c.b16 %v1552_v50, %v1551_v32  ;;  %v2675_v61 = vor.u32 %v2674_v40, %v2670_v46  ;;  %v2056_v50 = vsel %vm6529_vm2, %v5469_v30, %v2055_v56  ;;  %v2685_v40 = vrot.slane %v2683_v39, 4  ;;  %v2617_v56 = vld [vmem:[#allocation2 + $0x28] sm:$0xf]  ;;  %v2618_v30 = vld [vmem:[#allocation2 + $0x2c] sm:$0x1] }
 0x227   : > { %5445 = vmatmul.msk.bf16.gmra.mxu3 %vm1577_vm11, %v5768_v45  ;;  %v2662_v45 = vshll.u32 %v2610_v58, 16  ;;  %v2698_v58 = vrot.slane %v2696_v27, 4  ;;  %v2688_v32 = vrot.slane %v2686_v26, 5  ;;  %v6892_v49 = vsel %vm6529_vm2, %v3332_v22, %v3333_v23 }
 0x228   : > { %v2720_v9 = vshrl.u32 %v2617_v56, 16 }
 0x229   : > { %v2664_v38 = vrot.slane %v2662_v45, 5 }
 0x22b   : > { %v6845_v15 = vpop.f32.mrf.mxu1  ;;  %v6851_v20 = vpop.f32.mrf.mxu0  ;;  %v2665_v3 = vor.u32 %v2664_v38, %v2661_v51 }
 0x22d   : > { %v2666_v4 = vrot.slane %v2665_v3, 4  ;;  %v5771_v3 = vld [vmem:[#allocation2 + $0x30] sm:$0xff] }
 0x22e   : > { %5374 = vmatmul.msk.bf16.gmra.mxu2 %vm1577_vm11, %v1571_v5  ;;  %v2676_v5 = vrot.slane %v2675_v61, 4  ;;  %v2689_v61 = vor.u32 %v2688_v32, %v2685_v40  ;;  %v2726_v40 = vshll.u32 %v2618_v30, 16 }
 0x22f   : > { %v2671_v13 = vsel %vm6356_vm9, %v2666_v4, %v2670_v46  ;;  %v2615_v46 = vld [vmem:[#allocation2 + $0x20] sm:$0x1]  ;;  %v2064_v4 = vrot.slane %v2062_v62, 4 }
 0x230   : > { %v3044_v34 = vunpack.c.l.b16 %v2671_v13  ;;  %v2702_v18 = vshll.u32 %v2615_v46, 16  ;;  %v2722_v13 = vrot.slane %v2720_v9, 4  ;;  %v5789_v46 = vld [vmem:[#allocation2 + $0x54] sm:$0xff] }
 0x231   : > { %v2066_v39 = vsel %vm6529_vm2, %v2064_v4, %v2065_v52 }
 0x232   : > { %5561 = vmatmul.msk.bf16.gmra.mxu1 %vm1577_vm11, %v5786_v54  ;;  %v2681_v54 = vsel %vm6356_vm9, %v2676_v5, %v2680_v24  ;;  %v2690_v5 = vrot.slane %v2689_v61, 4  ;;  %v2616_v24 = vld [vmem:[#allocation2 + $0x24] sm:$0xf]  ;;  %v2728_v61 = vrot.slane %v2726_v40, 5 }
 0x233   : > { %5484 = vmatmul.msk.bf16.gmra.mxu0 %vm1577_vm11, %v2143_v11  ;;  %v6865_v31 = vpop.f32.mrf.mxu1  ;;  %v6868_v57 = vpop.f32.mrf.mxu0  ;;  %v2692_v11 = vshll.u32 %v2614_v53, 16  ;;  %v3045_v25 = vunpack.c.l.b16 %v2681_v54  ;;  %v1949_v54 = vld [vmem:[#allocation2 + $0x78] sm:$0xe]  ;;  %v2707_v27 = vshrl.u32 %v2616_v24, 16  ;;  %v2710_v12 = vshll.u32 %v2616_v24, 16  ;;  %v5790_v40 = vld [vmem:[#allocation2 + $0x60] sm:$0xff] }
 0x235   : > { %v2694_v48 = vrot.slane %v2692_v11, 5  ;;  %v3076_v45 = vpack.c.b16 %v3045_v25, %v3044_v34  ;;  %v5470_v25 = vrot.slane %v1949_v54, 9  ;;  %v2709_v34 = vrot.slane %v2707_v27, 4  ;;  %v2619_v54 = vld [vmem:[#allocation2 + $0x30] sm:$0xf] }
 0x236   : > { %v2712_v23 = vrot.slane %v2710_v12, 5  ;;  %v2731_v17 = vshrl.u32 %v2619_v54, 16 }
 0x237   : > { %5446 = vmatmul.msk.bf16.gmra.mxu3 %vm1577_vm11, %v5769_v19  ;;  %v2699_v33 = vor.u32 %v2698_v58, %v2694_v48  ;;  %v2695_v10 = vsel %vm6356_vm9, %v2690_v5, %v2694_v48  ;;  %v2063_v48 = vsel %vm6529_vm2, %v5470_v25, %v2062_v62  ;;  %v5772_v62 = vld [vmem:[#allocation2 + $0x3c] sm:$0xff] }
 0x238   : > { %v3046_v22 = vunpack.c.l.b16 %v2695_v10  ;;  %v2713_v32 = vor.u32 %v2712_v23, %v2709_v34  ;;  %v2621_v34 = vld [vmem:[#allocation2 + $0x38] sm:$0x1]  ;;  %v2733_v23 = vrot.slane %v2731_v17, 4 }
 0x239   : > { %v2700_v36 = vrot.slane %v2699_v33, 4  ;;  %v3264_v33 = vld [vmem:[#allocation2 + $0xc] sm:$0xe] }
 0x23e   : > { %5375 = vmatmul.msk.bf16.gmra.mxu2 %vm1577_vm11, %v1572_v2  ;;  %v2122_v2 = vunpack.c.l.b16 %v2056_v50  ;;  %v2125_v50 = vunpack.c.l.b16 %v2066_v39 }
 0x23f   : > { %v6878_v14 = vpop.f32.mrf.mxu1 }
 0x240   : > { %v2145_v44 = vpack.c.b16 %v2123_v1, %v2122_v2 }
 0x242   : > { %5562 = vmatmul.msk.bf16.gmra.mxu1 %vm1577_vm11, %v5787_v28 }
 0x243   : > { %5485 = vmatmul.msk.bf16.gmra.mxu0 %vm1577_vm11, %v2144_v35  ;;  %v6882_v19 = vpop.f32.mrf.mxu0  ;;  %v2704_v35 = vrot.slane %v2702_v18, 5  ;;  %v2069_v18 = vrot.slane %v6819_v42, 5 }
 0x245   : > { %v2705_v53 = vsel %vm6356_vm9, %v2700_v36, %v2704_v35  ;;  %v5591_v36 = vrot.slane %v3264_v33, 9  ;;  %v2714_v35 = vrot.slane %v2713_v32, 4  ;;  %v2071_v4 = vrot.slane %v2069_v18, 4 }
 0x246   : > { %v3047_v11 = vunpack.c.l.b16 %v2705_v53  ;;  %v2750_v32 = vshll.u32 %v2621_v34, 16 }
 0x247   : > { %5447 = vmatmul.msk.bf16.gmra.mxu3 %vm1577_vm11, %v5770_v21  ;;  %v6895_v51 = vpop.f32.mrf.mxu1  ;;  %v2716_v21 = vshll.u32 %v2617_v56, 16  ;;  %v3331_v42 = vsel %vm6529_vm2, %v5591_v36, %v3330_v59  ;;  %v2623_v36 = vld [vmem:[#allocation2 + $0x40] sm:$0xf] }
 0x248   : > { %v3077_v63 = vpack.c.b16 %v3047_v11, %v3046_v22  ;;  %v3442_v10 = vunpack.c.l.b16 %v3331_v42  ;;  %v2072_v11 = vrot.slane %v6840_v7, 5  ;;  %v2768_v42 = vshrl.u32 %v2623_v36, 16 }
 0x249   : > { %v2718_v43 = vrot.slane %v2716_v21, 5 }
 0x24a   : > { %v2073_v22 = vsel %vm6529_vm2, %v2071_v4, %v2072_v11 }
 0x24b   : > { %v6900_v28 = vpop.f32.mrf.mxu0  ;;  %v2723_v1 = vor.u32 %v2722_v13, %v2718_v43  ;;  %v2719_v52 = vsel %vm6356_vm9, %v2714_v35, %v2718_v43  ;;  %v2734_v13 = vshll.u32 %v2619_v54, 16  ;;  %v2127_v43 = vunpack.c.l.b16 %v2073_v22  ;;  %v2622_v35 = vld [vmem:[#allocation2 + $0x3c] sm:$0xf]  ;;  %v1951_v54 = vld [vmem:[#allocation2 + $0x90] sm:$0xe] }
 0x24c   : > { %v5472_v22 = vrot.slane %v1951_v54, 9 }
 0x24d   : > { %v6898_v38 = vpop.f32.mrf.mxu3  ;;  %v2736_v7 = vrot.slane %v2734_v13, 5 }
 0x24e   : > { %5575 = vmatmul.msk.bf16.vlgmr.msrb.gmra.mxu2 %vm1577_vm11, %v3076_v45  ;;  %8366 = vst [vmem:[#allocation13_spill] sm:$0xff] %v6898_v38  ;;  %v2124_v45 = vunpack.c.l.b16 %v2063_v48  ;;  %v3048_v48 = vunpack.c.l.b16 %v2719_v52  ;;  %v2758_v52 = vshll.u32 %v2622_v35, 16  ;;  %v2630_v38 = vld [vmem:[#allocation2 + $0x5c] sm:$0x1] }
 0x250   : > { %v2146_v2 = vpack.c.b16 %v2125_v50, %v2124_v45 }
 0x252   : > { %5563 = vmatmul.msk.bf16.gmra.mxu1 %vm1577_vm11, %v5788_v37  ;;  %v2724_v37 = vrot.slane %v2723_v1, 4 }
 0x253   : > { %5486 = vmatmul.msk.bf16.gmra.mxu0 %vm1577_vm11, %v2145_v44  ;;  %v2620_v44 = vld [vmem:[#allocation2 + $0x34] sm:$0xf] }
 0x254   : > { %v2729_v53 = vsel %vm6356_vm9, %v2724_v37, %v2728_v61  ;;  %v2740_v24 = vshll.u32 %v2620_v44, 16  ;;  %v2744_v21 = vshrl.u32 %v2620_v44, 16  ;;  %v2737_v37 = vor.u32 %v2736_v7, %v2733_v23  ;;  %v5995_v44 = vld [vmem:[#allocation2 + $0x94] sm:$0xf] }
 0x255   : > { %v6914_v26 = vpop.f32.mrf.mxu3  ;;  %v3049_v27 = vunpack.c.l.b16 %v2729_v53  ;;  %v2076_v61 = vrot.slane %v5995_v44, 5  ;;  %v2760_v23 = vrot.slane %v2758_v52, 5  ;;  %v5791_v44 = vld [vmem:[#allocation2 + $0x6c] sm:$0xff]  ;;  %v4604_v52 = vld [vmem:[#allocation2 + $0x24] sm:$0xe] }
 0x256   : > { %8367 = vst [vmem:[#allocation14_spill] sm:$0xff] %v6914_v26  ;;  %v2742_v25 = vrot.slane %v2740_v24, 5  ;;  %v2746_v59 = vrot.slane %v2744_v21, 4  ;;  %v2738_v53 = vrot.slane %v2737_v37, 4  ;;  %v2764_v21 = vshll.u32 %v2623_v36, 16 }
 0x257   : > { %5448 = vmatmul.msk.bf16.gmra.mxu3 %vm1577_vm11, %v5771_v3  ;;  %v3443_v3 = vunpack.c.l.b16 %v6892_v49  ;;  %v1950_v49 = vld [vmem:[#allocation2 + $0x84] sm:$0xe]  ;;  %v3078_v30 = vpack.c.b16 %v3049_v27, %v3048_v48  ;;  %v5996_v27 = vld [vmem:[#allocation2 + $0x98] sm:$0x1]  ;;  %v6977_v37 = vld [vmem:[#allocation2 + $0x1c] sm:$0xf] }
 0x258   : > { %v6910_v55 = vpop.f32.mrf.mxu1  ;;  %v5471_v39 = vrot.slane %v1950_v49, 9  ;;  %v2747_v50 = vor.u32 %v2746_v59, %v2742_v25  ;;  %v2755_v49 = vshrl.u32 %v2622_v35, 16  ;;  %v2743_v11 = vsel %vm6356_vm9, %v2738_v53, %v2742_v25  ;;  %v5997_v35 = vld [vmem:[#allocation2 + $0xa0] sm:$0xf]  ;;  %v4603_v53 = vld [vmem:[#allocation2 + $0x18] sm:$0xe] }
 0x259   : > { %v6941_v12 = vpack.c.b16 %v3443_v3, %v3442_v10  ;;  %v5773_v3 = vld [vmem:[#allocation2 + $0x48] sm:$0xff]  ;;  %v2078_v10 = vrot.slane %v2076_v61, 4  ;;  %v2079_v17 = vrot.slane %v5996_v27, 5  ;;  %v6967_v48 = vrot.slane %v2764_v21, 5 }
 0x25a   : > { %v3050_v34 = vunpack.c.l.b16 %v2743_v11  ;;  %v2077_v25 = vsel %vm6529_vm2, %v5472_v22, %v2076_v61  ;;  %v6981_v61 = vld [vmem:[#allocation2 + $0x28] sm:$0xf]  ;;  %v2626_v27 = vld [vmem:[#allocation2 + $0x4c] sm:$0xf]  ;;  %v5722_v22 = vrot.slane %v4603_v53, 9 }
 0x25b   : > { %8370 = vst [vmem:[#allocation17_spill] sm:$0xff] %v6941_v12 }
 0x25c   : > { %v6916_v58 = vpop.f32.mrf.mxu0 }
 0x25e   : > { %5576 = vmatmul.msk.bf16.gmra.mxu2 %vm1577_vm11, %v3077_v63  ;;  %v2070_v63 = vsel %vm6529_vm2, %v5471_v39, %v2069_v18  ;;  %v2748_v18 = vrot.slane %v2747_v50, 4  ;;  %v2624_v50 = vld [vmem:[#allocation2 + $0x44] sm:$0x1] }
 0x25f   : > { %v2774_v36 = vshll.u32 %v2624_v50, 16 }
 0x260   : > { %v6924_v56 = vpop.f32.mrf.mxu1 }
 0x261   : > { %8368 = vst [vmem:[#allocation15_spill] sm:$0xff] %v6924_v56 }
 0x262   : > { %5564 = vmatmul.msk.bf16.gmra.mxu1 %vm1577_vm11, %v5789_v46  ;;  %v2126_v46 = vunpack.c.l.b16 %v2070_v63  ;;  %v2770_v63 = vrot.slane %v2768_v42, 4 }
 0x263   : > { %5487 = vmatmul.msk.bf16.gmra.mxu0 %vm1577_vm11, %v2146_v2 }
 0x264   : > { %v6936_v9 = vpop.f32.mrf.mxu0  ;;  %v2147_v2 = vpack.c.b16 %v2127_v43, %v2126_v46  ;;  %v2757_v43 = vrot.slane %v2755_v49, 4  ;;  %v4669_v49 = vrot.slane %v6977_v37, 5 }
 0x265   : > { %v6927_v5 = vpop.f32.mrf.mxu3 }
 0x266   : > { %8369 = vst [vmem:[#allocation16_spill] sm:$0xff] %v6927_v5 }
 0x267   : > { %5449 = vmatmul.msk.bf16.gmra.mxu3 %vm1577_vm11, %v5772_v62  ;;  %v2752_v62 = vrot.slane %v2750_v32, 5 }
 0x269   : > { %v2753_v24 = vsel %vm6356_vm9, %v2748_v18, %v2752_v62  ;;  %v2128_v18 = vunpack.c.l.b16 %v2077_v25 }
 0x26a   : > { %v3051_v59 = vunpack.c.l.b16 %v2753_v24 }
 0x26c   : > { %v3079_v7 = vpack.c.b16 %v3051_v59, %v3050_v34  ;;  %v6992_v59 = vld [vmem:[#allocation2 + $0x2c] sm:$0x1]  ;;  %v5774_v34 = vld [vmem:[#allocation2 + $0x54] sm:$0xff] }
 0x26d   : > { %v6950_v45 = vpop.f32.mrf.mxu3  ;;  %v4679_v53 = vrot.slane %v6992_v59, 5 }
 0x26e   : > { %5577 = vmatmul.msk.bf16.gmra.mxu2 %vm1577_vm11, %v3078_v30  ;;  %8372 = vst [vmem:[#allocation19_spill] sm:$0xff] %v6950_v45  ;;  %v2080_v30 = vsel %vm6529_vm2, %v2078_v10, %v2079_v17  ;;  %v6988_v10 = vld [vmem:[#allocation2 + $0x20] sm:$0x1]  ;;  %v2776_v17 = vrot.slane %v2774_v36, 5 }
 0x26f   : > { %v6947_v1 = vpop.f32.mrf.mxu1  ;;  %v2129_v46 = vunpack.c.l.b16 %v2080_v30  ;;  %v4676_v30 = vrot.slane %v6981_v61, 5  ;;  %v4672_v25 = vrot.slane %v6988_v10, 5 }
 0x270   : > { %8371 = vst [vmem:[#allocation18_spill] sm:$0xff] %v6947_v1  ;;  %v6952_v33 = vpop.f32.mrf.mxu0 }
 0x271   : > { %v2148_v21 = vpack.c.b16 %v2129_v46, %v2128_v18  ;;  %v2788_v46 = vshll.u32 %v2626_v27, 16 }
 0x272   : > { %5565 = vmatmul.msk.bf16.gmra.mxu1 %vm1577_vm11, %v5790_v40  ;;  %v2771_v40 = vor.u32 %v2770_v63, %v6967_v48  ;;  %v4671_v63 = vrot.slane %v4669_v49, 4 }
 0x273   : > { %5488 = vmatmul.msk.bf16.gmra.mxu0 %vm1577_vm11, %v2147_v2  ;;  %v2761_v2 = vor.u32 %v2760_v23, %v2757_v43  ;;  %v2625_v23 = vld [vmem:[#allocation2 + $0x48] sm:$0xf] }
 0x274   : > { %v2772_v54 = vrot.slane %v2771_v40, 4  ;;  %v2792_v40 = vshrl.u32 %v2626_v27, 16  ;;  %v2779_v27 = vshrl.u32 %v2625_v23, 16 }
 0x275   : > { %v2762_v11 = vrot.slane %v2761_v2, 4  ;;  %v4670_v2 = vsel %vm6529_vm2, %v5722_v22, %v4669_v49 }
 0x276   : > { %v2777_v50 = vsel %vm6356_vm9, %v2772_v54, %v2776_v17  ;;  %v2782_v17 = vshll.u32 %v2625_v23, 16 }
 0x277   : > { %5450 = vmatmul.msk.bf16.gmra.mxu3 %vm1577_vm11, %v5773_v3  ;;  %v6959_v4 = vpop.f32.mrf.mxu1  ;;  %v2083_v3 = vrot.slane %v5997_v35, 5  ;;  %v4678_v35 = vrot.slane %v4676_v30, 4  ;;  %v2767_v49 = vsel %vm6356_vm9, %v2762_v11, %v6967_v48  ;;  %v3053_v22 = vunpack.c.l.b16 %v2777_v50 }
 0x278   : > { %8373 = vst [vmem:[#allocation20_spill] sm:$0xff] %v6959_v4  ;;  %v6963_v13 = vpop.f32.mrf.mxu0  ;;  %v3052_v11 = vunpack.c.l.b16 %v2767_v49 }
 0x279   : > { %v2085_v43 = vrot.slane %v2083_v3, 4 }
 0x27a   : > { %v6965_v39 = vpop.f32.mrf.mxu3 }
 0x27b   : > { %8374 = vst [vmem:[#allocation21_spill] sm:$0xff] %v6965_v39  ;;  %v2794_v39 = vrot.slane %v2792_v40, 4  ;;  %v2781_v40 = vrot.slane %v2779_v27, 4  ;;  %v5999_v27 = vld [vmem:[#allocation2 + $0xac] sm:$0xf] }
 0x27e   : > { %5578 = vmatmul.msk.bf16.gmra.mxu2 %vm1577_vm11, %v3079_v7  ;;  %v5723_v7 = vrot.slane %v4604_v52, 9  ;;  %v1952_v52 = vld [vmem:[#allocation2 + $0x9c] sm:$0xe] }
 0x27f   : > { %v6974_v32 = vpop.f32.mrf.mxu1  ;;  %v5473_v26 = vrot.slane %v1952_v52, 9 }
 0x280   : > { %v6979_v62 = vpop.f32.mrf.mxu0  ;;  %v4677_v36 = vsel %vm6529_vm2, %v5723_v7, %v4676_v30  ;;  %v2790_v7 = vrot.slane %v2788_v46, 5 }
 0x281   : > { %v6986_v42 = vpop.f32.mrf.mxu2 }
 0x282   : > { %v6983_v24 = vpop.f32.mrf.mxu3  ;;  %5566 = vmatmul.msk.bf16.gmra.mxu1 %vm1577_vm11, %v5791_v44  ;;  %8376 = vst [vmem:[#allocation23_spill] sm:$0xff] %v6986_v42  ;;  %v4673_v44 = vsel %vm6529_vm2, %v4671_v63, %v4672_v25  ;;  %v4680_v63 = vsel %vm6529_vm2, %v4678_v35, %v4679_v53  ;;  %v2627_v35 = vld [vmem:[#allocation2 + $0x50] sm:$0x1]  ;;  %v2795_v53 = vor.u32 %v2794_v39, %v2790_v7 }
 0x283   : > { %8375 = vst [vmem:[#allocation22_spill] sm:$0xff] %v6983_v24  ;;  %5489 = vmatmul.msk.bf16.gmra.mxu0 %vm1577_vm11, %v2148_v21  ;;  %v5998_v21 = vld [vmem:[#allocation2 + $0xa4] sm:$0x1]  ;;  %v4782_v24 = vunpack.c.l.b16 %v4673_v44  ;;  %v4784_v45 = vunpack.c.l.b16 %v4680_v63  ;;  %v3080_v44 = vpack.c.b16 %v3053_v22, %v3052_v11  ;;  %v2629_v22 = vld [vmem:[#allocation2 + $0x58] sm:$0xf] }
 0x284   : > { %v2086_v54 = vrot.slane %v5998_v21, 5  ;;  %v4783_v21 = vunpack.c.l.b16 %v4677_v36  ;;  %v2784_v36 = vrot.slane %v2782_v17, 5  ;;  %v2090_v17 = vrot.slane %v5999_v27, 5 }
 0x285   : > { %v2812_v11 = vshll.u32 %v2629_v22, 16 }
 0x286   : > { %v2087_v48 = vsel %vm6529_vm2, %v2085_v43, %v2086_v54  ;;  %v7023_v50 = vpack.c.b16 %v4784_v45, %v4783_v21  ;;  %v5792_v43 = vld [vmem:[#allocation2 + $0x78] sm:$0xff]  ;;  %v2798_v54 = vshll.u32 %v2627_v35, 16  ;;  %v5775_v21 = vld [vmem:[#allocation2 + $0x60] sm:$0xff] }
 0x287   : > { %5451 = vmatmul.msk.bf16.gmra.mxu3 %vm1577_vm11, %v5774_v34  ;;  %v7001_v18 = vpop.f32.mrf.mxu1  ;;  %v4781_v34 = vunpack.c.l.b16 %v4670_v2  ;;  %v2084_v2 = vsel %vm6529_vm2, %v5473_v26, %v2083_v3  ;;  %v2131_v46 = vunpack.c.l.b16 %v2087_v48  ;;  %v2785_v26 = vor.u32 %v2784_v36, %v2781_v40  ;;  %v2628_v48 = vld [vmem:[#allocation2 + $0x54] sm:$0xf]  ;;  %v1953_v40 = vld [vmem:[#allocation2 + $0xa8] sm:$0xe] }
 0x288   : > { %v7017_v5 = vpop.f32.mrf.mxu0  ;;  %8380 = vst [vmem:[#allocation27_spill] sm:$0xff] %v7023_v50  ;;  %v2130_v52 = vunpack.c.l.b16 %v2084_v2  ;;  %v2796_v3 = vrot.slane %v2795_v53, 4  ;;  %v2800_v39 = vrot.slane %v2798_v54, 5  ;;  %v2816_v2 = vshrl.u32 %v2629_v22, 16  ;;  %v6000_v53 = vld [vmem:[#allocation2 + $0xb0] sm:$0x1] }
 0x289   : > { %v7015_v30 = vpop.f32.mrf.mxu2  ;;  %v7021_v23 = vpack.c.b16 %v4782_v24, %v4781_v34  ;;  %v2092_v36 = vrot.slane %v2090_v17, 4  ;;  %v2803_v54 = vshrl.u32 %v2628_v48, 16  ;;  %v2806_v27 = vshll.u32 %v2628_v48, 16 }
 0x28a   : > { %v7013_v25 = vpop.f32.mrf.mxu3  ;;  %8378 = vst [vmem:[#allocation25_spill] sm:$0xff] %v7015_v30  ;;  %v2149_v45 = vpack.c.b16 %v2131_v46, %v2130_v52  ;;  %v2801_v35 = vsel %vm6356_vm9, %v2796_v3, %v2800_v39  ;;  %v2093_v52 = vrot.slane %v6000_v53, 5  ;;  %v5474_v39 = vrot.slane %v1953_v40, 9  ;;  %v6002_v30 = vld [vmem:[#allocation2 + $0xbc] sm:$0x1] }
 0x28b   : > { %8377 = vst [vmem:[#allocation24_spill] sm:$0xff] %v7013_v25  ;;  %v2822_v40 = vshll.u32 %v2630_v38, 16  ;;  %v7070_v38 = vld [vmem:[#allocation2 + $0x38] sm:$0x1] }
 0x28c   : > { %8379 = vst [vmem:[#allocation26_spill] sm:$0xff] %v7021_v23  ;;  %v2091_v53 = vsel %vm6529_vm2, %v5474_v39, %v2090_v17 }
 0x28d   : > { %v2132_v23 = vunpack.c.l.b16 %v2091_v53  ;;  %8387 = vst [vmem:[#allocation34_spill] sm:$0xff] %v7070_v38  ;;  %v5776_v53 = vld [vmem:[#allocation2 + $0x6c] sm:$0xff] }
 0x28e   : > { %5579 = vmatmul.msk.bf16.gmra.mxu2 %vm1577_vm11, %v3080_v44  ;;  %v2786_v44 = vrot.slane %v2785_v26, 4  ;;  %v2818_v26 = vrot.slane %v2816_v2, 4 }
 0x28f   : > { %v7027_v63 = vpop.f32.mrf.mxu1 }
 0x290   : > { %v7036_v34 = vpop.f32.mrf.mxu0 }
 0x291   : > { %v7033_v49 = vpop.f32.mrf.mxu2  ;;  %8383 = vst [vmem:[#allocation30_spill] sm:$0xff] %v7036_v34 }
 0x292   : > { %v7030_v24 = vpop.f32.mrf.mxu3  ;;  %5567 = vmatmul.msk.bf16.gmra.mxu1 %vm1577_vm11, %v5792_v43  ;;  %8382 = vst [vmem:[#allocation29_spill] sm:$0xff] %v7033_v49  ;;  %v2791_v43 = vsel %vm6356_vm9, %v2786_v44, %v2790_v7  ;;  %v2805_v44 = vrot.slane %v2803_v54, 4 }
 0x293   : > { %8381 = vst [vmem:[#allocation28_spill] sm:$0xff] %v7030_v24  ;;  %5490 = vmatmul.msk.bf16.gmra.mxu0 %vm1577_vm11, %v2149_v45  ;;  %v3055_v45 = vunpack.c.l.b16 %v2801_v35  ;;  %v7045_v24 = vrot.slane %v2812_v11, 5  ;;  %v3054_v25 = vunpack.c.l.b16 %v2791_v43  ;;  %v2808_v35 = vrot.slane %v2806_v27, 5 }
 0x295   : > { %v3081_v7 = vpack.c.b16 %v3055_v45, %v3054_v25  ;;  %v2819_v48 = vor.u32 %v2818_v26, %v7045_v24  ;;  %v2809_v43 = vor.u32 %v2808_v35, %v2805_v44  ;;  %v6001_v45 = vld [vmem:[#allocation2 + $0xb8] sm:$0xf]  ;;  %v2824_v26 = vrot.slane %v2822_v40, 5  ;;  %v2631_v40 = vld [vmem:[#allocation2 + $0x60] sm:$0xf] }
 0x296   : > { %v2097_v27 = vrot.slane %v6001_v45, 5  ;;  %v2827_v4 = vshrl.u32 %v2631_v40, 16  ;;  %v2830_v1 = vshll.u32 %v2631_v40, 16 }
 0x297   : > { %5452 = vmatmul.msk.bf16.gmra.mxu3 %vm1577_vm11, %v5775_v21  ;;  %v7041_v46 = vpop.f32.mrf.mxu1  ;;  %v2094_v21 = vsel %vm6529_vm2, %v2092_v36, %v2093_v52  ;;  %v5793_v36 = vld [vmem:[#allocation2 + $0x84] sm:$0xff]  ;;  %v7061_v52 = vld [vmem:[#allocation2 + $0x34] sm:$0xf]  ;;  %v2820_v17 = vrot.slane %v2819_v48, 4  ;;  %v2810_v44 = vrot.slane %v2809_v43, 4  ;;  %v4686_v43 = vrot.slane %v7070_v38, 5 }
 0x298   : > { %v2133_v11 = vunpack.c.l.b16 %v2094_v21  ;;  %v7056_v2 = vpop.f32.mrf.mxu0  ;;  %v2632_v21 = vld [vmem:[#allocation2 + $0x64] sm:$0xf]  ;;  %v4605_v48 = vld [vmem:[#allocation2 + $0x30] sm:$0xe]  ;;  %v2832_v40 = vrot.slane %v2830_v1, 5 }
 0x299   : > { %v7049_v3 = vpop.f32.mrf.mxu2  ;;  %8385 = vst [vmem:[#allocation32_spill] sm:$0xff] %v7056_v2  ;;  %v2825_v35 = vsel %vm6356_vm9, %v2820_v17, %v2824_v26  ;;  %v2840_v45 = vshrl.u32 %v2632_v21, 16  ;;  %v1954_v17 = vld [vmem:[#allocation2 + $0xb4] sm:$0xe]  ;;  %v2815_v26 = vsel %vm6356_vm9, %v2810_v44, %v7045_v24  ;;  %v5724_v49 = vrot.slane %v4605_v48, 9 }
 0x29a   : > { %v7047_v22 = vpop.f32.mrf.mxu3  ;;  %8384 = vst [vmem:[#allocation31_spill] sm:$0xff] %v7049_v3  ;;  %v2150_v25 = vpack.c.b16 %v2133_v11, %v2132_v23  ;;  %v5624_v23 = vld [vmem:[%s8333_s4 + $0xc] sm:$0x3]  ;;  %v2099_v3 = vrot.slane %v2097_v27, 4  ;;  %v5475_v44 = vrot.slane %v1954_v17, 9  ;;  %v3056_v48 = vunpack.c.l.b16 %v2815_v26 }
 0x29b   : > { %v3826_v11 = vsel %vm1626_vm10, %v5624_v23, 0  ;;  %v2100_v23 = vrot.slane %v6002_v30, 5  ;;  %v2842_v2 = vrot.slane %v2840_v45, 4  ;;  %v2635_v1 = vld [vmem:[#allocation2 + $0x70] sm:$0xf] }
 0x29c   : > { %3835 = vmatpush.bf16.msrb.mxu0 %v3826_v11 }
 0x29d   : > { %v2101_v30 = vsel %vm6529_vm2, %v2099_v3, %v2100_v23  ;;  %v5794_v3 = vld [vmem:[#allocation2 + $0x90] sm:$0xff] }
 0x29e   : > { %5580 = vmatmul.msk.bf16.gmra.mxu2 %vm1577_vm11, %v3081_v7  ;;  %v4683_v7 = vrot.slane %v7061_v52, 5  ;;  %v2135_v34 = vunpack.c.l.b16 %v2101_v30 }
 0x29f   : > { %v7058_v50 = vpop.f32.mrf.mxu1 }
 0x2a0   : > { %v7085_v42 = vpop.f32.mrf.mxu0  ;;  %v4684_v24 = vsel %vm6529_vm2, %v5724_v49, %v4683_v7 }
 0x2a1   : > { %v7066_v54 = vpop.f32.mrf.mxu2  ;;  %8388 = vst [vmem:[#allocation35_spill] sm:$0xff] %v7085_v42  ;;  %v2098_v42 = vsel %vm6529_vm2, %v5475_v44, %v2097_v27  ;;  %v4785_v56 = vunpack.c.l.b16 %v4684_v24  ;;  %v2634_v24 = vld [vmem:[#allocation2 + $0x6c] sm:$0xf]  ;;  %v2860_v44 = vshll.u32 %v2635_v1, 16 }
 0x2a2   : > { %v7063_v39 = vpop.f32.mrf.mxu3  ;;  %5568 = vmatmul.msk.bf16.gmra.mxu1 %vm1577_vm11, %v5793_v36  ;;  %8386 = vst [vmem:[#allocation33_spill] sm:$0xff] %v7066_v54  ;;  %v2836_v36 = vshll.u32 %v2632_v21, 16  ;;  %v4685_v54 = vrot.slane %v4683_v7, 4  ;;  %v3057_v21 = vunpack.c.l.b16 %v2825_v35  ;;  %v2134_v7 = vunpack.c.l.b16 %v2098_v42  ;;  %v5777_v42 = vld [vmem:[#allocation2 + $0x78] sm:$0xff] }
 0x2a3   : > { %5491 = vmatmul.msk.bf16.gmra.mxu0 %vm1577_vm11, %v2150_v25 }
 0x2a4   : > { %v2838_v38 = vrot.slane %v2836_v36, 5  ;;  %v2151_v23 = vpack.c.b16 %v2135_v34, %v2134_v7 }
 0x2a6   : > { %v2843_v36 = vor.u32 %v2842_v2, %v2838_v38 }
 0x2a7   : > { %5453 = vmatmul.msk.bf16.gmra.mxu3 %vm1577_vm11, %v5776_v53  ;;  %v7079_v25 = vpop.f32.mrf.mxu1  ;;  %v4687_v53 = vsel %vm6529_vm2, %v4685_v54, %v4686_v43  ;;  %v3082_v54 = vpack.c.b16 %v3057_v21, %v3056_v48  ;;  %v2633_v43 = vld [vmem:[#allocation2 + $0x68] sm:$0x1]  ;;  %v2864_v48 = vshrl.u32 %v2635_v1, 16 }
 0x2a8   : > { %v4786_v35 = vunpack.c.l.b16 %v4687_v53  ;;  %v2846_v17 = vshll.u32 %v2633_v43, 16  ;;  %v7109_v2 = vpop.f32.mrf.mxu0 }
 0x2a9   : > { %v7091_v11 = vpop.f32.mrf.mxu2  ;;  %v2866_v1 = vrot.slane %v2864_v48, 4 }
 0x2aa   : > { %v7089_v12 = vpop.f32.mrf.mxu3  ;;  %8389 = vst [vmem:[#allocation36_spill] sm:$0xff] %v7091_v11  ;;  %v2829_v11 = vrot.slane %v2827_v4, 4  ;;  %v7102_v49 = vpack.c.b16 %v4786_v35, %v4785_v56  ;;  %v2844_v4 = vrot.slane %v2843_v36, 4  ;;  %v2848_v53 = vrot.slane %v2846_v17, 5  ;;  %v7116_v35 = vld [vmem:[#allocation2 + $0x40] sm:$0xf] }
 0x2ab   : > { %v1860_v56 = vadd.f32 %v7047_v22, %v6745_v41  ;;  %v7123_v41 = vld [vmem:[#allocation2 + $0x44] sm:$0x1] }
 0x2ac   : > { %8390 = vst [vmem:[#allocation37_spill] sm:$0xff] %v7102_v49  ;;  %v2833_v21 = vor.u32 %v2832_v40, %v2829_v11  ;;  %v2849_v34 = vsel %vm6356_vm9, %v2844_v4, %v2848_v53  ;;  %v4606_v11 = vld [vmem:[#allocation2 + $0x3c] sm:$0xe]  ;;  %v2851_v40 = vshrl.u32 %v2634_v24, 16  ;;  %v2862_v4 = vrot.slane %v2860_v44, 5 }
 0x2ad   : > { %v2292_v22 = vadd.f32 %v6851_v20, %v1860_v56  ;;  %v3059_v36 = vunpack.c.l.b16 %v2849_v34  ;;  %v5725_v7 = vrot.slane %v4606_v11, 9  ;;  %v1862_v20 = vadd.f32 %v7063_v39, %v6769_v16  ;;  %v2636_v11 = vld [vmem:[#allocation2 + $0x74] sm:$0x1] }
 0x2ae   : > { %5581 = vmatmul.msk.bf16.gmra.mxu2 %vm1577_vm11, %v3082_v54  ;;  %v2834_v30 = vrot.slane %v2833_v21, 4  ;;  %v2854_v21 = vshll.u32 %v2634_v24, 16  ;;  %v2853_v49 = vrot.slane %v2851_v40, 4  ;;  %v2867_v48 = vor.u32 %v2866_v1, %v2862_v4  ;;  %v5795_v40 = vld [vmem:[#allocation2 + $0x9c] sm:$0xff] }
 0x2af   : > { %v7099_v45 = vpop.f32.mrf.mxu1  ;;  %v2293_v39 = vadd.f32 %v6868_v57, %v1862_v20 }
 0x2b0   : > { %v2839_v43 = vsel %vm6356_vm9, %v2834_v30, %v2838_v38  ;;  %v4693_v30 = vrot.slane %v7123_v41, 5  ;;  %v7136_v56 = vpop.f32.mrf.mxu0  ;;  %v2856_v44 = vrot.slane %v2854_v21, 5  ;;  %v2868_v1 = vrot.slane %v2867_v48, 4 }
 0x2b1   : > { %v7107_v27 = vpop.f32.mrf.mxu2  ;;  %v3058_v53 = vunpack.c.l.b16 %v2839_v43 }
 0x2b2   : > { %v7104_v26 = vpop.f32.mrf.mxu3  ;;  %5569 = vmatmul.msk.bf16.gmra.mxu1 %vm1577_vm11, %v5794_v3  ;;  %8391 = vst [vmem:[#allocation38_spill] sm:$0xff] %v7107_v27  ;;  %v4690_v3 = vrot.slane %v7116_v35, 5  ;;  %v2870_v27 = vshll.u32 %v2636_v11, 16  ;;  %v2857_v21 = vor.u32 %v2856_v44, %v2853_v49 }
 0x2b3   : > { %5492 = vmatmul.msk.bf16.gmra.mxu0 %vm1577_vm11, %v2151_v23  ;;  %v3083_v34 = vpack.c.b16 %v3059_v36, %v3058_v53  ;;  %v2638_v53 = vld [vmem:[#allocation2 + $0x7c] sm:$0xf] }
 0x2b4   : > { %v4691_v38 = vsel %vm6529_vm2, %v5725_v7, %v4690_v3  ;;  %v2858_v57 = vrot.slane %v2857_v21, 4  ;;  %v2884_v11 = vshll.u32 %v2638_v53, 16 }
 0x2b5   : > { %v4787_v43 = vunpack.c.l.b16 %v4691_v38  ;;  %v2872_v38 = vrot.slane %v2870_v27, 5  ;;  %v2637_v27 = vld [vmem:[#allocation2 + $0x78] sm:$0xf] }
 0x2b7   : > { %5454 = vmatmul.msk.bf16.gmra.mxu3 %vm1577_vm11, %v5777_v42  ;;  %v7119_v54 = vpop.f32.mrf.mxu1  ;;  %v4692_v42 = vrot.slane %v4690_v3, 4  ;;  %v2873_v20 = vsel %vm6356_vm9, %v2868_v1, %v2872_v38  ;;  %v1867_v1 = vadd.f32 %v7104_v26, %v6802_v6  ;;  %v2639_v38 = vld [vmem:[#allocation2 + $0x80] sm:$0x1] }
 0x2b9   : > { %v7129_v23 = vpop.f32.mrf.mxu2  ;;  %v4694_v24 = vsel %vm6529_vm2, %v4692_v42, %v4693_v30  ;;  %v1865_v42 = vadd.f32 %v7089_v12, %v6786_v47  ;;  %v5778_v30 = vld [vmem:[#allocation2 + $0x84] sm:$0xff]  ;;  %v2863_v47 = vsel %vm6356_vm9, %v2858_v57, %v2862_v4 }
 0x2ba   : > { %v7127_v17 = vpop.f32.mrf.mxu3  ;;  %8392 = vst [vmem:[#allocation39_spill] sm:$0xff] %v7129_v23  ;;  %v2578_v23 = vadd.f32 %v6974_v32, %v2292_v22  ;;  %v4788_v7 = vunpack.c.l.b16 %v4694_v24  ;;  %v5799_v32 = vld [vmem:[#allocation2 + $0x18] sm:$0xff]  ;;  %v2888_v24 = vshrl.u32 %v2638_v53, 16  ;;  %v3060_v21 = vunpack.c.l.b16 %v2863_v47  ;;  %v2641_v47 = vld [vmem:[#allocation2 + $0x88] sm:$0xf] }
 0x2bb   : > { %v2294_v12 = vadd.f32 %v6882_v19, %v1865_v42 }
 0x2bc   : > { %v7144_v16 = vpack.c.b16 %v4788_v7, %v4787_v43  ;;  %v7160_v43 = vpop.f32.mrf.mxu0  ;;  %v2875_v7 = vshrl.u32 %v2637_v27, 16 }
 0x2be   : > { %5582 = vmatmul.msk.bf16.gmra.mxu2 %vm1577_vm11, %v3083_v34  ;;  %8393 = vst [vmem:[#allocation40_spill] sm:$0xff] %v7144_v16  ;;  %v7156_v34 = vadd.f32 %v7001_v18, %v2293_v39  ;;  %v3061_v18 = vunpack.c.l.b16 %v2873_v20  ;;  %v2886_v39 = vrot.slane %v2884_v11, 5  ;;  %v2877_v4 = vrot.slane %v2875_v7, 4  ;;  %v5796_v20 = vld [vmem:[#allocation2 + $0xa8] sm:$0xff] }
 0x2bf   : > { %v7141_v3 = vpop.f32.mrf.mxu1  ;;  %v2295_v11 = vadd.f32 %v6900_v28, %v1867_v1  ;;  %v1870_v28 = vadd.f32 %v7127_v17, %v6815_v29  ;;  %v5779_v1 = vld [vmem:[#allocation2 + $0x90] sm:$0xff] }
 0x2c0   : > { %v3084_v53 = vpack.c.b16 %v3061_v18, %v3060_v21  ;;  %v2908_v21 = vshll.u32 %v2641_v47, 16 }
 0x2c1   : > { %v7150_v22 = vpop.f32.mrf.mxu2  ;;  %v2296_v29 = vadd.f32 %v6916_v58, %v1870_v28 }
 0x2c2   : > { %v7147_v36 = vpop.f32.mrf.mxu3  ;;  %5570 = vmatmul.msk.bf16.gmra.mxu1 %vm1577_vm11, %v5795_v40  ;;  %8394 = vst [vmem:[#allocation41_spill] sm:$0xff] %v7150_v22  ;;  %v2878_v40 = vshll.u32 %v2637_v27, 16  ;;  %v2894_v27 = vshll.u32 %v2639_v38, 16  ;;  %v7192_v38 = vadd.f32 %v7041_v46, %v2295_v11 }
 0x2c3   : > { %5689 = vmatmul.msk.bf16.vlgmr.msrb.gmra.mxu0 %vm1577_vm11, %v5799_v32  ;;  %v2890_v32 = vrot.slane %v2888_v24, 4  ;;  %v7212_v58 = vadd.f32 %v7058_v50, %v2296_v29 }
 0x2c4   : > { %v2880_v19 = vrot.slane %v2878_v40, 5  ;;  %v7181_v24 = vpop.f32.mrf.mxu0  ;;  %v2640_v40 = vld [vmem:[#allocation2 + $0x84] sm:$0xf] }
 0x2c5   : > { %v2891_v42 = vor.u32 %v2890_v32, %v2886_v39  ;;  %v2896_v32 = vrot.slane %v2894_v27, 5 }
 0x2c7   : > { %5455 = vmatmul.msk.bf16.gmra.mxu3 %vm1577_vm11, %v5778_v30  ;;  %v7163_v49 = vpop.f32.mrf.mxu1  ;;  %v7175_v30 = vadd.f32 %v7027_v63, %v2294_v12  ;;  %v5800_v63 = vld [vmem:[#allocation2 + $0x24] sm:$0xff]  ;;  %v2881_v12 = vor.u32 %v2880_v19, %v2877_v4  ;;  %v2892_v18 = vrot.slane %v2891_v42, 4  ;;  %v2899_v19 = vshrl.u32 %v2640_v40, 16 }
 0x2c9   : > { %v7170_v48 = vpop.f32.mrf.mxu2  ;;  %v2897_v4 = vsel %vm6356_vm9, %v2892_v18, %v2896_v32 }
 0x2ca   : > { %v7168_v44 = vpop.f32.mrf.mxu3  ;;  %8395 = vst [vmem:[#allocation42_spill] sm:$0xff] %v7170_v48  ;;  %v3063_v17 = vunpack.c.l.b16 %v2897_v4 }
 0x2cc   : > { %v7204_v18 = vpop.f32.mrf.mxu0 }
 0x2ce   : > { %5583 = vmatmul.msk.bf16.gmra.mxu2 %vm1577_vm11, %v3084_v53  ;;  %v2912_v53 = vshrl.u32 %v2641_v47, 16  ;;  %v2910_v47 = vrot.slane %v2908_v21, 5 }
 0x2cf   : > { %v7177_v57 = vpop.f32.mrf.mxu1 }
 0x2d1   : > { %v3152_v26 = vpop.f32.mrf.mxu2 }
 0x2d2   : > { %v7183_v6 = vpop.f32.mrf.mxu3  ;;  %5571 = vmatmul.msk.bf16.gmra.mxu1 %vm1577_vm11, %v5796_v20  ;;  %v7186_v7 = vadd.f32 %v3152_v26, %v2578_v23  ;;  %v2882_v20 = vrot.slane %v2881_v12, 4  ;;  %v2902_v23 = vshll.u32 %v2640_v40, 16  ;;  %v2901_v26 = vrot.slane %v2899_v19, 4  ;;  %v2643_v19 = vld [vmem:[#allocation2 + $0x90] sm:$0xf] }
 0x2d3   : > { %5690 = vmatmul.msk.bf16.gmra.mxu0 %vm1577_vm11, %v5800_v63  ;;  %v2914_v63 = vrot.slane %v2912_v53, 4 }
 0x2d4   : > { %8396 = vst [vmem:[#allocation43_spill] sm:$0xff] %v7186_v7  ;;  %v2887_v27 = vsel %vm6356_vm9, %v2882_v20, %v2886_v39  ;;  %v2904_v12 = vrot.slane %v2902_v23, 5  ;;  %v1872_v39 = vadd.f32 %v7147_v36, %v6836_v0  ;;  %v3977_v20 = vld [vmem:[#allocation2 + $0x88] sm:$0xf]  ;;  %v5801_v0 = vld [vmem:[#allocation2 + $0x30] sm:$0xff] }
 0x2d5   : > { %v3062_v32 = vunpack.c.l.b16 %v2887_v27  ;;  %v2915_v7 = vor.u32 %v2914_v63, %v2910_v47  ;;  %v2644_v63 = vld [vmem:[#allocation2 + $0x94] sm:$0xf] }
 0x2d6   : > { %v2905_v53 = vor.u32 %v2904_v12, %v2901_v26  ;;  %v2297_v27 = vadd.f32 %v6936_v9, %v1872_v39  ;;  %v2926_v12 = vshll.u32 %v2643_v19, 16  ;;  %v3978_v39 = vld [vmem:[#allocation2 + $0x8c] sm:$0x1] }
 0x2d7   : > { %5456 = vmatmul.msk.bf16.gmra.mxu3 %vm1577_vm11, %v5779_v1  ;;  %v7197_v42 = vpop.f32.mrf.mxu1  ;;  %v2642_v1 = vld [vmem:[#allocation2 + $0x8c] sm:$0x1]  ;;  %v3085_v21 = vpack.c.b16 %v3063_v17, %v3062_v32  ;;  %v2916_v23 = vrot.slane %v2915_v7, 4  ;;  %v2923_v17 = vshrl.u32 %v2643_v19, 16  ;;  %v2932_v32 = vshll.u32 %v2644_v63, 16 }
 0x2d8   : > { %v2918_v28 = vshll.u32 %v2642_v1, 16  ;;  %v2906_v36 = vrot.slane %v2905_v53, 4  ;;  %v2936_v1 = vshrl.u32 %v2644_v63, 16  ;;  %v1875_v53 = vadd.f32 %v7168_v44, %v6845_v15  ;;  %v3949_v19 = vld [vmem:[#allocation2 + $0x18] sm:$0xf] }
 0x2d9   : > { %v3154_v11 = vpop.f32.mrf.mxu2  ;;  %v2925_v63 = vrot.slane %v2923_v17, 4  ;;  %v3998_v48 = vshrl.u32 %v3949_v19, 16 }
 0x2da   : > { %v7202_v46 = vpop.f32.mrf.mxu3  ;;  %v7207_v40 = vadd.f32 %v3154_v11, %v7156_v34  ;;  %v5797_v34 = vld [vmem:[#allocation2 + $0xb4] sm:$0xff]  ;;  %v4732_v11 = vrot.slane %v3977_v20, 5  ;;  %v2920_v29 = vrot.slane %v2918_v28, 5  ;;  %v2911_v9 = vsel %vm6356_vm9, %v2906_v36, %v2910_v47  ;;  %v7231_v28 = vpop.f32.mrf.mxu0  ;;  %v5705_v47 = vld [vmem:[%s8333_s4 + $0xe] sm:$0x3] }
 0x2db   : > { %v7234_v20 = vadd.f32 %v7079_v25, %v2297_v27  ;;  %v3064_v44 = vunpack.c.l.b16 %v2911_v9  ;;  %v4735_v36 = vrot.slane %v3978_v39, 5  ;;  %v2938_v16 = vrot.slane %v2936_v1, 4  ;;  %v3980_v1 = vld [vmem:[#allocation2 + $0x94] sm:$0xf] }
 0x2dc   : > { %8397 = vst [vmem:[#allocation44_spill] sm:$0xff] %v7207_v40  ;;  %v2921_v7 = vsel %vm6356_vm9, %v2916_v23, %v2920_v29  ;;  %v4480_v23 = vsel %vm1626_vm10, %v5705_v47, 0  ;;  %v2928_v29 = vrot.slane %v2926_v12, 5  ;;  %v2298_v17 = vadd.f32 %v6952_v33, %v1875_v53 }
 0x2dd   : > { %v3065_v25 = vunpack.c.l.b16 %v2921_v7  ;;  %4489 = vmatpush.bf16.msrb.mxu1 %v4480_v23  ;;  %v4001_v47 = vshll.u32 %v3949_v19, 16  ;;  %v2645_v23 = vld [vmem:[#allocation2 + $0x98] sm:$0x1] }
 0x2de   : > { %5584 = vmatmul.msk.bf16.gmra.mxu2 %vm1577_vm11, %v3085_v21  ;;  %v4612_v21 = vld [vmem:[#allocation2 + $0x84] sm:$0xe]  ;;  %v2929_v33 = vor.u32 %v2928_v29, %v2925_v63  ;;  %v4739_v63 = vrot.slane %v3980_v1, 5  ;;  %v2647_v1 = vld [vmem:[#allocation2 + $0xa0] sm:$0xf] }
 0x2df   : > { %v7214_v4 = vpop.f32.mrf.mxu1  ;;  %v5731_v27 = vrot.slane %v4612_v21, 9  ;;  %v4613_v21 = vld [vmem:[#allocation2 + $0x90] sm:$0xe] }
 0x2e1   : > { %v3157_v50 = vpop.f32.mrf.mxu2 }
 0x2e2   : > { %v7218_v40 = vpop.f32.mrf.mxu3  ;;  %5572 = vmatmul.msk.bf16.gmra.mxu1 %vm1577_vm11, %v5797_v34  ;;  %v7222_v26 = vadd.f32 %v3157_v50, %v7175_v30  ;;  %v5780_v30 = vld [vmem:[#allocation2 + $0x9c] sm:$0xff]  ;;  %v4734_v34 = vrot.slane %v4732_v11, 4  ;;  %v4011_v50 = vshrl.u32 %v6977_v37, 16  ;;  %v7268_v29 = vpop.f32.mrf.mxu0 }
 0x2e3   : > { %5691 = vmatmul.msk.bf16.gmra.mxu0 %vm1577_vm11, %v5801_v0  ;;  %v4007_v0 = vshll.u32 %v6977_v37, 16  ;;  %v4733_v37 = vsel %vm6529_vm2, %v5731_v27, %v4732_v11  ;;  %v4000_v27 = vrot.slane %v3998_v48, 4  ;;  %v2942_v48 = vshll.u32 %v2645_v23, 16 }
 0x2e4   : > { %8398 = vst [vmem:[#allocation45_spill] sm:$0xff] %v7222_v26  ;;  %v7245_v26 = vrot.slane %v2932_v32, 5  ;;  %v4013_v39 = vrot.slane %v4011_v50, 4  ;;  %v3086_v32 = vpack.c.b16 %v3065_v25, %v3064_v44  ;;  %v4799_v19 = vunpack.c.l.b16 %v4733_v37  ;;  %v3981_v50 = vld [vmem:[#allocation2 + $0x98] sm:$0x1] }
 0x2e5   : > { %v7254_v7 = vrot.slane %v4007_v0, 5  ;;  %v7263_v0 = vadd.f32 %v7099_v45, %v2298_v17  ;;  %v5732_v25 = vrot.slane %v4613_v21, 9  ;;  %v4741_v17 = vrot.slane %v4739_v63, 4 }
 0x2e6   : > { %v2939_v53 = vor.u32 %v2938_v16, %v7245_v26 }
 0x2e7   : > { %5457 = vmatmul.msk.bf16.gmra.mxu3 %vm1577_vm11, %v5780_v30  ;;  %v7243_v15 = vpop.f32.mrf.mxu1  ;;  %v4736_v30 = vsel %vm6529_vm2, %v4734_v34, %v4735_v36  ;;  %v1877_v34 = vadd.f32 %v7183_v6, %v6865_v31  ;;  %v4003_v36 = vrot.slane %v4001_v47, 5  ;;  %v3952_v31 = vld [vmem:[#allocation2 + $0x24] sm:$0xf]  ;;  %v4740_v45 = vsel %vm6529_vm2, %v5732_v25, %v4739_v63 }
 0x2e8   : > { %v4800_v11 = vunpack.c.l.b16 %v4736_v30  ;;  %v5798_v6 = vld [vmem:[#allocation2 + $0xc0] sm:$0xff]  ;;  %v4742_v47 = vrot.slane %v3981_v50, 5  ;;  %v2930_v30 = vrot.slane %v2929_v33, 4  ;;  %v4801_v33 = vunpack.c.l.b16 %v4740_v45  ;;  %v2646_v45 = vld [vmem:[#allocation2 + $0x9c] sm:$0xf] }
 0x2e9   : > { %v3159_v9 = vpop.f32.mrf.mxu2  ;;  %v2299_v37 = vadd.f32 %v6963_v13, %v1877_v34  ;;  %v4025_v13 = vshll.u32 %v3952_v31, 16  ;;  %v2944_v34 = vrot.slane %v2942_v48, 5  ;;  %v2956_v63 = vshll.u32 %v2647_v1, 16 }
 0x2ea   : > { %v7252_v22 = vpop.f32.mrf.mxu3  ;;  %v7257_v12 = vadd.f32 %v3159_v9, %v7192_v38  ;;  %v4014_v38 = vor.u32 %v4013_v39, %v7254_v7  ;;  %v7266_v44 = vpack.c.b16 %v4800_v11, %v4799_v19  ;;  %v2940_v9 = vrot.slane %v2939_v53, 4 }
 0x2eb   : > { %v4017_v39 = vshll.u32 %v6988_v10, 16  ;;  %v4004_v11 = vor.u32 %v4003_v36, %v4000_v27  ;;  %v4743_v25 = vsel %vm6529_vm2, %v4741_v17, %v4742_v47  ;;  %v2935_v10 = vsel %vm6356_vm9, %v2930_v30, %v7245_v26 }
 0x2ec   : > { %8399 = vst [vmem:[#allocation46_spill] sm:$0xff] %v7266_v44  ;;  %v4015_v23 = vrot.slane %v4014_v38, 4  ;;  %v4022_v44 = vshrl.u32 %v3952_v31, 16  ;;  %v4802_v53 = vunpack.c.l.b16 %v4743_v25  ;;  %v2960_v27 = vshrl.u32 %v2647_v1, 16  ;;  %v5781_v38 = vld [vmem:[#allocation2 + $0xa8] sm:$0xff] }
 0x2ed   : > { %v1880_v36 = vadd.f32 %v7202_v46, %v6878_v14  ;;  %v5607_v31 = vld [vmem:[%s8333_s4 + $0xa] sm:$0x3]  ;;  %v2945_v26 = vsel %vm6356_vm9, %v2940_v9, %v2944_v34  ;;  %v4005_v48 = vrot.slane %v4004_v11, 4  ;;  %v4027_v46 = vrot.slane %v4025_v13, 5  ;;  %v7312_v11 = vpop.f32.mrf.mxu0 }
 0x2ee   : > { %5585 = vmatmul.msk.bf16.gmra.mxu2 %vm1577_vm11, %v3086_v32  ;;  %v5802_v32 = vld [vmem:[#allocation2 + $0x3c] sm:$0xff]  ;;  %v7297_v17 = vpack.c.b16 %v4802_v53, %v4801_v33  ;;  %v3539_v47 = vsel %vm1626_vm10, %v5607_v31, 0  ;;  %v4024_v30 = vrot.slane %v4022_v44, 4  ;;  %v2947_v1 = vshrl.u32 %v2646_v45, 16 }
 0x2ef   : > { %v7270_v16 = vpop.f32.mrf.mxu1  ;;  %3548 = vmatpush.bf16.msra.mxu3 %v3539_v47  ;;  %v7309_v9 = vrot.slane %v2956_v63, 5  ;;  %v2300_v44 = vadd.f32 %v6979_v62, %v1880_v36  ;;  %v3067_v25 = vunpack.c.l.b16 %v2945_v26  ;;  %v4010_v13 = vsel %vm6356_vm9, %v4005_v48, %v7254_v7  ;;  %v4614_v26 = vld [vmem:[#allocation2 + $0x9c] sm:$0xe] }
 0x2f0   : > { %8401 = vst [vmem:[#allocation48_spill] sm:$0xff] %v7297_v17  ;;  %v2949_v62 = vrot.slane %v2947_v1, 4  ;;  %v4041_v48 = vshll.u32 %v6992_v59, 16 }
 0x2f1   : > { %v3162_v19 = vpop.f32.mrf.mxu2  ;;  %v7326_v7 = vadd.f32 %v7141_v3, %v2300_v44  ;;  %v7333_v3 = vld [vmem:[#allocation2 + $0x30] sm:$0xf] }
 0x2f2   : > { %v7277_v21 = vpop.f32.mrf.mxu3  ;;  %5573 = vmatmul.msk.bf16.gmra.mxu1 %vm1577_vm11, %v5798_v6  ;;  %v7283_v50 = vadd.f32 %v3162_v19, %v7212_v58  ;;  %v4019_v6 = vrot.slane %v4017_v39, 5  ;;  %v7292_v58 = vadd.f32 %v7119_v54, %v2299_v37  ;;  %v4031_v37 = vshll.u32 %v6981_v61, 16 }
 0x2f3   : > { %5692 = vmatmul.msk.bf16.gmra.mxu0 %vm1577_vm11, %v5802_v32  ;;  %v4035_v39 = vshrl.u32 %v6981_v61, 16  ;;  %v2950_v32 = vshll.u32 %v2646_v45, 16  ;;  %v2962_v19 = vrot.slane %v2960_v27, 4  ;;  %v3983_v27 = vld [vmem:[#allocation2 + $0xa0] sm:$0xf]  ;;  %v4028_v45 = vor.u32 %v4027_v46, %v4024_v30 }
 0x2f4   : > { %8400 = vst [vmem:[#allocation47_spill] sm:$0xff] %v7283_v50  ;;  %v4020_v54 = vsel %vm6356_vm9, %v4015_v23, %v4019_v6  ;;  %v3066_v23 = vunpack.c.l.b16 %v2935_v10  ;;  %v4033_v63 = vrot.slane %v4031_v37, 5  ;;  %v2648_v6 = vld [vmem:[#allocation2 + $0xa4] sm:$0x1]  ;;  %v1882_v10 = vadd.f32 %v7218_v40, %v6895_v51  ;;  %v5804_v50 = vld [vmem:[#allocation2 + $0x54] sm:$0xff] }
 0x2f5   : > { %v4384_v34 = vunpack.c.l.b16 %v4020_v54  ;;  %v2952_v36 = vrot.slane %v2950_v32, 5  ;;  %v2963_v31 = vor.u32 %v2962_v19, %v7309_v9  ;;  %v3984_v54 = vld [vmem:[#allocation2 + $0xa4] sm:$0x1]  ;;  %v4746_v37 = vrot.slane %v3983_v27, 5 }
 0x2f6   : > { %v3087_v47 = vpack.c.b16 %v3067_v25, %v3066_v23  ;;  %v2966_v1 = vshll.u32 %v2648_v6, 16  ;;  %v5733_v30 = vrot.slane %v4614_v26, 9  ;;  %v4029_v51 = vrot.slane %v4028_v45, 4  ;;  %v2650_v6 = vld [vmem:[#allocation2 + $0xac] sm:$0xf] }
 0x2f7   : > { %5458 = vmatmul.msk.bf16.gmra.mxu3 %vm1577_vm11, %v5781_v38  ;;  %v7303_v14 = vpop.f32.mrf.mxu1  ;;  %v4037_v38 = vrot.slane %v4035_v39, 4  ;;  %v2953_v19 = vor.u32 %v2952_v36, %v2949_v62  ;;  %v2301_v40 = vadd.f32 %v7017_v5, %v1882_v10  ;;  %v4748_v44 = vrot.slane %v4746_v37, 4  ;;  %v7342_v62 = vld [vmem:[#allocation2 + $0x1c] sm:$0xf]  ;;  %v7345_v36 = vpop.f32.mrf.mxu0 }
 0x2f8   : > { %v4747_v59 = vsel %vm6529_vm2, %v5733_v30, %v4746_v37  ;;  %v4749_v25 = vrot.slane %v3984_v54, 5  ;;  %v4043_v27 = vrot.slane %v4041_v48, 5  ;;  %v2968_v45 = vrot.slane %v2966_v1, 5  ;;  %v5782_v30 = vld [vmem:[#allocation2 + $0xb4] sm:$0xff] }
 0x2f9   : > { %v3164_v53 = vpop.f32.mrf.mxu2  ;;  %v4038_v32 = vor.u32 %v4037_v38, %v4033_v63  ;;  %v4803_v48 = vunpack.c.l.b16 %v4747_v59  ;;  %v1885_v37 = vadd.f32 %v7252_v22, %v6910_v55  ;;  %v7359_v1 = vadd.f32 %v7163_v49, %v2301_v40 }
 0x2fa   : > { %v7314_v33 = vpop.f32.mrf.mxu3  ;;  %v7320_v61 = vadd.f32 %v3164_v53, %v7234_v20  ;;  %v4383_v20 = vunpack.c.l.b16 %v4010_v13  ;;  %v2964_v53 = vrot.slane %v2963_v31, 4  ;;  %v5803_v13 = vld [vmem:[#allocation2 + $0x48] sm:$0xff]  ;;  %v4750_v10 = vsel %vm6529_vm2, %v4748_v44, %v4749_v25 }
 0x2fb   : > { %v4039_v26 = vrot.slane %v4038_v32, 4  ;;  %v4804_v54 = vunpack.c.l.b16 %v4750_v10  ;;  %v2980_v32 = vshll.u32 %v2650_v6, 16  ;;  %v2984_v44 = vshrl.u32 %v2650_v6, 16 }
 0x2fc   : > { %8402 = vst [vmem:[#allocation49_spill] sm:$0xff] %v7320_v61  ;;  %v4415_v46 = vpack.c.b16 %v4384_v34, %v4383_v20  ;;  %v4034_v34 = vsel %vm6356_vm9, %v4029_v51, %v4033_v63  ;;  %v2649_v63 = vld [vmem:[#allocation2 + $0xa8] sm:$0xf]  ;;  %v4046_v20 = vshrl.u32 %v7333_v3, 16  ;;  %v4609_v51 = vld [vmem:[#allocation2 + $0x60] sm:$0xe] }
 0x2fd   : > { %v4385_v59 = vunpack.c.l.b16 %v4034_v34  ;;  %v7366_v25 = vpack.c.b16 %v4804_v54, %v4803_v48  ;;  %v4044_v22 = vsel %vm6356_vm9, %v4039_v26, %v4043_v27  ;;  %v4049_v49 = vshll.u32 %v7333_v3, 16  ;;  %v2651_v61 = vld [vmem:[#allocation2 + $0xb0] sm:$0x1] }
 0x2fe   : > { %5586 = vmatmul.msk.bf16.gmra.mxu2 %vm1577_vm11, %v3087_v47  ;;  %v2954_v47 = vrot.slane %v2953_v19, 4  ;;  %v4059_v40 = vshrl.u32 %v7061_v52, 16  ;;  %v5728_v34 = vrot.slane %v4609_v51, 9  ;;  %v2974_v48 = vshll.u32 %v2649_v63, 16 }
 0x2ff   : > { %v7329_v39 = vpop.f32.mrf.mxu1  ;;  %8404 = vst [vmem:[#allocation51_spill] sm:$0xff] %v7366_v25  ;;  %v7380_v54 = vrot.slane %v2980_v32, 5  ;;  %v2986_v26 = vrot.slane %v2984_v44, 4  ;;  %v4386_v5 = vunpack.c.l.b16 %v4044_v22  ;;  %v4615_v32 = vld [vmem:[#allocation2 + $0xa8] sm:$0xe]  ;;  %v4048_v17 = vrot.slane %v4046_v20, 4 }
 0x300   : > { %v2959_v19 = vsel %vm6356_vm9, %v2954_v47, %v7309_v9 }
 0x301   : > { %v3167_v38 = vpop.f32.mrf.mxu2  ;;  %v3068_v47 = vunpack.c.l.b16 %v2959_v19 }
 0x302   : > { %v7337_v23 = vpop.f32.mrf.mxu3  ;;  %5706 = vmatmul.msk.bf16.vlgmr.msrb.gmra.mxu1 %vm1577_vm11, %v4415_v46  ;;  %v7348_v31 = vadd.f32 %v3167_v38, %v7263_v0  ;;  %v2969_v0 = vsel %vm6356_vm9, %v2964_v53, %v2968_v45  ;;  %v7361_v46 = vld [vmem:[#allocation2 + $0x64] sm:$0xf]  ;;  %v4055_v53 = vshll.u32 %v7061_v52, 16  ;;  %v2971_v38 = vshrl.u32 %v2649_v63, 16  ;;  %v3986_v63 = vld [vmem:[#allocation2 + $0xac] sm:$0xf] }
 0x303   : > { %5693 = vmatmul.msk.bf16.gmra.mxu0 %vm1577_vm11, %v5803_v13  ;;  %v7376_v13 = vld [vmem:[#allocation2 + $0x68] sm:$0x1]  ;;  %v3069_v9 = vunpack.c.l.b16 %v2969_v0  ;;  %v4711_v6 = vrot.slane %v7361_v46, 5  ;;  %v8405_v45 = vld [vmem:[#allocation30_spill] sm:$0xff]  ;;  %v4753_v20 = vrot.slane %v3986_v63, 5 }
 0x304   : > { %8403 = vst [vmem:[#allocation50_spill] sm:$0xff] %v7348_v31  ;;  %v2302_v10 = vadd.f32 %v8405_v45, %v1885_v37  ;;  %v4714_v0 = vrot.slane %v7376_v13, 5  ;;  %v7390_v25 = vrot.slane %v4055_v53, 5  ;;  %v4061_v37 = vrot.slane %v4059_v40, 4  ;;  %v8407_v31 = vld [vmem:[#allocation15_spill] sm:$0xff] }
 0x305   : > { %v4712_v52 = vsel %vm6529_vm2, %v5728_v34, %v4711_v6  ;;  %v3088_v19 = vpack.c.b16 %v3069_v9, %v3068_v47  ;;  %v2973_v45 = vrot.slane %v2971_v38, 4  ;;  %v1887_v34 = vadd.f32 %v7277_v21, %v8407_v31  ;;  %v3987_v40 = vld [vmem:[#allocation2 + $0xb0] sm:$0x1] }
 0x306   : > { %v4793_v22 = vunpack.c.l.b16 %v4712_v52  ;;  %v2987_v9 = vor.u32 %v2986_v26, %v7380_v54  ;;  %v5734_v38 = vrot.slane %v4615_v32, 9  ;;  %v4051_v21 = vrot.slane %v4049_v49, 5  ;;  %v8409_v32 = vld [vmem:[#allocation34_spill] sm:$0xff] }
 0x307   : > { %5459 = vmatmul.msk.bf16.gmra.mxu3 %vm1577_vm11, %v5782_v30  ;;  %v7369_v55 = vpop.f32.mrf.mxu1  ;;  %v4713_v30 = vrot.slane %v4711_v6, 4  ;;  %v7396_v6 = vpop.f32.mrf.mxu0  ;;  %v4062_v31 = vor.u32 %v4061_v37, %v7390_v25  ;;  %v4755_v52 = vrot.slane %v4753_v20, 4  ;;  %v4065_v63 = vshll.u32 %v8409_v32, 16 }
 0x308   : > { %v2988_v49 = vrot.slane %v2987_v9, 4  ;;  %v8410_v37 = vrot.slane %v7342_v62, 5  ;;  %v8412_v9 = vld [vmem:[#allocation18_spill] sm:$0xff] }
 0x309   : > { %v3169_v3 = vpop.f32.mrf.mxu2  ;;  %v4715_v44 = vsel %vm6529_vm2, %v4713_v30, %v4714_v0  ;;  %v4416_v30 = vpack.c.b16 %v4386_v5, %v4385_v59  ;;  %v1890_v32 = vadd.f32 %v7314_v33, %v8412_v9 }
 0x30a   : > { %v7382_v27 = vpop.f32.mrf.mxu3  ;;  %v7388_v51 = vadd.f32 %v3169_v3, %v7292_v58  ;;  %v7399_v58 = vadd.f32 %v7177_v57, %v2302_v10  ;;  %v4794_v53 = vunpack.c.l.b16 %v4715_v44  ;;  %v2976_v3 = vrot.slane %v2974_v48, 5  ;;  %v8408_v44 = vld [vmem:[#allocation32_spill] sm:$0xff] }
 0x30b   : > { %v2990_v57 = vshll.u32 %v2651_v61, 16  ;;  %v4754_v10 = vsel %vm6529_vm2, %v5734_v38, %v4753_v20  ;;  %v4756_v48 = vrot.slane %v3987_v40, 5  ;;  %v2303_v26 = vadd.f32 %v8408_v44, %v1887_v34  ;;  %v6004_v20 = vld [vmem:[#allocation2 + $0x20] sm:$0x1] }
 0x30c   : > { %8406 = vst [vmem:[#allocation30_spill] sm:$0xff] %v7388_v51  ;;  %v7406_v0 = vpack.c.b16 %v4794_v53, %v4793_v22  ;;  %v2977_v59 = vor.u32 %v2976_v3, %v2973_v45  ;;  %v3339_v61 = vrot.slane %v8410_v37, 4  ;;  %v4052_v34 = vor.u32 %v4051_v21, %v4048_v17  ;;  %v2653_v53 = vld [vmem:[#allocation2 + $0xb8] sm:$0xf] }
 0x30d   : > { %v4805_v40 = vunpack.c.l.b16 %v4754_v10  ;;  %v3340_v44 = vrot.slane %v6004_v20, 5  ;;  %v3265_v45 = vld [vmem:[#allocation2 + $0x18] sm:$0xe]  ;;  %v4063_v3 = vrot.slane %v4062_v31, 4  ;;  %v4067_v37 = vrot.slane %v4065_v63, 5 }
 0x30e   : > { %5587 = vmatmul.msk.bf16.gmra.mxu2 %vm1577_vm11, %v3088_v19  ;;  %v4757_v19 = vsel %vm6529_vm2, %v4755_v52, %v4756_v48  ;;  %v7426_v52 = vadd.f32 %v7197_v42, %v2303_v26  ;;  %v2978_v17 = vrot.slane %v2977_v59, 4  ;;  %v3004_v10 = vshll.u32 %v2653_v53, 16  ;;  %v2652_v63 = vld [vmem:[#allocation2 + $0xb4] sm:$0xf] }
 0x30f   : > { %v7402_v47 = vpop.f32.mrf.mxu1  ;;  %v4806_v38 = vunpack.c.l.b16 %v4757_v19  ;;  %v3008_v48 = vshrl.u32 %v2653_v53, 16  ;;  %v5592_v33 = vrot.slane %v3265_v45, 9  ;;  %v3341_v42 = vsel %vm6529_vm2, %v3339_v61, %v3340_v44 }
 0x310   : > { %v4053_v26 = vrot.slane %v4052_v34, 4  ;;  %v2983_v59 = vsel %vm6356_vm9, %v2978_v17, %v7380_v54  ;;  %v4079_v19 = vshll.u32 %v7116_v35, 16  ;;  %v4083_v53 = vshrl.u32 %v7116_v35, 16 }
 0x311   : > { %v3172_v5 = vpop.f32.mrf.mxu2  ;;  %v2995_v45 = vshrl.u32 %v2652_v63, 16  ;;  %v2998_v54 = vshll.u32 %v2652_v63, 16  ;;  %v7453_v9 = vrot.slane %v3004_v10, 5  ;;  %v3070_v35 = vunpack.c.l.b16 %v2983_v59  ;;  %v3989_v59 = vld [vmem:[#allocation2 + $0xb8] sm:$0xf] }
 0x312   : > { %v7412_v51 = vpop.f32.mrf.mxu3  ;;  %5707 = vmatmul.msk.bf16.gmra.mxu1 %vm1577_vm11, %v4416_v30  ;;  %v7420_v22 = vadd.f32 %v3172_v5, %v7326_v7  ;;  %v2992_v30 = vrot.slane %v2990_v57, 5  ;;  %v7428_v7 = vpack.c.b16 %v4806_v38, %v4805_v40  ;;  %v3958_v5 = vld [vmem:[#allocation2 + $0x3c] sm:$0xf]  ;;  %v8415_v40 = vld [vmem:[#allocation35_spill] sm:$0xff]  ;;  %v4058_v61 = vsel %vm6356_vm9, %v4053_v26, %v7390_v25 }
 0x313   : > { %5694 = vmatmul.msk.bf16.gmra.mxu0 %vm1577_vm11, %v5804_v50  ;;  %v7432_v50 = vpop.f32.mrf.mxu0  ;;  %v8414_v57 = vld [vmem:[#allocation17_spill] sm:$0xff]  ;;  %v2304_v38 = vadd.f32 %v8415_v40, %v1890_v32  ;;  %v4070_v34 = vshrl.u32 %v3958_v5, 16  ;;  %v4073_v32 = vshll.u32 %v3958_v5, 16  ;;  %v4085_v26 = vrot.slane %v4083_v53, 4  ;;  %v8418_v40 = vld [vmem:[#allocation20_spill] sm:$0xff] }
 0x314   : > { %8411 = vst [vmem:[#allocation15_spill] sm:$0xff] %v7420_v22  ;;  %v2993_v21 = vsel %vm6356_vm9, %v2988_v49, %v2992_v30  ;;  %v4068_v49 = vsel %vm6356_vm9, %v4063_v3, %v4067_v37  ;;  %v3010_v3 = vrot.slane %v3008_v48, 4  ;;  %v1892_v63 = vadd.f32 %v7337_v23, %v8418_v40  ;;  %v2654_v48 = vld [vmem:[#allocation2 + $0xbc] sm:$0x1] }
 0x315   : > { %8413 = vst [vmem:[#allocation32_spill] sm:$0xff] %v7428_v7  ;;  %v3071_v20 = vunpack.c.l.b16 %v2993_v21  ;;  %v4388_v17 = vunpack.c.l.b16 %v4068_v49  ;;  %v8417_v21 = vrot.slane %v7342_v62, 5  ;;  %v4387_v7 = vunpack.c.l.b16 %v4058_v61  ;;  %v4616_v49 = vld [vmem:[#allocation2 + $0xb4] sm:$0xe] }
 0x316   : > { %v3445_v5 = vunpack.c.l.b16 %v3341_v42  ;;  %v3000_v62 = vrot.slane %v2998_v54, 5  ;;  %v4072_v53 = vrot.slane %v4070_v34, 4  ;;  %v4075_v23 = vrot.slane %v4073_v32, 5 }
 0x317   : > { %5608 = vmatmul.msk.bf16.vlgmr.msra.gmra.mxu3 %vm1577_vm11, %v8414_v57  ;;  %v7436_v31 = vpop.f32.mrf.mxu1  ;;  %v3338_v25 = vsel %vm6529_vm2, %v5592_v33, %v8417_v21  ;;  %v7462_v57 = vrot.slane %v4079_v19, 5  ;;  %v3089_v10 = vpack.c.b16 %v3071_v20, %v3070_v35  ;;  %v4417_v19 = vpack.c.b16 %v4388_v17, %v4387_v7  ;;  %v3990_v20 = vld [vmem:[#allocation2 + $0xbc] sm:$0x1] }
 0x318   : > { %v4760_v61 = vrot.slane %v3989_v59, 5  ;;  %v3014_v35 = vshll.u32 %v2654_v48, 16  ;;  %v5735_v21 = vrot.slane %v4616_v49, 9  ;;  %v2305_v42 = vadd.f32 %v7109_v2, %v1892_v63  ;;  %v6005_v2 = vld [vmem:[#allocation2 + $0x28] sm:$0xf] }
 0x319   : > { %v3174_v30 = vpop.f32.mrf.mxu2  ;;  %v3444_v54 = vunpack.c.l.b16 %v3338_v25  ;;  %v3344_v63 = vrot.slane %v6005_v2, 5  ;;  %v4076_v25 = vor.u32 %v4075_v23, %v4072_v53  ;;  %v2656_v59 = vld [vmem:[#allocation2 + $0xc4] sm:$0xf] }
 0x31a   : > { %v7451_v44 = vpop.f32.mrf.mxu3  ;;  %v7456_v37 = vadd.f32 %v3174_v30, %v7359_v1  ;;  %v7467_v1 = vadd.f32 %v7214_v4, %v2304_v38  ;;  %v2997_v30 = vrot.slane %v2995_v45, 4  ;;  %v4086_v4 = vor.u32 %v4085_v26, %v7462_v57 }
 0x31b   : > { %v4089_v38 = vshll.u32 %v7123_v41, 16  ;;  %v7476_v45 = vpop.f32.mrf.mxu0  ;;  %v4761_v32 = vsel %vm6529_vm2, %v5735_v21, %v4760_v61  ;;  %v4763_v26 = vrot.slane %v3990_v20, 5  ;;  %v3475_v41 = vpack.c.b16 %v3445_v5, %v3444_v54  ;;  %v6006_v21 = vld [vmem:[#allocation2 + $0x2c] sm:$0x1] }
 0x31c   : > { %8416 = vst [vmem:[#allocation34_spill] sm:$0xff] %v7456_v37  ;;  %v3011_v37 = vor.u32 %v3010_v3, %v7453_v9  ;;  %v4762_v3 = vrot.slane %v4760_v61, 4  ;;  %v3001_v34 = vor.u32 %v3000_v62, %v2997_v30  ;;  %v3016_v49 = vrot.slane %v3014_v35, 5  ;;  %v8420_v30 = vld [vmem:[#allocation23_spill] sm:$0xff]  ;;  %v3266_v35 = vld [vmem:[#allocation2 + $0x24] sm:$0xe] }
 0x31d   : > { %v4087_v22 = vrot.slane %v4086_v4, 4  ;;  %v1895_v62 = vadd.f32 %v7382_v27, %v8420_v30  ;;  %v7492_v5 = vadd.f32 %v7243_v15, %v2305_v42  ;;  %v4807_v20 = vunpack.c.l.b16 %v4761_v32  ;;  %v2655_v42 = vld [vmem:[#allocation2 + $0xc0] sm:$0xf] }
 0x31e   : > { %5588 = vmatmul.msk.bf16.gmra.mxu2 %vm1577_vm11, %v3089_v10  ;;  %v5805_v10 = vld [vmem:[#allocation2 + $0x60] sm:$0xff]  ;;  %v3012_v17 = vrot.slane %v3011_v37, 4  ;;  %v4764_v37 = vsel %vm6529_vm2, %v4762_v3, %v4763_v26  ;;  %v3002_v53 = vrot.slane %v3001_v34, 4  ;;  %v3028_v4 = vshll.u32 %v2656_v59, 16 }
 0x31f   : > { %v7470_v33 = vpop.f32.mrf.mxu1  ;;  %v4808_v61 = vunpack.c.l.b16 %v4764_v37  ;;  %v3347_v54 = vrot.slane %v6006_v21, 5  ;;  %v3346_v27 = vrot.slane %v3344_v63, 4  ;;  %v4077_v15 = vrot.slane %v4076_v25, 4 }
 0x320   : > { %v3017_v23 = vsel %vm6356_vm9, %v3012_v17, %v3016_v49  ;;  %v3961_v17 = vld [vmem:[#allocation2 + $0x48] sm:$0xf]  ;;  %v3022_v30 = vshll.u32 %v2655_v42, 16 }
 0x321   : > { %v3177_v7 = vpop.f32.mrf.mxu2  ;;  %v3073_v2 = vunpack.c.l.b16 %v3017_v23  ;;  %v4082_v25 = vsel %vm6356_vm9, %v4077_v15, %v7462_v57  ;;  %v3348_v23 = vsel %vm6529_vm2, %v3346_v27, %v3347_v54  ;;  %v4097_v57 = vshll.u32 %v3961_v17, 16  ;;  %v8423_v15 = vld [vmem:[#allocation25_spill] sm:$0xff] }
 0x322   : > { %v7478_v40 = vpop.f32.mrf.mxu3  ;;  %5708 = vmatmul.msk.bf16.gmra.mxu1 %vm1577_vm11, %v4417_v19  ;;  %v7484_v48 = vadd.f32 %v3177_v7, %v7399_v58  ;;  %v4091_v19 = vrot.slane %v4089_v38, 5  ;;  %v7494_v58 = vld [vmem:[#allocation2 + $0x4c] sm:$0xf]  ;;  %v3032_v38 = vshrl.u32 %v2656_v59, 16  ;;  %v3007_v7 = vsel %vm6356_vm9, %v3002_v53, %v7453_v9 }
 0x323   : > { %5695 = vmatmul.msk.bf16.gmra.mxu0 %vm1577_vm11, %v5805_v10  ;;  %v7501_v10 = vpack.c.b16 %v4808_v61, %v4807_v20  ;;  %v4103_v32 = vshll.u32 %v7494_v58, 16  ;;  %v4107_v26 = vshrl.u32 %v7494_v58, 16  ;;  %v5593_v59 = vrot.slane %v3266_v35, 9 }
 0x324   : > { %8419 = vst [vmem:[#allocation18_spill] sm:$0xff] %v7484_v48  ;;  %v4092_v34 = vsel %vm6356_vm9, %v4087_v22, %v4091_v19  ;;  %v3019_v9 = vshrl.u32 %v2655_v42, 16  ;;  %v7516_v20 = vrot.slane %v3028_v4, 5  ;;  %v3034_v22 = vrot.slane %v3032_v38, 4  ;;  %v7518_v19 = vpop.f32.mrf.mxu0 }
 0x325   : > { %8421 = vst [vmem:[#allocation17_spill] sm:$0xff] %v7501_v10  ;;  %v4094_v53 = vshrl.u32 %v3961_v17, 16  ;;  %v7525_v35 = vrot.slane %v4103_v32, 5  ;;  %v4109_v21 = vrot.slane %v4107_v26, 4  ;;  %v1897_v4 = vadd.f32 %v7412_v51, %v8423_v15  ;;  %v2657_v10 = vld [vmem:[#allocation2 + $0xc8] sm:$0x1] }
 0x326   : > { %v4389_v38 = vunpack.c.l.b16 %v4082_v25  ;;  %v3024_v54 = vrot.slane %v3022_v30, 5  ;;  %v3035_v27 = vor.u32 %v3034_v22, %v7516_v20  ;;  %v3447_v51 = vunpack.c.l.b16 %v3348_v23 }
 0x327   : > { %5609 = vmatmul.msk.bf16.gmra.mxu3 %vm1577_vm11, %v3475_v41  ;;  %v7499_v3 = vpop.f32.mrf.mxu1  ;;  %v2306_v41 = vadd.f32 %v7136_v56, %v1895_v62  ;;  %v3072_v56 = vunpack.c.l.b16 %v3007_v7  ;;  %v4390_v62 = vunpack.c.l.b16 %v4092_v34  ;;  %v4617_v7 = vld [vmem:[#allocation2 + $0xc0] sm:$0xe]  ;;  %v3345_v34 = vsel %vm6529_vm2, %v5593_v59, %v3344_v63 }
 0x328   : > { %v4096_v26 = vrot.slane %v4094_v53, 4  ;;  %v4110_v15 = vor.u32 %v4109_v21, %v7525_v35  ;;  %v5736_v63 = vrot.slane %v4617_v7, 9  ;;  %v2307_v59 = vadd.f32 %v7160_v43, %v1897_v4 }
 0x329   : > { %v3179_v37 = vpop.f32.mrf.mxu2  ;;  %v3090_v42 = vpack.c.b16 %v3073_v2, %v3072_v56  ;;  %v7530_v48 = vadd.f32 %v7270_v16, %v2306_v41  ;;  %v4418_v32 = vpack.c.b16 %v4390_v62, %v4389_v38  ;;  %v3993_v2 = vld [vmem:[#allocation2 + $0xc8] sm:$0x1]  ;;  %v3038_v16 = vshll.u32 %v2657_v10, 16  ;;  %v7538_v41 = vld [vmem:[#allocation2 + $0x50] sm:$0x1] }
 0x32a   : > { %v7514_v49 = vpop.f32.mrf.mxu3  ;;  %v7521_v61 = vadd.f32 %v3179_v37, %v7426_v52  ;;  %v3992_v52 = vld [vmem:[#allocation2 + $0xc4] sm:$0xf]  ;;  %v3021_v37 = vrot.slane %v3019_v9, 4  ;;  %v4099_v56 = vrot.slane %v4097_v57, 5  ;;  %v3446_v9 = vunpack.c.l.b16 %v3345_v34 }
 0x32b   : > { %v4767_v25 = vrot.slane %v3992_v52, 5  ;;  %v3036_v23 = vrot.slane %v3035_v27, 4  ;;  %v4113_v43 = vshll.u32 %v7538_v41, 16  ;;  %v3040_v4 = vrot.slane %v3038_v16, 5 }
 0x32c   : > { %8422 = vst [vmem:[#allocation35_spill] sm:$0xff] %v7521_v61  ;;  %v5806_v61 = vld [vmem:[#allocation2 + $0x6c] sm:$0xff]  ;;  %v3025_v53 = vor.u32 %v3024_v54, %v3021_v37  ;;  %v3476_v57 = vpack.c.b16 %v3447_v51, %v3446_v9  ;;  %v4100_v38 = vor.u32 %v4099_v56, %v4096_v26  ;;  %v4111_v52 = vrot.slane %v4110_v15, 4  ;;  %v7554_v34 = vpop.f32.mrf.mxu0  ;;  %v8424_v37 = vld [vmem:[#allocation29_spill] sm:$0xff] }
 0x32d   : > { %v4769_v30 = vrot.slane %v4767_v25, 4  ;;  %v4768_v10 = vsel %vm6529_vm2, %v5736_v63, %v4767_v25  ;;  %v1900_v54 = vadd.f32 %v7451_v44, %v8424_v37  ;;  %v7559_v27 = vadd.f32 %v7303_v14, %v2307_v59  ;;  %v7564_v51 = vld [vmem:[#allocation2 + $0x58] sm:$0xf]  ;;  %v6007_v25 = vld [vmem:[#allocation2 + $0x34] sm:$0xf] }
 0x32e   : > { %5589 = vmatmul.msk.bf16.gmra.mxu2 %vm1577_vm11, %v3090_v42  ;;  %v4770_v42 = vrot.slane %v3993_v2, 5  ;;  %v3026_v26 = vrot.slane %v3025_v53, 4  ;;  %v3041_v2 = vsel %vm6356_vm9, %v3036_v23, %v3040_v4  ;;  %v3351_v16 = vrot.slane %v6007_v25, 5  ;;  %v3964_v23 = vld [vmem:[#allocation2 + $0x54] sm:$0xf] }
 0x32f   : > { %v7535_v17 = vpop.f32.mrf.mxu1  ;;  %v4115_v44 = vrot.slane %v4113_v43, 5  ;;  %v4101_v59 = vrot.slane %v4100_v38, 4  ;;  %v4127_v9 = vshll.u32 %v7564_v51, 16  ;;  %v6008_v4 = vld [vmem:[#allocation2 + $0x38] sm:$0x1] }
 0x330   : > { %v4771_v7 = vsel %vm6529_vm2, %v4769_v30, %v4770_v42  ;;  %v3031_v63 = vsel %vm6356_vm9, %v3026_v26, %v7516_v20  ;;  %v2308_v30 = vadd.f32 %v7181_v24, %v1900_v54  ;;  %v3353_v43 = vrot.slane %v3351_v16, 4  ;;  %v3267_v37 = vld [vmem:[#allocation2 + $0x30] sm:$0xe] }
 0x331   : > { %v3182_v62 = vpop.f32.mrf.mxu2  ;;  %v4116_v53 = vsel %vm6356_vm9, %v4111_v52, %v4115_v44  ;;  %v3074_v38 = vunpack.c.l.b16 %v3031_v63  ;;  %v4106_v24 = vsel %vm6356_vm9, %v4101_v59, %v7525_v35  ;;  %v4118_v52 = vshrl.u32 %v3964_v23, 16 }
 0x332   : > { %v7542_v22 = vpop.f32.mrf.mxu3  ;;  %5709 = vmatmul.msk.bf16.gmra.mxu1 %vm1577_vm11, %v4418_v32  ;;  %v7548_v21 = vadd.f32 %v3182_v62, %v7467_v1  ;;  %v5738_v1 = vld [vmem:[%s8333_s4 + $0x10] sm:$0x3]  ;;  %v4810_v32 = vunpack.c.l.b16 %v4771_v7  ;;  %v3075_v62 = vunpack.c.l.b16 %v3041_v2  ;;  %v3354_v7 = vrot.slane %v6008_v4, 5 }
 0x333   : > { %5696 = vmatmul.msk.bf16.gmra.mxu0 %vm1577_vm11, %v5806_v61  ;;  %v4809_v61 = vunpack.c.l.b16 %v4768_v10  ;;  %v4878_v56 = vsel %vm1626_vm10, %v5738_v1, 0  ;;  %v4131_v10 = vshrl.u32 %v7564_v51, 16  ;;  %v4392_v54 = vunpack.c.l.b16 %v4116_v53 }
 0x334   : > { %4887 = vmatpush.bf16.msra.mxu2 %v4878_v56  ;;  %v4121_v1 = vshll.u32 %v3964_v23, 16  ;;  %v3091_v2 = vpack.c.b16 %v3075_v62, %v3074_v38  ;;  %v7593_v56 = vadd.f32 %v7329_v39, %v2308_v30  ;;  %v3355_v44 = vsel %vm6529_vm2, %v3353_v43, %v3354_v7  ;;  %v5807_v43 = vld [vmem:[#allocation2 + $0x78] sm:$0xff] }
 0x335   : > { %v7572_v15 = vpack.c.b16 %v4810_v32, %v4809_v61  ;;  %v4129_v61 = vrot.slane %v4127_v9, 5  ;;  %v8425_v32 = vld [vmem:[#allocation31_spill] sm:$0xff]  ;;  %v4133_v25 = vrot.slane %v4131_v10, 4  ;;  %v4391_v63 = vunpack.c.l.b16 %v4106_v24  ;;  %v7602_v9 = vld [vmem:[#allocation2 + $0x5c] sm:$0x1] }
 0x336   : > { %v1902_v26 = vadd.f32 %v7478_v40, %v8425_v32  ;;  %v4120_v40 = vrot.slane %v4118_v52, 4  ;;  %v4123_v62 = vrot.slane %v4121_v1, 5  ;;  %v3449_v53 = vunpack.c.l.b16 %v3355_v44 }
 0x337   : > { %5610 = vmatmul.msk.bf16.gmra.mxu3 %vm1577_vm11, %v3476_v57  ;;  %v7570_v14 = vpop.f32.mrf.mxu1  ;;  %v4419_v59 = vpack.c.b16 %v4392_v54, %v4391_v63  ;;  %v4134_v23 = vor.u32 %v4133_v25, %v4129_v61  ;;  %v4137_v38 = vshll.u32 %v7602_v9, 16  ;;  %v8426_v54 = vld [vmem:[#allocation33_spill] sm:$0xff] }
 0x338   : > { %v2309_v39 = vadd.f32 %v7204_v18, %v1902_v26  ;;  %v4124_v24 = vor.u32 %v4123_v62, %v4120_v40  ;;  %v1905_v52 = vadd.f32 %v7514_v49, %v8426_v54  ;;  %v4151_v49 = vshll.u32 %v7361_v46, 16 }
 0x339   : > { %v3184_v57 = vpop.f32.mrf.mxu2  ;;  %v4135_v32 = vrot.slane %v4134_v23, 4  ;;  %v4155_v40 = vshrl.u32 %v7361_v46, 16 }
 0x33a   : > { %v7582_v42 = vpop.f32.mrf.mxu3  ;;  %v7585_v20 = vadd.f32 %v3184_v57, %v7492_v5  ;;  %v5594_v5 = vrot.slane %v3267_v37, 9  ;;  %v7597_v57 = vpop.f32.mrf.mxu0  ;;  %v6009_v37 = vld [vmem:[#allocation2 + $0x40] sm:$0xf]  ;;  %v7618_v26 = vadd.f32 %v7369_v55, %v2309_v39  ;;  %v2310_v63 = vadd.f32 %v7231_v28, %v1905_v52  ;;  %v6010_v55 = vld [vmem:[#allocation2 + $0x44] sm:$0x1] }
 0x33b   : > { %v3358_v18 = vrot.slane %v6009_v37, 5  ;;  %v3361_v62 = vrot.slane %v6010_v55, 5  ;;  %v4153_v52 = vrot.slane %v4151_v49, 5 }
 0x33c   : > { %v3352_v35 = vsel %vm6529_vm2, %v5594_v5, %v3351_v16  ;;  %v4125_v5 = vrot.slane %v4124_v24, 4  ;;  %v8427_v24 = vld [vmem:[#allocation36_spill] sm:$0xff] }
 0x33d   : > { %v3448_v7 = vunpack.c.l.b16 %v3352_v35  ;;  %v3360_v25 = vrot.slane %v3358_v18, 4  ;;  %v1907_v54 = vadd.f32 %v7542_v22, %v8427_v24  ;;  %v6011_v24 = vld [vmem:[#allocation2 + $0x4c] sm:$0xf] }
 0x33e   : > { %5590 = vmatmul.msk.bf16.gmra.mxu2 %vm1577_vm11, %v3091_v2  ;;  %v4139_v2 = vrot.slane %v4137_v38, 5  ;;  %v4130_v28 = vsel %vm6356_vm9, %v4125_v5, %v4129_v61 }
 0x33f   : > { %v7605_v30 = vpop.f32.mrf.mxu1  ;;  %v3477_v1 = vpack.c.b16 %v3449_v53, %v3448_v7  ;;  %v3362_v7 = vsel %vm6529_vm2, %v3360_v25, %v3361_v62  ;;  %v2311_v5 = vadd.f32 %v7268_v29, %v1907_v54  ;;  %v4161_v62 = vshll.u32 %v7376_v13, 16  ;;  %v8429_v29 = vld [vmem:[#allocation38_spill] sm:$0xff] }
 0x340   : > { %v4140_v35 = vsel %vm6356_vm9, %v4135_v32, %v4139_v2  ;;  %v7642_v32 = vadd.f32 %v7402_v47, %v2310_v63  ;;  %v3451_v61 = vunpack.c.l.b16 %v3362_v7 }
 0x341   : > { %v3187_v4 = vpop.f32.mrf.mxu2  ;;  %v4394_v38 = vunpack.c.l.b16 %v4140_v35  ;;  %v4163_v13 = vrot.slane %v4161_v62, 5 }
 0x342   : > { %v7607_v10 = vpop.f32.mrf.mxu3  ;;  %5710 = vmatmul.msk.bf16.gmra.mxu1 %vm1577_vm11, %v4419_v59  ;;  %v7611_v16 = vadd.f32 %v3187_v4, %v7530_v48  ;;  %v3268_v48 = vld [vmem:[#allocation2 + $0x3c] sm:$0xe]  ;;  %v7621_v44 = vpop.f32.mrf.mxu0  ;;  %v3967_v59 = vld [vmem:[#allocation2 + $0x60] sm:$0xf] }
 0x343   : > { %5697 = vmatmul.msk.bf16.gmra.mxu0 %vm1577_vm11, %v5807_v43  ;;  %v5595_v4 = vrot.slane %v3268_v48, 9  ;;  %v4142_v37 = vshrl.u32 %v3967_v59, 16  ;;  %v4145_v46 = vshll.u32 %v3967_v59, 16  ;;  %v8428_v48 = vld [vmem:[#allocation26_spill] sm:$0xff] }
 0x345   : > { %v3359_v2 = vsel %vm6529_vm2, %v5595_v4, %v3358_v18  ;;  %v4144_v35 = vrot.slane %v4142_v37, 4  ;;  %v4147_v59 = vrot.slane %v4145_v46, 5  ;;  %v1910_v4 = vadd.f32 %v7582_v42, %v8429_v29  ;;  %v7666_v46 = vld [vmem:[#allocation2 + $0x70] sm:$0xf] }
 0x346   : > { %v3450_v49 = vunpack.c.l.b16 %v3359_v2  ;;  %v7664_v37 = vadd.f32 %v7436_v31, %v2311_v5  ;;  %v4175_v54 = vshll.u32 %v7666_v46, 16  ;;  %v3970_v2 = vld [vmem:[#allocation2 + $0x6c] sm:$0xf] }
 0x347   : > { %5611 = vmatmul.msk.bf16.gmra.mxu3 %vm1577_vm11, %v3477_v1  ;;  %v7630_v23 = vpop.f32.mrf.mxu1  ;;  %v4157_v1 = vrot.slane %v4155_v40, 4  ;;  %v5808_v40 = vld [vmem:[#allocation2 + $0x84] sm:$0xff]  ;;  %v4148_v7 = vor.u32 %v4147_v59, %v4144_v35 }
 0x348   : > { %v3269_v35 = vld [vmem:[#allocation2 + $0x48] sm:$0xe] }
 0x349   : > { %v3189_v53 = vpop.f32.mrf.mxu2  ;;  %v4158_v55 = vor.u32 %v4157_v1, %v4153_v52  ;;  %v2312_v1 = vadd.f32 %v7312_v11, %v1910_v4  ;;  %v4177_v4 = vrot.slane %v4175_v54, 5 }
 0x34a   : > { %v7628_v39 = vpop.f32.mrf.mxu3  ;;  %v7633_v43 = vadd.f32 %v3189_v53, %v7559_v27  ;;  %v4393_v27 = vunpack.c.l.b16 %v4130_v28  ;;  %v7652_v63 = vpop.f32.mrf.mxu0  ;;  %v3478_v53 = vpack.c.b16 %v3451_v61, %v3450_v49 }
 0x34c   : > { %v4420_v25 = vpack.c.b16 %v4394_v38, %v4393_v27  ;;  %v4159_v38 = vrot.slane %v4158_v55, 4  ;;  %v4149_v27 = vrot.slane %v4148_v7, 4  ;;  %v6012_v55 = vld [vmem:[#allocation2 + $0x50] sm:$0x1] }
 0x34d   : > { %v3368_v11 = vrot.slane %v6012_v55, 5 }
 0x34e   : > { %5739 = vmatmul.msk.bf16.vlgmr.msra.gmra.mxu2 %vm1577_vm11, %v8428_v48  ;;  %v4164_v42 = vsel %vm6356_vm9, %v4159_v38, %v4163_v13  ;;  %v4179_v48 = vshrl.u32 %v7666_v46, 16  ;;  %v4154_v59 = vsel %vm6356_vm9, %v4149_v27, %v4153_v52  ;;  %v7686_v38 = vadd.f32 %v7470_v33, %v2312_v1  ;;  %v8431_v27 = vld [vmem:[#allocation27_spill] sm:$0xff] }
 0x34f   : > { %v7661_v28 = vpop.f32.mrf.mxu1  ;;  %v4396_v49 = vunpack.c.l.b16 %v4164_v42  ;;  %v4395_v52 = vunpack.c.l.b16 %v4154_v59 }
 0x350   : > { %v4181_v7 = vrot.slane %v4179_v48, 4 }
 0x351   : > { %v3192_v47 = vpop.f32.mrf.mxu2 }
 0x352   : > { %v7649_v22 = vpop.f32.mrf.mxu3  ;;  %5711 = vmatmul.msk.bf16.gmra.mxu1 %vm1577_vm11, %v4420_v25  ;;  %v7655_v18 = vadd.f32 %v3192_v47, %v7593_v56  ;;  %v3365_v56 = vrot.slane %v6011_v24, 5  ;;  %v4169_v47 = vshll.u32 %v3970_v2, 16  ;;  %v7681_v62 = vpop.f32.mrf.mxu0 }
 0x353   : > { %5698 = vmatmul.msk.bf16.gmra.mxu0 %vm1577_vm11, %v5808_v40  ;;  %v4166_v40 = vshrl.u32 %v3970_v2, 16  ;;  %v4421_v2 = vpack.c.b16 %v4396_v49, %v4395_v52 }
 0x354   : > { %v3367_v25 = vrot.slane %v3365_v56, 4  ;;  %v4171_v48 = vrot.slane %v4169_v47, 5 }
 0x355   : > { %v4168_v54 = vrot.slane %v4166_v40, 4  ;;  %v8433_v40 = vld [vmem:[#allocation41_spill] sm:$0xff] }
 0x356   : > { %v3369_v24 = vsel %vm6529_vm2, %v3367_v25, %v3368_v11  ;;  %v5809_v25 = vld [vmem:[#allocation2 + $0x90] sm:$0xff] }
 0x357   : > { %5612 = vmatmul.msk.bf16.gmra.mxu3 %vm1577_vm11, %v3478_v53  ;;  %v8430_v53 = vld [vmem:[#allocation39_spill] sm:$0xff]  ;;  %v7690_v13 = vpop.f32.mrf.mxu1  ;;  %v3453_v1 = vunpack.c.l.b16 %v3369_v24  ;;  %v4172_v49 = vor.u32 %v4171_v48, %v4168_v54  ;;  %v7712_v24 = vld [vmem:[#allocation2 + $0x7c] sm:$0xf]  ;;  %v3973_v54 = vld [vmem:[#allocation2 + $0x78] sm:$0xf] }
 0x358   : > { %v1912_v29 = vadd.f32 %v7607_v10, %v8430_v53  ;;  %v7696_v10 = vld [vmem:[#allocation2 + $0x74] sm:$0x1]  ;;  %v4203_v48 = vshrl.u32 %v7712_v24, 16 }
 0x359   : > { %v3194_v61 = vpop.f32.mrf.mxu2 }
 0x35a   : > { %v7674_v31 = vpop.f32.mrf.mxu3  ;;  %v7677_v5 = vadd.f32 %v3194_v61, %v7618_v26  ;;  %v5596_v26 = vrot.slane %v3269_v35, 9  ;;  %v2313_v33 = vadd.f32 %v7345_v36, %v1912_v29  ;;  %v4182_v61 = vor.u32 %v4181_v7, %v4177_v4  ;;  %v6013_v7 = vld [vmem:[#allocation2 + $0x58] sm:$0xf]  ;;  %v7714_v52 = vpop.f32.mrf.mxu0 }
 0x35b   : > { %v1915_v36 = vadd.f32 %v7628_v39, %v8433_v40  ;;  %v4190_v40 = vshrl.u32 %v3973_v54, 16 }
 0x35c   : > { %v3366_v42 = vsel %vm6529_vm2, %v5596_v26, %v3365_v56  ;;  %v4185_v56 = vshll.u32 %v7696_v10, 16  ;;  %v4183_v53 = vrot.slane %v4182_v61, 4  ;;  %v7710_v29 = vadd.f32 %v7499_v3, %v2313_v33 }
 0x35d   : > { %v3452_v55 = vunpack.c.l.b16 %v3366_v42  ;;  %v3372_v26 = vrot.slane %v6013_v7, 5  ;;  %v2314_v42 = vadd.f32 %v7396_v6, %v1915_v36  ;;  %v4199_v3 = vshll.u32 %v7712_v24, 16 }
 0x35e   : > { %5740 = vmatmul.msk.bf16.gmra.mxu2 %vm1577_vm11, %v8431_v27  ;;  %v4173_v27 = vrot.slane %v4172_v49, 4  ;;  %v4193_v36 = vshll.u32 %v3973_v54, 16 }
 0x35f   : > { %v3479_v47 = vpack.c.b16 %v3453_v1, %v3452_v55  ;;  %v3374_v61 = vrot.slane %v3372_v26, 4  ;;  %v6014_v55 = vld [vmem:[#allocation2 + $0x5c] sm:$0x1]  ;;  %v7733_v7 = vrot.slane %v4199_v3, 5  ;;  %v7746_v3 = vld [vmem:[#allocation2 + $0x80] sm:$0x1] }
 0x360   : > { %v4178_v6 = vsel %vm6356_vm9, %v4173_v27, %v4177_v4  ;;  %v8436_v4 = vld [vmem:[#allocation13_spill] sm:$0xff] }
 0x361   : > { %v3197_v59 = vpop.f32.mrf.mxu2  ;;  %v1920_v27 = vadd.f32 %v7674_v31, %v8436_v4  ;;  %v5810_v31 = vld [vmem:[#allocation2 + $0x9c] sm:$0xff] }
 0x362   : > { %v7699_v35 = vpop.f32.mrf.mxu3  ;;  %5712 = vmatmul.msk.bf16.gmra.mxu1 %vm1577_vm11, %v4421_v2  ;;  %v7703_v11 = vadd.f32 %v3197_v59, %v7642_v32  ;;  %v4187_v32 = vrot.slane %v4185_v56, 5  ;;  %v7718_v2 = vpop.f32.mrf.mxu1  ;;  %v3270_v59 = vld [vmem:[#allocation2 + $0x54] sm:$0xe]  ;;  %v3375_v56 = vrot.slane %v6014_v55, 5 }
 0x363   : > { %5699 = vmatmul.msk.bf16.gmra.mxu0 %vm1577_vm11, %v5809_v25 }
 0x364   : > { %8432 = vst [vmem:[#allocation20_spill] sm:$0xff] %v7703_v11  ;;  %v4188_v39 = vsel %vm6356_vm9, %v4183_v53, %v4187_v32  ;;  %v4205_v32 = vrot.slane %v4203_v48, 4  ;;  %v7736_v11 = vadd.f32 %v7535_v17, %v2314_v42  ;;  %v4192_v48 = vrot.slane %v4190_v40, 4  ;;  %v7748_v42 = vpop.f32.mrf.mxu0 }
 0x365   : > { %v4398_v49 = vunpack.c.l.b16 %v4188_v39  ;;  %v8437_v39 = vld [vmem:[#allocation37_spill] sm:$0xff]  ;;  %v4195_v17 = vrot.slane %v4193_v36, 5  ;;  %v4209_v36 = vshll.u32 %v7746_v3, 16 }
 0x367   : > { %5613 = vmatmul.msk.bf16.gmra.mxu3 %vm1577_vm11, %v3479_v47  ;;  %v8435_v47 = vld [vmem:[#allocation42_spill] sm:$0xff] }
 0x368   : > { %v1917_v53 = vadd.f32 %v7649_v22, %v8435_v47  ;;  %v8438_v47 = vld [vmem:[#allocation14_spill] sm:$0xff] }
 0x369   : > { %v3199_v1 = vpop.f32.mrf.mxu2 }
 0x36a   : > { %v7724_v33 = vpop.f32.mrf.mxu3  ;;  %v7727_v25 = vadd.f32 %v3199_v1, %v7664_v37  ;;  %v5597_v37 = vrot.slane %v3270_v59, 9  ;;  %v3376_v1 = vsel %vm6529_vm2, %v3374_v61, %v3375_v56  ;;  %v2315_v59 = vadd.f32 %v7432_v50, %v1917_v53 }
 0x36b   : > { %v3455_v61 = vunpack.c.l.b16 %v3376_v1  ;;  %v4196_v50 = vor.u32 %v4195_v17, %v4192_v48  ;;  %v1922_v53 = vadd.f32 %v7699_v35, %v8438_v47  ;;  %v3976_v35 = vld [vmem:[#allocation2 + $0x84] sm:$0xf]  ;;  %v6016_v48 = vld [vmem:[#allocation2 + $0x88] sm:$0xf] }
 0x36c   : > { %8434 = vst [vmem:[#allocation23_spill] sm:$0xff] %v7727_v25  ;;  %v4397_v25 = vunpack.c.l.b16 %v4178_v6  ;;  %v3373_v22 = vsel %vm6529_vm2, %v5597_v37, %v3372_v26  ;;  %v4206_v6 = vor.u32 %v4205_v32, %v7733_v7  ;;  %v2316_v26 = vadd.f32 %v7476_v45, %v1920_v27  ;;  %v6015_v45 = vld [vmem:[#allocation2 + $0x64] sm:$0xf] }
 0x36d   : > { %v7766_v1 = vadd.f32 %v7570_v14, %v2315_v59  ;;  %v3379_v4 = vrot.slane %v6015_v45, 5  ;;  %v4211_v27 = vrot.slane %v4209_v36, 5  ;;  %v4223_v17 = vshll.u32 %v6016_v48, 16 }
 0x36e   : > { %5741 = vmatmul.msk.bf16.gmra.mxu2 %vm1577_vm11, %v8437_v39  ;;  %v4422_v54 = vpack.c.b16 %v4398_v49, %v4397_v25  ;;  %v7756_v25 = vpop.f32.mrf.mxu1  ;;  %v3454_v49 = vunpack.c.l.b16 %v3373_v22  ;;  %v4207_v37 = vrot.slane %v4206_v6, 4  ;;  %v4197_v39 = vrot.slane %v4196_v50, 4 }
 0x36f   : > { %v2317_v22 = vadd.f32 %v7518_v19, %v1922_v53  ;;  %v3381_v6 = vrot.slane %v3379_v4, 4  ;;  %v4214_v50 = vshrl.u32 %v3976_v35, 16  ;;  %v4217_v53 = vshll.u32 %v3976_v35, 16 }
 0x370   : > { %v3480_v32 = vpack.c.b16 %v3455_v61, %v3454_v49  ;;  %v4227_v61 = vshrl.u32 %v6016_v48, 16  ;;  %v4202_v19 = vsel %vm6356_vm9, %v4197_v39, %v7733_v7  ;;  %v4697_v7 = vrot.slane %v7494_v58, 5  ;;  %v8439_v39 = vld [vmem:[#allocation16_spill] sm:$0xff] }
 0x371   : > { %v3202_v56 = vpop.f32.mrf.mxu2  ;;  %v7790_v45 = vadd.f32 %v7630_v23, %v2317_v22  ;;  %v4399_v48 = vunpack.c.l.b16 %v4202_v19  ;;  %v4216_v23 = vrot.slane %v4214_v50, 4  ;;  %v4219_v22 = vrot.slane %v4217_v53, 5 }
 0x372   : > { %v7752_v55 = vpop.f32.mrf.mxu3  ;;  %5713 = vmatmul.msk.bf16.gmra.mxu1 %vm1577_vm11, %v4422_v54  ;;  %v7759_v40 = vadd.f32 %v3202_v56, %v7686_v38  ;;  %v7770_v38 = vadd.f32 %v7605_v30, %v2316_v26  ;;  %v4212_v54 = vsel %vm6356_vm9, %v4207_v37, %v4211_v27  ;;  %v3271_v30 = vld [vmem:[#allocation2 + $0x60] sm:$0xe]  ;;  %v6017_v26 = vld [vmem:[#allocation2 + $0x68] sm:$0x1]  ;;  %v4229_v37 = vrot.slane %v4227_v61, 4 }
 0x373   : > { %5700 = vmatmul.msk.bf16.gmra.mxu0 %vm1577_vm11, %v5810_v31  ;;  %v7777_v31 = vpop.f32.mrf.mxu0  ;;  %v3382_v49 = vrot.slane %v6017_v26, 5  ;;  %v4400_v36 = vunpack.c.l.b16 %v4212_v54  ;;  %v1925_v54 = vadd.f32 %v7724_v33, %v8439_v39  ;;  %v4699_v19 = vrot.slane %v4697_v7, 4 }
 0x374   : > { %v4700_v50 = vrot.slane %v7538_v41, 5 }
 0x375   : > { %v3383_v27 = vsel %vm6529_vm2, %v3381_v6, %v3382_v49  ;;  %v5811_v6 = vld [vmem:[#allocation2 + $0xa8] sm:$0xff]  ;;  %v2318_v33 = vadd.f32 %v7554_v34, %v1925_v54  ;;  %v6019_v34 = vld [vmem:[#allocation2 + $0x70] sm:$0xf] }
 0x376   : > { %v7785_v47 = vpop.f32.mrf.mxu1  ;;  %v3457_v61 = vunpack.c.l.b16 %v3383_v27  ;;  %v3386_v54 = vrot.slane %v6019_v34, 5 }
 0x377   : > { %5614 = vmatmul.msk.bf16.gmra.mxu3 %vm1577_vm11, %v3480_v32  ;;  %v7787_v32 = vrot.slane %v4223_v17, 5  ;;  %v4423_v17 = vpack.c.b16 %v4400_v36, %v4399_v48  ;;  %v7821_v41 = vadd.f32 %v7661_v28, %v2318_v33  ;;  %v6021_v33 = vld [vmem:[#allocation2 + $0x74] sm:$0x1] }
 0x378   : > { %v3388_v28 = vrot.slane %v3386_v54, 4 }
 0x379   : > { %v3204_v59 = vpop.f32.mrf.mxu2 }
 0x37a   : > { %v7775_v14 = vpop.f32.mrf.mxu3  ;;  %v7780_v56 = vadd.f32 %v3204_v59, %v7710_v29  ;;  %v5598_v29 = vrot.slane %v3271_v30, 9  ;;  %v8440_v59 = vld [vmem:[#allocation40_spill] sm:$0xff]  ;;  %v4230_v30 = vor.u32 %v4229_v37, %v7787_v32  ;;  %v8442_v37 = vld [vmem:[#allocation19_spill] sm:$0xff] }
 0x37b   : > { %v7811_v53 = vpop.f32.mrf.mxu0  ;;  %v1927_v27 = vadd.f32 %v7752_v55, %v8442_v37  ;;  %v3272_v37 = vld [vmem:[#allocation2 + $0x6c] sm:$0xe] }
 0x37c   : > { %v3380_v35 = vsel %vm6529_vm2, %v5598_v29, %v3379_v4  ;;  %v6018_v4 = vld [vmem:[#allocation2 + $0x8c] sm:$0x1]  ;;  %v4607_v29 = vld [vmem:[#allocation2 + $0x48] sm:$0xe] }
 0x37d   : > { %v3456_v49 = vunpack.c.l.b16 %v3380_v35  ;;  %v4233_v36 = vshll.u32 %v6018_v4, 16  ;;  %v5726_v35 = vrot.slane %v4607_v29, 9 }
 0x37e   : > { %5742 = vmatmul.msk.bf16.gmra.mxu2 %vm1577_vm11, %v8440_v59  ;;  %v4220_v59 = vor.u32 %v4219_v22, %v4216_v23  ;;  %v6020_v23 = vld [vmem:[#allocation2 + $0x94] sm:$0xf] }
 0x37f   : > { %v3481_v48 = vpack.c.b16 %v3457_v61, %v3456_v49  ;;  %v4698_v55 = vsel %vm6529_vm2, %v5726_v35, %v4697_v7  ;;  %v3979_v61 = vld [vmem:[#allocation2 + $0x90] sm:$0xf]  ;;  %v4247_v22 = vshll.u32 %v6020_v23, 16  ;;  %v2319_v49 = vadd.f32 %v7597_v57, %v1927_v27 }
 0x380   : > { %v4221_v4 = vrot.slane %v4220_v59, 4  ;;  %v4789_v57 = vunpack.c.l.b16 %v4698_v55  ;;  %v4238_v27 = vshrl.u32 %v3979_v61, 16  ;;  %v4241_v35 = vshll.u32 %v3979_v61, 16 }
 0x381   : > { %v3207_v58 = vpop.f32.mrf.mxu2 }
 0x382   : > { %v7802_v26 = vpop.f32.mrf.mxu3  ;;  %5714 = vmatmul.msk.bf16.gmra.mxu1 %vm1577_vm11, %v4423_v17  ;;  %v7807_v39 = vadd.f32 %v3207_v58, %v7736_v11  ;;  %v4231_v17 = vrot.slane %v4230_v30, 4  ;;  %v4701_v11 = vsel %vm6529_vm2, %v4699_v19, %v4700_v50  ;;  %v7817_v58 = vpop.f32.mrf.mxu1  ;;  %v4251_v30 = vshrl.u32 %v6020_v23, 16 }
 0x383   : > { %5701 = vmatmul.msk.bf16.gmra.mxu0 %vm1577_vm11, %v5811_v6  ;;  %v4235_v6 = vrot.slane %v4233_v36, 5  ;;  %v4790_v29 = vunpack.c.l.b16 %v4701_v11  ;;  %v4226_v34 = vsel %vm6356_vm9, %v4221_v4, %v7787_v32  ;;  %v8444_v32 = vld [vmem:[#allocation21_spill] sm:$0xff] }
 0x384   : > { %8441 = vst [vmem:[#allocation25_spill] sm:$0xff] %v7807_v39  ;;  %v4253_v11 = vrot.slane %v4251_v30, 4  ;;  %v7839_v39 = vadd.f32 %v7690_v13, %v2319_v49  ;;  %v1930_v55 = vadd.f32 %v7775_v14, %v8444_v32  ;;  %v4240_v30 = vrot.slane %v4238_v27, 4  ;;  %v6022_v14 = vld [vmem:[#allocation2 + $0x98] sm:$0x1] }
 0x385   : > { %v4236_v19 = vsel %vm6356_vm9, %v4231_v17, %v4235_v6  ;;  %v7836_v17 = vrot.slane %v4247_v22, 5  ;;  %v5599_v6 = vrot.slane %v3272_v37, 9  ;;  %v4817_v23 = vpack.c.b16 %v4790_v29, %v4789_v57  ;;  %v4608_v27 = vld [vmem:[#allocation2 + $0x54] sm:$0xe] }
 0x386   : > { %v4402_v59 = vunpack.c.l.b16 %v4236_v19  ;;  %v4243_v13 = vrot.slane %v4241_v35, 5 }
 0x387   : > { %5615 = vmatmul.msk.bf16.gmra.mxu3 %vm1577_vm11, %v3481_v48  ;;  %v3389_v48 = vrot.slane %v6021_v33, 5  ;;  %v4704_v33 = vrot.slane %v7564_v51, 5  ;;  %v3387_v61 = vsel %vm6529_vm2, %v5599_v6, %v3386_v54  ;;  %v4254_v49 = vor.u32 %v4253_v11, %v7836_v17  ;;  %v5812_v51 = vld [vmem:[#allocation2 + $0xb4] sm:$0xff]  ;;  %v8445_v6 = vld [vmem:[#allocation22_spill] sm:$0xff] }
 0x388   : > { %v2320_v54 = vadd.f32 %v7621_v44, %v1930_v55  ;;  %v4707_v11 = vrot.slane %v7602_v9, 5 }
 0x389   : > { %v3209_v36 = vpop.f32.mrf.mxu2  ;;  %v4255_v35 = vrot.slane %v4254_v49, 4 }
 0x38a   : > { %v7828_v50 = vpop.f32.mrf.mxu3  ;;  %v7831_v7 = vadd.f32 %v3209_v36, %v7766_v1  ;;  %v3390_v1 = vsel %vm6529_vm2, %v3388_v28, %v3389_v48  ;;  %v4401_v36 = vunpack.c.l.b16 %v4226_v34  ;;  %v7852_v4 = vpop.f32.mrf.mxu1  ;;  %v4257_v28 = vshll.u32 %v6022_v14, 16 }
 0x38b   : > { %v3459_v19 = vunpack.c.l.b16 %v3390_v1  ;;  %v4706_v48 = vrot.slane %v4704_v33, 4  ;;  %v3458_v34 = vunpack.c.l.b16 %v3387_v61  ;;  %v5727_v14 = vrot.slane %v4608_v27, 9 }
 0x38c   : > { %8443 = vst [vmem:[#allocation29_spill] sm:$0xff] %v7831_v7  ;;  %v7844_v7 = vpop.f32.mrf.mxu0  ;;  %v4424_v22 = vpack.c.b16 %v4402_v59, %v4401_v36  ;;  %v4244_v59 = vor.u32 %v4243_v13, %v4240_v30  ;;  %v6023_v36 = vld [vmem:[#allocation2 + $0x7c] sm:$0xf]  ;;  %v7869_v55 = vadd.f32 %v7718_v2, %v2320_v54 }
 0x38d   : > { %v3482_v1 = vpack.c.b16 %v3459_v19, %v3458_v34  ;;  %v3393_v32 = vrot.slane %v6023_v36, 5  ;;  %v4708_v44 = vsel %vm6529_vm2, %v4706_v48, %v4707_v11  ;;  %v3982_v19 = vld [vmem:[#allocation2 + $0x9c] sm:$0xf] }
 0x38e   : > { %5743 = vmatmul.msk.bf16.gmra.mxu2 %vm1577_vm11, %v4817_v23  ;;  %v1932_v23 = vadd.f32 %v7802_v26, %v8445_v6  ;;  %v4245_v61 = vrot.slane %v4244_v59, 4  ;;  %v4705_v26 = vsel %vm6529_vm2, %v5727_v14, %v4704_v33  ;;  %v4792_v49 = vunpack.c.l.b16 %v4708_v44  ;;  %v8446_v59 = vld [vmem:[#allocation43_spill] sm:$0xff]  ;;  %v6025_v6 = vld [vmem:[#allocation2 + $0x80] sm:$0x1] }
 0x38f   : > { %v3395_v54 = vrot.slane %v3393_v32, 4  ;;  %v4791_v11 = vunpack.c.l.b16 %v4705_v26  ;;  %v4262_v36 = vshrl.u32 %v3982_v19, 16 }
 0x390   : > { %v2321_v13 = vadd.f32 %v7652_v63, %v1932_v23  ;;  %v4250_v63 = vsel %vm6356_vm9, %v4245_v61, %v7836_v17  ;;  %v3396_v23 = vrot.slane %v6025_v6, 5 }
 0x391   : > { %v3212_v37 = vpop.f32.mrf.mxu2  ;;  %v4818_v14 = vpack.c.b16 %v4792_v49, %v4791_v11 }
 0x392   : > { %v7854_v29 = vpop.f32.mrf.mxu3  ;;  %5715 = vmatmul.msk.bf16.gmra.mxu1 %vm1577_vm11, %v4424_v22  ;;  %v7859_v57 = vadd.f32 %v3212_v37, %v7770_v38  ;;  %v4259_v22 = vrot.slane %v4257_v28, 5  ;;  %v3273_v38 = vld [vmem:[#allocation2 + $0x78] sm:$0xe]  ;;  %v7878_v27 = vpop.f32.mrf.mxu1 }
 0x393   : > { %5702 = vmatmul.msk.bf16.gmra.mxu0 %vm1577_vm11, %v5812_v51  ;;  %v6024_v51 = vld [vmem:[#allocation2 + $0xa0] sm:$0xf]  ;;  %v5600_v2 = vrot.slane %v3273_v38, 9 }
 0x394   : > { %v4260_v9 = vsel %vm6356_vm9, %v4255_v35, %v4259_v22  ;;  %v7875_v30 = vpop.f32.mrf.mxu0  ;;  %v4271_v37 = vshll.u32 %v6024_v51, 16  ;;  %v4275_v28 = vshrl.u32 %v6024_v51, 16  ;;  %v4265_v22 = vshll.u32 %v3982_v19, 16 }
 0x395   : > { %v7890_v51 = vadd.f32 %v7756_v25, %v2321_v13  ;;  %v3394_v17 = vsel %vm6529_vm2, %v5600_v2, %v3393_v32  ;;  %v5813_v13 = vld [vmem:[#allocation2 + $0xc0] sm:$0xff] }
 0x396   : > { %v4273_v44 = vrot.slane %v4271_v37, 5  ;;  %v4277_v38 = vrot.slane %v4275_v28, 4  ;;  %v4267_v26 = vrot.slane %v4265_v22, 5  ;;  %v3460_v25 = vunpack.c.l.b16 %v3394_v17  ;;  %v6026_v2 = vld [vmem:[#allocation2 + $0xa4] sm:$0x1] }
 0x397   : > { %5616 = vmatmul.msk.bf16.gmra.mxu3 %vm1577_vm11, %v3482_v1  ;;  %v4404_v1 = vunpack.c.l.b16 %v4260_v9  ;;  %v4264_v9 = vrot.slane %v4262_v36, 4  ;;  %v4281_v11 = vshll.u32 %v6026_v2, 16 }
 0x398   : > { %v4278_v19 = vor.u32 %v4277_v38, %v4273_v44  ;;  %v6027_v38 = vld [vmem:[#allocation2 + $0x88] sm:$0xf] }
 0x399   : > { %v3214_v34 = vpop.f32.mrf.mxu2 }
 0x39a   : > { %v3550_v48 = vpop.f32.mrf.mxu3  ;;  %v7884_v33 = vadd.f32 %v3214_v34, %v7790_v45  ;;  %v3397_v45 = vsel %vm6529_vm2, %v3395_v54, %v3396_v23  ;;  %v8447_v34 = vld [vmem:[#allocation24_spill] sm:$0xff]  ;;  %v4268_v23 = vor.u32 %v4267_v26, %v4264_v9  ;;  %v7912_v22 = vpop.f32.mrf.mxu1  ;;  %v6028_v9 = vld [vmem:[#allocation2 + $0xac] sm:$0xf] }
 0x39b   : > { %v7881_v35 = vadd.f32 %v3550_v48, %v8446_v59  ;;  %v4403_v48 = vunpack.c.l.b16 %v4250_v63  ;;  %v1935_v59 = vadd.f32 %v7828_v50, %v8447_v34  ;;  %v3461_v49 = vunpack.c.l.b16 %v3397_v45  ;;  %v8448_v63 = vld [vmem:[#allocation44_spill] sm:$0xff]  ;;  %v3274_v34 = vld [vmem:[#allocation2 + $0x84] sm:$0xe] }
 0x39c   : > { %v7907_v6 = vpop.f32.mrf.mxu0  ;;  %v3400_v45 = vrot.slane %v6027_v38, 5  ;;  %v4295_v26 = vshll.u32 %v6028_v9, 16 }
 0x39d   : > { %v4425_v61 = vpack.c.b16 %v4404_v1, %v4403_v48  ;;  %v2322_v54 = vadd.f32 %v7681_v62, %v1935_v59  ;;  %v8449_v1 = vld [vmem:[#allocation28_spill] sm:$0xff]  ;;  %v4279_v62 = vrot.slane %v4278_v19, 4  ;;  %v4269_v59 = vrot.slane %v4268_v23, 4 }
 0x39e   : > { %5744 = vmatmul.msk.bf16.gmra.mxu2 %vm1577_vm11, %v4818_v14  ;;  %v1937_v36 = vadd.f32 %v7854_v29, %v8449_v1  ;;  %v3483_v14 = vpack.c.b16 %v3461_v49, %v3460_v25  ;;  %v3985_v29 = vld [vmem:[#allocation2 + $0xa8] sm:$0xf]  ;;  %v4299_v49 = vshrl.u32 %v6028_v9, 16  ;;  %v3402_v25 = vrot.slane %v3400_v45, 4 }
 0x39f   : > { %v7916_v48 = vadd.f32 %v7785_v47, %v2322_v54  ;;  %v5601_v54 = vrot.slane %v3274_v34, 9  ;;  %v4286_v23 = vshrl.u32 %v3985_v29, 16  ;;  %v4289_v1 = vshll.u32 %v3985_v29, 16 }
 0x3a0   : > { %v2323_v17 = vadd.f32 %v7714_v52, %v1937_v36  ;;  %v4274_v52 = vsel %vm6356_vm9, %v4269_v59, %v4273_v44  ;;  %v7929_v36 = vrot.slane %v4295_v26, 5 }
 0x3a1   : > { %v3217_v28 = vpop.f32.mrf.mxu2  ;;  %v3401_v44 = vsel %vm6529_vm2, %v5601_v54, %v3400_v45  ;;  %v4291_v29 = vrot.slane %v4289_v1, 5 }
 0x3a2   : > { %v3552_v37 = vpop.f32.mrf.mxu3  ;;  %5716 = vmatmul.msk.bf16.gmra.mxu1 %vm1577_vm11, %v4425_v61  ;;  %v7905_v32 = vadd.f32 %v3217_v28, %v7821_v41  ;;  %v4283_v41 = vrot.slane %v4281_v11, 5  ;;  %v7933_v38 = vadd.f32 %v7817_v58, %v2323_v17  ;;  %v7937_v34 = vpop.f32.mrf.mxu1  ;;  %v3462_v26 = vunpack.c.l.b16 %v3401_v44 }
 0x3a3   : > { %v7902_v50 = vadd.f32 %v3552_v37, %v8448_v63  ;;  %5703 = vmatmul.msk.bf16.gmra.mxu0 %vm1577_vm11, %v5813_v13  ;;  %v8450_v13 = vld [vmem:[#allocation45_spill] sm:$0xff]  ;;  %v6029_v63 = vld [vmem:[#allocation2 + $0x8c] sm:$0x1] }
 0x3a4   : > { %v4284_v61 = vsel %vm6356_vm9, %v4279_v62, %v4283_v41  ;;  %v3403_v2 = vrot.slane %v6029_v63, 5  ;;  %v4718_v62 = vrot.slane %v7666_v46, 5  ;;  %v4405_v41 = vunpack.c.l.b16 %v4274_v52 }
 0x3a5   : > { %v4406_v11 = vunpack.c.l.b16 %v4284_v61  ;;  %v4288_v61 = vrot.slane %v4286_v23, 4 }
 0x3a6   : > { %v4720_v58 = vrot.slane %v4718_v62, 4 }
 0x3a7   : > { %5617 = vmatmul.msk.bf16.gmra.mxu3 %vm1577_vm11, %v3483_v14  ;;  %v4301_v14 = vrot.slane %v4299_v49, 4  ;;  %v4426_v59 = vpack.c.b16 %v4406_v11, %v4405_v41  ;;  %v4292_v54 = vor.u32 %v4291_v29, %v4288_v61  ;;  %v6031_v11 = vld [vmem:[#allocation2 + $0x94] sm:$0xf]  ;;  %v6032_v29 = vld [vmem:[#allocation2 + $0xb8] sm:$0xf] }
 0x3a8   : > { %v3407_v23 = vrot.slane %v6031_v11, 5  ;;  %v3988_v61 = vld [vmem:[#allocation2 + $0xb4] sm:$0xf] }
 0x3a9   : > { %v3219_v37 = vpop.f32.mrf.mxu2  ;;  %v4302_v46 = vor.u32 %v4301_v14, %v7929_v36 }
 0x3aa   : > { %v3555_v19 = vpop.f32.mrf.mxu3  ;;  %v7925_v47 = vadd.f32 %v3219_v37, %v7839_v39  ;;  %v3404_v39 = vsel %vm6529_vm2, %v3402_v25, %v3403_v2  ;;  %v6030_v37 = vld [vmem:[#allocation2 + $0xb0] sm:$0x1]  ;;  %v4610_v25 = vld [vmem:[#allocation2 + $0x6c] sm:$0xe]  ;;  %v7959_v44 = vpop.f32.mrf.mxu1 }
 0x3ab   : > { %v7922_v28 = vadd.f32 %v3555_v19, %v8450_v13  ;;  %v3463_v9 = vunpack.c.l.b16 %v3404_v39  ;;  %v4721_v13 = vrot.slane %v7696_v10, 5  ;;  %v4303_v63 = vrot.slane %v4302_v46, 4 }
 0x3ac   : > { %v5729_v1 = vrot.slane %v4610_v25, 9  ;;  %v3917_v10 = vadd.f32 %v7748_v42, %v7881_v35  ;;  %v4323_v46 = vshrl.u32 %v6032_v29, 16 }
 0x3ad   : > { %v3484_v52 = vpack.c.b16 %v3463_v9, %v3462_v26  ;;  %v4722_v2 = vsel %vm6529_vm2, %v4720_v58, %v4721_v13  ;;  %v4319_v9 = vshll.u32 %v6032_v29, 16 }
 0x3ae   : > { %5745 = vmatmul.msk.bf16.gmra.mxu2 %vm1577_vm11, %v7406_v0  ;;  %v4305_v0 = vshll.u32 %v6030_v37, 16  ;;  %v4719_v39 = vsel %vm6529_vm2, %v5729_v1, %v4718_v62  ;;  %v4796_v41 = vunpack.c.l.b16 %v4722_v2  ;;  %v6033_v37 = vld [vmem:[#allocation2 + $0x98] sm:$0x1]  ;;  %v8451_v62 = vld [vmem:[#allocation47_spill] sm:$0xff]  ;;  %v4725_v2 = vrot.slane %v7712_v24, 5 }
 0x3af   : > { %v4795_v13 = vunpack.c.l.b16 %v4719_v39  ;;  %v7973_v1 = vrot.slane %v4319_v9, 5  ;;  %v3918_v24 = vadd.f32 %v7777_v31, %v7902_v50  ;;  %v4728_v50 = vrot.slane %v7746_v3, 5 }
 0x3b0   : > { %v4307_v14 = vrot.slane %v4305_v0, 5  ;;  %v3410_v0 = vrot.slane %v6033_v37, 5  ;;  %v6034_v37 = vld [vmem:[#allocation2 + $0xbc] sm:$0x1] }
 0x3b1   : > { %v3222_v49 = vpop.f32.mrf.mxu2  ;;  %v4820_v11 = vpack.c.b16 %v4796_v41, %v4795_v13  ;;  %v4329_v31 = vshll.u32 %v6034_v37, 16  ;;  %v3276_v37 = vld [vmem:[#allocation2 + $0x9c] sm:$0xe] }
 0x3b2   : > { %v3557_v17 = vpop.f32.mrf.mxu3  ;;  %5717 = vmatmul.msk.bf16.gmra.mxu1 %vm1577_vm11, %v4426_v59  ;;  %v7949_v45 = vadd.f32 %v3222_v49, %v7869_v55  ;;  %v4293_v55 = vrot.slane %v4292_v54, 4  ;;  %v4308_v59 = vsel %vm6356_vm9, %v4303_v63, %v4307_v14  ;;  %v3409_v49 = vrot.slane %v3407_v23, 4 }
 0x3b3   : > { %v7946_v19 = vadd.f32 %v3557_v17, %v7257_v12  ;;  %v3275_v12 = vld [vmem:[#allocation2 + $0x90] sm:$0xe]  ;;  %v4408_v54 = vunpack.c.l.b16 %v4308_v59  ;;  %v4313_v63 = vshll.u32 %v3988_v61, 16  ;;  %v7976_v14 = vadd.f32 %v7852_v4, %v3917_v10  ;;  %v4611_v4 = vld [vmem:[#allocation2 + $0x78] sm:$0xe] }
 0x3b4   : > { %v5602_v26 = vrot.slane %v3275_v12, 9  ;;  %v4298_v35 = vsel %vm6356_vm9, %v4293_v55, %v7929_v36  ;;  %v4325_v12 = vrot.slane %v4323_v46, 4  ;;  %v4727_v10 = vrot.slane %v4725_v2, 4 }
 0x3b5   : > { %v4407_v29 = vunpack.c.l.b16 %v4298_v35  ;;  %v4315_v59 = vrot.slane %v4313_v63, 5  ;;  %v5730_v13 = vrot.slane %v4611_v4, 9 }
 0x3b6   : > { %v3408_v36 = vsel %vm6529_vm2, %v5602_v26, %v3407_v23  ;;  %v8452_v23 = vld [vmem:[#allocation49_spill] sm:$0xff]  ;;  %v4729_v63 = vsel %vm6529_vm2, %v4727_v10, %v4728_v50  ;;  %v6037_v10 = vld [vmem:[#allocation2 + $0xa4] sm:$0x1] }
 0x3b7   : > { %5618 = vmatmul.msk.bf16.gmra.mxu3 %vm1577_vm11, %v3484_v52  ;;  %v4310_v52 = vshrl.u32 %v3988_v61, 16  ;;  %v4427_v55 = vpack.c.b16 %v4408_v54, %v4407_v29  ;;  %v4326_v61 = vor.u32 %v4325_v12, %v7973_v1  ;;  %v3464_v46 = vunpack.c.l.b16 %v3408_v36  ;;  %v8004_v36 = vpop.f32.mrf.mxu0 }
 0x3b8   : > { %v4726_v12 = vsel %vm6529_vm2, %v5730_v13, %v4725_v2  ;;  %v4798_v29 = vunpack.c.l.b16 %v4729_v63 }
 0x3b9   : > { %v3224_v17 = vpop.f32.mrf.mxu2  ;;  %v4312_v39 = vrot.slane %v4310_v52, 4  ;;  %v4327_v52 = vrot.slane %v4326_v61, 4  ;;  %v4797_v2 = vunpack.c.l.b16 %v4726_v12 }
 0x3ba   : > { %v3560_v58 = vpop.f32.mrf.mxu3  ;;  %v7967_v42 = vadd.f32 %v3224_v17, %v7890_v51  ;;  %v3411_v51 = vsel %vm6529_vm2, %v3409_v49, %v3410_v0  ;;  %v7987_v17 = vpop.f32.mrf.mxu1  ;;  %v6035_v0 = vld [vmem:[#allocation2 + $0xa0] sm:$0xf] }
 0x3bb   : > { %v7964_v25 = vadd.f32 %v3560_v58, %v8451_v62  ;;  %v3465_v41 = vunpack.c.l.b16 %v3411_v51  ;;  %v3414_v62 = vrot.slane %v6035_v0, 5  ;;  %v4316_v35 = vor.u32 %v4315_v59, %v4312_v39  ;;  %v3991_v59 = vld [vmem:[#allocation2 + $0xc0] sm:$0xf] }
 0x3bc   : > { %v4821_v50 = vpack.c.b16 %v4798_v29, %v4797_v2  ;;  %v4334_v0 = vshrl.u32 %v3991_v59, 16  ;;  %v4337_v13 = vshll.u32 %v3991_v59, 16 }
 0x3bd   : > { %v3485_v54 = vpack.c.b16 %v3465_v41, %v3464_v46  ;;  %v3416_v51 = vrot.slane %v3414_v62, 4  ;;  %v4317_v3 = vrot.slane %v4316_v35, 4  ;;  %v8453_v46 = vld [vmem:[#allocation50_spill] sm:$0xff] }
 0x3be   : > { %5746 = vmatmul.msk.bf16.gmra.mxu2 %vm1577_vm11, %v4820_v11  ;;  %v7999_v11 = vadd.f32 %v7878_v27, %v3918_v24  ;;  %v6036_v27 = vld [vmem:[#allocation2 + $0xc4] sm:$0xf]  ;;  %v4336_v29 = vrot.slane %v4334_v0, 4 }
 0x3bf   : > { %v4343_v24 = vshll.u32 %v6036_v27, 16  ;;  %v4347_v41 = vshrl.u32 %v6036_v27, 16 }
 0x3c1   : > { %v3227_v58 = vpop.f32.mrf.mxu2 }
 0x3c2   : > { %v3562_v9 = vpop.f32.mrf.mxu3  ;;  %5718 = vmatmul.msk.bf16.gmra.mxu1 %vm1577_vm11, %v4427_v55  ;;  %v7993_v49 = vadd.f32 %v3227_v58, %v7916_v48  ;;  %v4331_v48 = vrot.slane %v4329_v31, 5  ;;  %v3919_v55 = vadd.f32 %v7811_v53, %v7922_v28  ;;  %v4322_v53 = vsel %vm6356_vm9, %v4317_v3, %v7973_v1  ;;  %v8021_v35 = vpop.f32.mrf.mxu1 }
 0x3c3   : > { %v7990_v26 = vadd.f32 %v3562_v9, %v8452_v23  ;;  %v3417_v9 = vrot.slane %v6037_v10, 5 }
 0x3c4   : > { %v4332_v39 = vsel %vm6356_vm9, %v4327_v52, %v4331_v48  ;;  %v4349_v52 = vrot.slane %v4347_v41, 4  ;;  %v4573_v63 = vadd.f32 %v7912_v22, %v3919_v55  ;;  %v4409_v48 = vunpack.c.l.b16 %v4322_v53  ;;  %v8030_v22 = vpop.f32.mrf.mxu0  ;;  %v8454_v55 = vld [vmem:[#allocation30_spill] sm:$0xff] }
 0x3c5   : > { %v3418_v28 = vsel %vm6529_vm2, %v3416_v51, %v3417_v9  ;;  %v4410_v31 = vunpack.c.l.b16 %v4332_v39  ;;  %v3920_v51 = vadd.f32 %v7844_v7, %v7946_v19  ;;  %v4339_v39 = vrot.slane %v4337_v13, 5 }
 0x3c6   : > { %v3467_v12 = vunpack.c.l.b16 %v3418_v28 }
 0x3c7   : > { %5619 = vmatmul.msk.bf16.gmra.mxu3 %vm1577_vm11, %v3485_v54  ;;  %v4345_v54 = vrot.slane %v4343_v24, 5  ;;  %v4428_v3 = vpack.c.b16 %v4410_v31, %v4409_v48  ;;  %v4340_v7 = vor.u32 %v4339_v39, %v4336_v29  ;;  %v4574_v2 = vadd.f32 %v7937_v34, %v3920_v51 }
 0x3c8   : > { %v3921_v31 = vadd.f32 %v7875_v30, %v7964_v25 }
 0x3c9   : > { %v3229_v4 = vpop.f32.mrf.mxu2  ;;  %v4350_v27 = vor.u32 %v4349_v52, %v4345_v54 }
 0x3ca   : > { %v3565_v61 = vpop.f32.mrf.mxu3  ;;  %v8014_v23 = vadd.f32 %v3229_v4, %v7933_v38  ;;  %v5603_v38 = vrot.slane %v3276_v37, 9  ;;  %v6038_v4 = vld [vmem:[#allocation2 + $0xc8] sm:$0x1]  ;;  %v8039_v53 = vpop.f32.mrf.mxu1  ;;  %v4575_v29 = vadd.f32 %v7959_v44, %v3921_v31 }
 0x3cb   : > { %v8011_v58 = vadd.f32 %v3565_v61, %v8453_v46  ;;  %v4353_v10 = vshll.u32 %v6038_v4, 16  ;;  %v4351_v19 = vrot.slane %v4350_v27, 4  ;;  %v6039_v46 = vld [vmem:[#allocation2 + $0xac] sm:$0xf] }
 0x3cc   : > { %v3415_v1 = vsel %vm6529_vm2, %v5603_v38, %v3414_v62  ;;  %v3421_v37 = vrot.slane %v6039_v46, 5  ;;  %v8455_v38 = vld [vmem:[#allocation15_spill] sm:$0xff]  ;;  %v8054_v25 = vpop.f32.mrf.mxu0  ;;  %v6041_v46 = vld [vmem:[#allocation2 + $0xb8] sm:$0xf] }
 0x3cd   : > { %v3466_v61 = vunpack.c.l.b16 %v3415_v1  ;;  %v4355_v28 = vrot.slane %v4353_v10, 5  ;;  %v3277_v1 = vld [vmem:[#allocation2 + $0xa8] sm:$0xe] }
 0x3ce   : > { %5747 = vmatmul.msk.bf16.gmra.mxu2 %vm1577_vm11, %v4821_v50  ;;  %v4341_v50 = vrot.slane %v4340_v7, 4  ;;  %v3423_v52 = vrot.slane %v3421_v37, 4  ;;  %v5604_v39 = vrot.slane %v3277_v1, 9  ;;  %v6042_v1 = vld [vmem:[#allocation2 + $0xbc] sm:$0x1] }
 0x3cf   : > { %v3486_v9 = vpack.c.b16 %v3467_v12, %v3466_v61 }
 0x3d0   : > { %v4346_v12 = vsel %vm6356_vm9, %v4341_v50, %v4345_v54  ;;  %v3922_v54 = vadd.f32 %v7907_v6, %v7990_v26  ;;  %v3923_v6 = vadd.f32 %v8004_v36, %v8011_v58  ;;  %v5814_v36 = vld [vmem:[#allocation2 + $0xcc] sm:$0xff] }
 0x3d1   : > { %v4889_v24 = vpop.f32.mrf.mxu2  ;;  %v3994_v58 = vld [vmem:[#allocation2 + $0xcc] sm:$0xf]  ;;  %5704 = vmatmul.msk.bf16.gmra.mxu0 %vm1577_vm11, %v5814_v36 }
 0x3d2   : > { %v3567_v59 = vpop.f32.mrf.mxu3  ;;  %5719 = vmatmul.msk.bf16.gmra.mxu1 %vm1577_vm11, %v4428_v3  ;;  %v8036_v62 = vadd.f32 %v4889_v24, %v7976_v14  ;;  %v4356_v14 = vsel %vm6356_vm9, %v4351_v19, %v4355_v28  ;;  %v6040_v3 = vld [vmem:[#allocation2 + $0xb0] sm:$0x1]  ;;  %v8456_v24 = vld [vmem:[#allocation46_spill] sm:$0xff]  ;;  %v8065_v61 = vpop.f32.mrf.mxu1  ;;  %v3428_v28 = vrot.slane %v6041_v46, 5 }
 0x3d3   : > { %v8033_v41 = vadd.f32 %v3567_v59, %v8454_v55  ;;  %v3424_v51 = vrot.slane %v6040_v3, 5  ;;  %v4412_v30 = vunpack.c.l.b16 %v4356_v14  ;;  %v4411_v59 = vunpack.c.l.b16 %v4346_v12 }
 0x3d4   : > { %v8073_v31 = vpop.f32.mrf.mxu0  ;;  %v3430_v26 = vrot.slane %v3428_v28, 4 }
 0x3d5   : > { %v3425_v27 = vsel %vm6529_vm2, %v3423_v52, %v3424_v51  ;;  %v4429_v55 = vpack.c.b16 %v4412_v30, %v4411_v59  ;;  %v8088_v51 = vadd.f32 %v8021_v35, %v3923_v6  ;;  %v8090_v30 = vld [vmem:[#allocation2 + $0xd0] sm:$0xf]  ;;  %v4361_v59 = vshll.u32 %v3994_v58, 16 }
 0x3d6   : > { %v3469_v4 = vunpack.c.l.b16 %v3425_v27  ;;  %v4358_v27 = vshrl.u32 %v3994_v58, 16  ;;  %v3924_v46 = vadd.f32 %v8030_v22, %v8033_v41 }
 0x3d7   : > { %5620 = vmatmul.msk.bf16.gmra.mxu3 %vm1577_vm11, %v3486_v9 }
 0x3d9   : > { %v4891_v13 = vpop.f32.mrf.mxu2 }
 0x3da   : > { %v3570_v0 = vpop.f32.mrf.mxu3  ;;  %v8050_v34 = vadd.f32 %v4891_v13, %v7999_v11  ;;  %v3422_v11 = vsel %vm6529_vm2, %v5604_v39, %v3421_v37  ;;  %v4576_v37 = vadd.f32 %v7987_v17, %v3922_v54  ;;  %v8078_v13 = vpop.f32.mrf.mxu1  ;;  %v3431_v17 = vrot.slane %v6042_v1, 5  ;;  %v8092_v39 = vld [vmem:[#allocation2 + $0xd4] sm:$0x1] }
 0x3db   : > { %v8047_v48 = vadd.f32 %v3570_v0, %v8455_v38  ;;  %v3468_v9 = vunpack.c.l.b16 %v3422_v11  ;;  %v3278_v0 = vld [vmem:[#allocation2 + $0xb4] sm:$0xe]  ;;  %v4377_v35 = vshll.u32 %v8092_v39, 16  ;;  %v4360_v54 = vrot.slane %v4358_v27, 4 }
 0x3dc   : > { %v5605_v12 = vrot.slane %v3278_v0, 9  ;;  %v3432_v3 = vsel %vm6529_vm2, %v3430_v26, %v3431_v17 }
 0x3dd   : > { %v3487_v19 = vpack.c.b16 %v3469_v4, %v3468_v9  ;;  %v4363_v4 = vrot.slane %v4361_v59, 5  ;;  %v3471_v6 = vunpack.c.l.b16 %v3432_v3  ;;  %v4379_v0 = vrot.slane %v4377_v35, 5 }
 0x3de   : > { %5748 = vmatmul.msk.bf16.gmra.mxu2 %vm1577_vm11, %v8456_v24  ;;  %v4371_v24 = vshrl.u32 %v8090_v30, 16  ;;  %v3429_v11 = vsel %vm6529_vm2, %v5605_v12, %v3428_v28 }
 0x3df   : > { %v3470_v17 = vunpack.c.l.b16 %v3429_v11 }
 0x3e0   : > { %v4373_v9 = vrot.slane %v4371_v24, 4  ;;  %v6043_v24 = vld [vmem:[#allocation2 + $0xc4] sm:$0xf] }
 0x3e1   : > { %v4894_v44 = vpop.f32.mrf.mxu2  ;;  %v3488_v59 = vpack.c.b16 %v3471_v6, %v3470_v17  ;;  %v3279_v6 = vld [vmem:[#allocation2 + $0xc0] sm:$0xe] }
 0x3e2   : > { %v8067_v10 = vpop.f32.mrf.mxu3  ;;  %5720 = vmatmul.msk.bf16.gmra.mxu1 %vm1577_vm11, %v4429_v55  ;;  %v8070_v7 = vadd.f32 %v4894_v44, %v4573_v63  ;;  %v8457_v63 = vld [vmem:[#allocation18_spill] sm:$0xff]  ;;  %v8458_v55 = vld [vmem:[#allocation48_spill] sm:$0xff]  ;;  %v4516_v27 = vpop.f32.mrf.mxu1 }
 0x3e7   : > { %5621 = vmatmul.msk.bf16.gmra.mxu3 %vm1577_vm11, %v3487_v19  ;;  %v3862_v19 = vpop.f32.mrf.mxu0 }
 0x3e9   : > { %v4896_v14 = vpop.f32.mrf.mxu2 }
 0x3ea   : > { %v3575_v50 = vpop.f32.mrf.mxu3  ;;  %v8083_v38 = vadd.f32 %v4896_v14, %v4574_v2  ;;  %v4367_v2 = vshll.u32 %v8090_v30, 16  ;;  %v4364_v14 = vor.u32 %v4363_v4, %v4360_v54 }
 0x3eb   : > { %v8081_v52 = vadd.f32 %v3575_v50, %v8457_v63  ;;  %v8459_v63 = vld [vmem:[#allocation35_spill] sm:$0xff] }
 0x3ec   : > { %v4369_v44 = vrot.slane %v4367_v2, 5  ;;  %v4365_v36 = vrot.slane %v4364_v14, 4  ;;  %v4578_v2 = vadd.f32 %v8039_v53, %v3924_v46 }
 0x3ee   : > { %5749 = vmatmul.msk.bf16.gmra.mxu2 %vm1577_vm11, %v8458_v55  ;;  %v4374_v28 = vor.u32 %v4373_v9, %v4369_v44  ;;  %v3435_v55 = vrot.slane %v6043_v24, 5  ;;  %v4370_v22 = vsel %vm6356_vm9, %v4365_v36, %v4369_v44  ;;  %v6044_v44 = vld [vmem:[#allocation2 + $0xc8] sm:$0x1] }
 0x3ef   : > { %v4413_v3 = vunpack.c.l.b16 %v4370_v22  ;;  %v3864_v60 = vpop.f32.mrf.mxu0 }
 0x3f0   : > { %v4375_v58 = vrot.slane %v4374_v28, 4  ;;  %v3437_v9 = vrot.slane %v3435_v55, 4 }
 0x3f1   : > { %v4899_v50 = vpop.f32.mrf.mxu2 }
 0x3f2   : > { %v3577_v26 = vpop.f32.mrf.mxu3  ;;  %v8105_v12 = vadd.f32 %v4899_v50, %v4575_v29  ;;  %v4380_v41 = vsel %vm6356_vm9, %v4375_v58, %v4379_v0  ;;  %v3925_v29 = vadd.f32 %v8054_v25, %v8047_v48  ;;  %v8460_v50 = vld [vmem:[#allocation34_spill] sm:$0xff]  ;;  %v5606_v48 = vrot.slane %v3279_v6, 9  ;;  %v4518_v0 = vpop.f32.mrf.mxu1 }
 0x3f3   : > { %v3641_v1 = vadd.f32 %v3577_v26, %v8459_v63  ;;  %v4414_v11 = vunpack.c.l.b16 %v4380_v41  ;;  %v3438_v26 = vrot.slane %v6044_v44, 5  ;;  %v3639_v14 = vadd.f32 %v8067_v10, %v8460_v50  ;;  %v8461_v63 = vld [vmem:[#allocation51_spill] sm:$0xff] }
 0x3f4   : > { %v4579_v28 = vadd.f32 %v8065_v61, %v3925_v29 }
 0x3f5   : > { %v4430_v35 = vpack.c.b16 %v4414_v11, %v4413_v3  ;;  %v3439_v25 = vsel %vm6529_vm2, %v3437_v9, %v3438_v26 }
 0x3f6   : > { %v3473_v17 = vunpack.c.l.b16 %v3439_v25 }
 0x3f7   : > { %5622 = vmatmul.msk.bf16.gmra.mxu3 %vm1577_vm11, %v3488_v59  ;;  %5721 = vmatmul.msk.bf16.gmra.mxu1 %vm1577_vm11, %v4430_v35  ;;  %v3867_v41 = vpop.f32.mrf.mxu0 }
 0x3f9   : > { %v4901_v4 = vpop.f32.mrf.mxu2 }
 0x3fa   : > { %v3580_v54 = vpop.f32.mrf.mxu3  ;;  %v8116_v46 = vadd.f32 %v4901_v4, %v4576_v37  ;;  %v3926_v37 = vadd.f32 %v8073_v31, %v3639_v14  ;;  %v4521_v3 = vpop.f32.mrf.mxu1  ;;  %v3928_v4 = vadd.f32 %v3864_v60, %v3641_v1 }
 0x3fb   : > { %v3642_v53 = vadd.f32 %v3580_v54, %v7548_v21  ;;  %v3436_v21 = vsel %vm6529_vm2, %v5606_v48, %v3435_v55  ;;  %v3927_v55 = vadd.f32 %v3862_v19, %v8081_v52  ;;  %v8462_v54 = vld [vmem:[#allocation32_spill] sm:$0xff]  ;;  %v8463_v48 = vld [vmem:[#allocation17_spill] sm:$0xff] }
 0x3fc   : > { %v3472_v59 = vunpack.c.l.b16 %v3436_v21  ;;  %v4580_v22 = vadd.f32 %v8078_v13, %v3926_v37  ;;  %v4582_v52 = vadd.f32 %v4518_v0, %v3928_v4 }
 0x3fd   : > { %v3929_v19 = vadd.f32 %v3867_v41, %v3642_v53  ;;  %v4777_v53 = vrot.slane %v8092_v39, 5 }
 0x3fe   : > { %5750 = vmatmul.msk.bf16.gmra.mxu2 %vm1577_vm11, %v8461_v63  ;;  %v3489_v24 = vpack.c.b16 %v3473_v17, %v3472_v59 }
 0x401   : > { %v4904_v58 = vpop.f32.mrf.mxu2 }
 0x402   : > { %v3582_v36 = vpop.f32.mrf.mxu3  ;;  %v8131_v61 = vadd.f32 %v4904_v58, %v8088_v51  ;;  %v3869_v51 = vpop.f32.mrf.mxu0 }
 0x403   : > { %v3643_v10 = vadd.f32 %v3582_v36, %v7585_v20  ;;  %v4581_v20 = vadd.f32 %v4516_v27, %v3927_v55  ;;  %v4523_v6 = vpop.f32.mrf.mxu1  ;;  %v4583_v27 = vadd.f32 %v4521_v3, %v3929_v19 }
 0x405   : > { %v3930_v25 = vadd.f32 %v3869_v51, %v3643_v10 }
 0x407   : > { %5623 = vmatmul.msk.bf16.gmra.mxu3 %vm1577_vm11, %v3489_v24  ;;  %v4584_v21 = vadd.f32 %v4523_v6, %v3930_v25  ;;  %v8173_v25 = vld [vmem:[%s8334_s5] ss:$0 sm:$0xff] }
 0x409   : > { %v4906_v31 = vpop.f32.mrf.mxu2 }
 0x40a   : > { %v3585_v11 = vpop.f32.mrf.mxu3  ;;  %v8137_v35 = vadd.f32 %v4906_v31, %v4578_v2  ;;  %v3872_v50 = vpop.f32.mrf.mxu0 }
 0x40b   : > { %v3644_v29 = vadd.f32 %v3585_v11, %v7611_v16  ;;  %v4526_v2 = vpop.f32.mrf.mxu1 }
 0x40d   : > { %v3931_v59 = vadd.f32 %v3872_v50, %v3644_v29 }
 0x40e   : > { %5751 = vmatmul.msk.bf16.gmra.mxu2 %vm1577_vm11, %v8462_v54 }
 0x411   : > { %v4909_v13 = vpop.f32.mrf.mxu2 }
 0x412   : > { %v3587_v9 = vpop.f32.mrf.mxu3  ;;  %v8142_v26 = vadd.f32 %v4909_v13, %v4579_v28  ;;  %v3874_v63 = vpop.f32.mrf.mxu0  ;;  %v4774_v28 = vrot.slane %v8090_v30, 5  ;;  %v4585_v30 = vadd.f32 %v4526_v2, %v3931_v59 }
 0x413   : > { %v3645_v44 = vadd.f32 %v3587_v9, %v7633_v43  ;;  %v4618_v43 = vld [vmem:[#allocation2 + $0xcc] sm:$0xe]  ;;  %v4528_v37 = vpop.f32.mrf.mxu1 }
 0x414   : > { %v5737_v0 = vrot.slane %v4618_v43, 9  ;;  %v4776_v17 = vrot.slane %v4774_v28, 4  ;;  %v5005_v43 = vmul.f32 %v8173_v25, %v8036_v62  ;;  %v5006_v62 = vmul.f32 %v8173_v25, %v8050_v34 }
 0x415   : > { %v3932_v31 = vadd.f32 %v3874_v63, %v3645_v44  ;;  %v5007_v34 = vmul.f32 %v8173_v25, %v8070_v7 }
 0x416   : > { %v4775_v58 = vsel %vm6529_vm2, %v5737_v0, %v4774_v28  ;;  %v4778_v10 = vsel %vm6529_vm2, %v4776_v17, %v4777_v53  ;;  %v8180_v28 = vld [vmem:[%s8335_s6] ss:$0 sm:$0xff] }
 0x417   : > { %v4811_v24 = vunpack.c.l.b16 %v4775_v58  ;;  %v4812_v41 = vunpack.c.l.b16 %v4778_v10  ;;  %v4586_v29 = vadd.f32 %v4528_v37, %v3932_v31  ;;  %v5041_v58 = vadd.f32 %v8180_v28, %v5005_v43 }
 0x419   : > { %v4911_v14 = vpop.f32.mrf.mxu2  ;;  %v4828_v55 = vpack.c.b16 %v4812_v41, %v4811_v24 }
 0x41a   : > { %v8144_v16 = vadd.f32 %v4911_v14, %v4580_v22  ;;  %v3590_v36 = vpop.f32.mrf.mxu3  ;;  %v3877_v11 = vpop.f32.mrf.mxu0 }
 0x41b   : > { %v4531_v39 = vpop.f32.mrf.mxu1  ;;  %v3646_v44 = vadd.f32 %v3590_v36, %v7655_v18 }
 0x41e   : > { %5752 = vmatmul.msk.bf16.gmra.mxu2 %vm1577_vm11, %v8463_v48 }
 0x421   : > { %v4914_v1 = vpop.f32.mrf.mxu2 }
 0x422   : > { %v8148_v60 = vadd.f32 %v4914_v1, %v4581_v20  ;;  %v3592_v20 = vpop.f32.mrf.mxu3  ;;  %v3879_v8 = vpop.f32.mrf.mxu0  ;;  %v3933_v1 = vadd.f32 %v3877_v11, %v3646_v44 }
 0x423   : > { %v4533_v9 = vpop.f32.mrf.mxu1  ;;  %v3647_v18 = vadd.f32 %v3592_v20, %v7677_v5 }
 0x424   : > { %v4587_v0 = vadd.f32 %v4531_v39, %v3933_v1 }
 0x425   : > { %v3934_v17 = vadd.f32 %v3879_v8, %v3647_v18 }
 0x429   : > { %v4916_v22 = vpop.f32.mrf.mxu2 }
 0x42a   : > { %v8156_v3 = vadd.f32 %v4916_v22, %v4582_v52  ;;  %v3595_v6 = vpop.f32.mrf.mxu3  ;;  %v3882_v52 = vpop.f32.mrf.mxu0  ;;  %v8464_v22 = vld [vmem:[#allocation20_spill] sm:$0xff] }
 0x42b   : > { %v3648_v41 = vadd.f32 %v3595_v6, %v8464_v22  ;;  %v8465_v6 = vld [vmem:[#allocation23_spill] sm:$0xff] }
 0x42e   : > { %5753 = vmatmul.msk.bf16.gmra.mxu2 %vm1577_vm11, %v7572_v15  ;;  %v4536_v15 = vpop.f32.mrf.mxu1 }
 0x431   : > { %v4919_v54 = vpop.f32.mrf.mxu2 }
 0x432   : > { %v8160_v51 = vadd.f32 %v4919_v54, %v4583_v27  ;;  %v3597_v14 = vpop.f32.mrf.mxu3  ;;  %v3884_v48 = vpop.f32.mrf.mxu0  ;;  %v5042_v54 = vadd.f32 %v8180_v28, %v5006_v62 }
 0x434   : > { %v5074_v1 = vmax.f32 %v5042_v54, 0.0 }
 0x436   : > { %v4538_v63 = vpop.f32.mrf.mxu1 }
 0x439   : > { %v4921_v4 = vpop.f32.mrf.mxu2 }
 0x43a   : > { %v8162_v13 = vadd.f32 %v4921_v4, %v4584_v21  ;;  %v3600_v21 = vpop.f32.mrf.mxu3  ;;  %v3887_v59 = vpop.f32.mrf.mxu0 }
 0x43e   : > { %5754 = vmatmul.msk.bf16.gmra.mxu2 %vm1577_vm11, %v4828_v55  ;;  %v4541_v24 = vpop.f32.mrf.mxu1  ;;  %v4588_v55 = vadd.f32 %v4533_v9, %v3934_v17  ;;  %v3649_v9 = vadd.f32 %v3597_v14, %v8465_v6  ;;  %v5008_v14 = vmul.f32 %v8173_v25, %v8083_v38  ;;  %v5009_v38 = vmul.f32 %v8173_v25, %v8105_v12 }
 0x440   : > { %v3936_v17 = vadd.f32 %v3884_v48, %v3649_v9  ;;  %v5045_v6 = vadd.f32 %v8180_v28, %v5009_v38 }
 0x441   : > { %v4924_v19 = vpop.f32.mrf.mxu2 }
 0x442   : > { %v8165_v50 = vadd.f32 %v4924_v19, %v4585_v30  ;;  %v5073_v30 = vmax.f32 %v5041_v58, 0.0  ;;  %v3602_v11 = vpop.f32.mrf.mxu3  ;;  %v3889_v19 = vpop.f32.mrf.mxu0  ;;  %v4590_v62 = vadd.f32 %v4538_v63, %v3936_v17 }
 0x446   : > { %v4543_v18 = vpop.f32.mrf.mxu1 }
 0x449   : > { %v4926_v2 = vpop.f32.mrf.mxu2 }
 0x44a   : > { %v8168_v27 = vadd.f32 %v4926_v2, %v4586_v29  ;;  %v3935_v29 = vadd.f32 %v3882_v52, %v3648_v41  ;;  %v5043_v52 = vadd.f32 %v8180_v28, %v5007_v34  ;;  %v3892_v22 = vpop.f32.mrf.mxu0 }
 0x44c   : > { %v4589_v2 = vadd.f32 %v4536_v15, %v3935_v29  ;;  %v5075_v7 = vmax.f32 %v5043_v52, 0.0  ;;  %v3650_v15 = vadd.f32 %v3600_v21, %v7759_v40  ;;  %v3651_v40 = vadd.f32 %v3602_v11, %v7780_v56 }
 0x44d   : > { %v5010_v56 = vmul.f32 %v8173_v25, %v8116_v46 }
 0x44e   : > { %v4546_v48 = vpop.f32.mrf.mxu1  ;;  %v3938_v9 = vadd.f32 %v3889_v19, %v3651_v40 }
 0x44f   : > { %v5046_v19 = vadd.f32 %v8180_v28, %v5010_v56 }
 0x451   : > { %v4929_v53 = vpop.f32.mrf.mxu2 }
 0x452   : > { %v4985_v37 = vadd.f32 %v4929_v53, %v4587_v0 }
 0x454   : > { %v5021_v36 = vmul.f32 %v8173_v25, %v4985_v37  ;;  %v3605_v37 = vpop.f32.mrf.mxu3 }
 0x456   : > { %v5057_v10 = vadd.f32 %v8180_v28, %v5021_v36 }
 0x458   : > { %v5089_v5 = vmax.f32 %v5057_v10, 0.0 }
 0x459   : > { %v4931_v39 = vpop.f32.mrf.mxu2 }
 0x45a   : > { %v4986_v31 = vadd.f32 %v4931_v39, %v4588_v55  ;;  %v5955_v20 = vpack.i.bf16 %v5089_v5, %v5073_v30  ;;  %v5044_v5 = vadd.f32 %v8180_v28, %v5008_v14  ;;  %v3937_v39 = vadd.f32 %v3887_v59, %v3650_v15  ;;  %v3894_v59 = vpop.f32.mrf.mxu0 }
 0x45c   : > { %v5022_v8 = vmul.f32 %v8173_v25, %v4986_v31  ;;  %5956 = vxpose.xlu1.b32.start [1/16] (narrow) %v5955_v20, 8  ;;  %v3607_v20 = vpop.f32.mrf.mxu3  ;;  %v4591_v21 = vadd.f32 %v4541_v24, %v3937_v39  ;;  %v5076_v29 = vmax.f32 %v5044_v5, 0.0  ;;  %v8466_v24 = vld [vmem:[#allocation25_spill] sm:$0xff] }
 0x45d   : > { %v3652_v11 = vadd.f32 %v3605_v37, %v8466_v24 }
 0x45e   : > { %v5058_v4 = vadd.f32 %v8180_v28, %v5022_v8 }
 0x460   : > { %v5090_v44 = vmax.f32 %v5058_v4, 0.0 }
 0x461   : > { %v4934_v43 = vpop.f32.mrf.mxu2 }
 0x462   : > { %v4987_v0 = vadd.f32 %v4934_v43, %v4589_v2  ;;  %v5957_v53 = vpack.i.bf16 %v5090_v44, %v5074_v1  ;;  %v4548_v2 = vpop.f32.mrf.mxu1  ;;  %v5077_v43 = vmax.f32 %v5045_v6, 0.0  ;;  %v3897_v14 = vpop.f32.mrf.mxu0 }
 0x464   : > { %v5023_v36 = vmul.f32 %v8173_v25, %v4987_v0  ;;  %5958 = vxpose.xlu1.b32.cont [2/16] (narrow) %v5957_v53, 8  ;;  %v3610_v12 = vpop.f32.mrf.mxu3  ;;  %v4592_v53 = vadd.f32 %v4543_v18, %v3938_v9 }
 0x466   : > { %v5059_v58 = vadd.f32 %v8180_v28, %v5023_v36 }
 0x468   : > { %v5091_v10 = vmax.f32 %v5059_v58, 0.0  ;;  %v3939_v58 = vadd.f32 %v3892_v22, %v3652_v11 }
 0x469   : > { %v4936_v41 = vpop.f32.mrf.mxu2 }
 0x46a   : > { %v4988_v55 = vadd.f32 %v4936_v41, %v4590_v62  ;;  %v5959_v30 = vpack.i.bf16 %v5091_v10, %v5075_v7  ;;  %v5011_v10 = vmul.f32 %v8173_v25, %v8131_v61  ;;  %v4551_v46 = vpop.f32.mrf.mxu1  ;;  %v8467_v62 = vld [vmem:[#allocation29_spill] sm:$0xff]  ;;  %v4593_v18 = vadd.f32 %v4546_v48, %v3939_v58  ;;  %v3899_v61 = vpop.f32.mrf.mxu0 }
 0x46b   : > { %v3653_v37 = vadd.f32 %v3607_v20, %v8467_v62  ;;  %v5012_v20 = vmul.f32 %v8173_v25, %v8137_v35  ;;  %v3654_v48 = vadd.f32 %v3610_v12, %v7859_v57  ;;  %v5013_v35 = vmul.f32 %v8173_v25, %v8142_v26 }
 0x46c   : > { %v5024_v31 = vmul.f32 %v8173_v25, %v4988_v55  ;;  %5960 = vxpose.xlu1.b32.cont [3/16] (narrow) %v5959_v30, 8  ;;  %v5078_v55 = vmax.f32 %v5046_v19, 0.0  ;;  %v3612_v30 = vpop.f32.mrf.mxu3  ;;  %v5047_v22 = vadd.f32 %v8180_v28, %v5011_v10 }
 0x46d   : > { %v3655_v57 = vadd.f32 %v3612_v30, %v7884_v33  ;;  %v5014_v33 = vmul.f32 %v8173_v25, %v8144_v16 }
 0x46e   : > { %v5060_v54 = vadd.f32 %v8180_v28, %v5024_v31 }
 0x470   : > { %v5092_v63 = vmax.f32 %v5060_v54, 0.0  ;;  %v3940_v54 = vadd.f32 %v3894_v59, %v3653_v37  ;;  %v5048_v59 = vadd.f32 %v8180_v28, %v5012_v20 }
 0x471   : > { %v4939_v8 = vpop.f32.mrf.mxu2 }
 0x472   : > { %v4989_v4 = vadd.f32 %v4939_v8, %v4591_v21  ;;  %v5961_v34 = vpack.i.bf16 %v5092_v63, %v5076_v29  ;;  %v5079_v63 = vmax.f32 %v5047_v22, 0.0  ;;  %v4594_v29 = vadd.f32 %v4548_v2, %v3940_v54  ;;  %v3902_v24 = vpop.f32.mrf.mxu0 }
 0x473   : > { %v5080_v56 = vmax.f32 %v5048_v59, 0.0 }
 0x474   : > { %v5025_v44 = vmul.f32 %v8173_v25, %v4989_v4  ;;  %5962 = vxpose.xlu1.b32.cont [4/16] (narrow) %v5961_v34, 8  ;;  %v4553_v4 = vpop.f32.mrf.mxu1  ;;  %v3615_v9 = vpop.f32.mrf.mxu3 }
 0x476   : > { %v5061_v1 = vadd.f32 %v8180_v28, %v5025_v44  ;;  %v3941_v44 = vadd.f32 %v3897_v14, %v3654_v48  ;;  %v3656_v14 = vadd.f32 %v3615_v9, %v7905_v32  ;;  %v5015_v32 = vmul.f32 %v8173_v25, %v8148_v60 }
 0x478   : > { %v5093_v0 = vmax.f32 %v5061_v1, 0.0  ;;  %v4595_v2 = vadd.f32 %v4551_v46, %v3941_v44  ;;  %v5051_v20 = vadd.f32 %v8180_v28, %v5015_v32 }
 0x479   : > { %v4941_v52 = vpop.f32.mrf.mxu2 }
 0x47a   : > { %v4990_v17 = vadd.f32 %v4941_v52, %v4592_v53  ;;  %v5963_v36 = vpack.i.bf16 %v5093_v0, %v5077_v43  ;;  %v5049_v52 = vadd.f32 %v8180_v28, %v5013_v35  ;;  %v5083_v60 = vmax.f32 %v5051_v20, 0.0 }
 0x47c   : > { %v5026_v7 = vmul.f32 %v8173_v25, %v4990_v17  ;;  %5964 = vxpose.xlu1.b32.cont [5/16] (narrow) %v5963_v36, 8  ;;  %v4556_v17 = vpop.f32.mrf.mxu1  ;;  %v3942_v36 = vadd.f32 %v3899_v61, %v3655_v57  ;;  %v3617_v58 = vpop.f32.mrf.mxu3  ;;  %v5081_v26 = vmax.f32 %v5049_v52, 0.0 }
 0x47d   : > { %v3657_v22 = vadd.f32 %v3617_v58, %v7925_v47 }
 0x47e   : > { %v5062_v15 = vadd.f32 %v8180_v28, %v5026_v7  ;;  %v4596_v10 = vadd.f32 %v4553_v4, %v3942_v36  ;;  %v5016_v4 = vmul.f32 %v8173_v25, %v8156_v3 }
 0x480   : > { %v5094_v41 = vmax.f32 %v5062_v15, 0.0  ;;  %v5052_v35 = vadd.f32 %v8180_v28, %v5016_v4 }
 0x481   : > { %v4944_v5 = vpop.f32.mrf.mxu2 }
 0x482   : > { %v4991_v39 = vadd.f32 %v4944_v5, %v4593_v18  ;;  %v5965_v31 = vpack.i.bf16 %v5094_v41, %v5078_v55  ;;  %v3904_v41 = vpop.f32.mrf.mxu0  ;;  %v5050_v18 = vadd.f32 %v8180_v28, %v5014_v33  ;;  %v3943_v55 = vadd.f32 %v3902_v24, %v3656_v14 }
 0x483   : > { %v3944_v48 = vadd.f32 %v3904_v41, %v3657_v22  ;;  %v5084_v3 = vmax.f32 %v5052_v35, 0.0  ;;  %v5017_v24 = vmul.f32 %v8173_v25, %v8160_v51  ;;  %v5018_v51 = vmul.f32 %v8173_v25, %v8162_v13 }
 0x484   : > { %v5027_v38 = vmul.f32 %v8173_v25, %v4991_v39  ;;  %5966 = vxpose.xlu1.b32.cont [6/16] (narrow) %v5965_v31, 8  ;;  %v4558_v5 = vpop.f32.mrf.mxu1  ;;  %v5082_v31 = vmax.f32 %v5050_v18, 0.0  ;;  %v3620_v16 = vpop.f32.mrf.mxu3 }
 0x485   : > { %v3658_v47 = vadd.f32 %v3620_v16, %v7949_v45  ;;  %v4598_v9 = vadd.f32 %v4558_v5, %v3944_v48  ;;  %v5053_v58 = vadd.f32 %v8180_v28, %v5017_v24  ;;  %v5054_v18 = vadd.f32 %v8180_v28, %v5018_v51  ;;  %v5216_v24 = vld [vmem:[%s8337_s8 + $0x8] sm:$0xff] }
 0x486   : > { %v5063_v40 = vadd.f32 %v8180_v28, %v5027_v38  ;;  %v4597_v38 = vadd.f32 %v4556_v17, %v3943_v55  ;;  %v5019_v16 = vmul.f32 %v8173_v25, %v8165_v50  ;;  %v5020_v50 = vmul.f32 %v8173_v25, %v8168_v27  ;;  %v5215_v27 = vld [vmem:[%s8337_s8] sm:$0xff] }
 0x487   : > { %v5086_v13 = vmax.f32 %v5054_v18, 0.0  ;;  %5219 = vperm.xlu2 %5992, %v5215_v27   ;;  %v5249_v18 = vld [vmem:[%s6293_s28 + $0x10] sm:$0xff] }
 0x488   : > { %v5095_v21 = vmax.f32 %v5063_v40, 0.0 }
 0x489   : > { %v4946_v8 = vpop.f32.mrf.mxu2 }
 0x48a   : > { %v4992_v34 = vadd.f32 %v4946_v8, %v4594_v29  ;;  %v5967_v6 = vpack.i.bf16 %v5095_v21, %v5079_v63  ;;  %v3907_v29 = vpop.f32.mrf.mxu0 }
 0x48b   : > { %v3945_v57 = vadd.f32 %v3907_v29, %v3658_v47 }
 0x48c   : > { %v5028_v1 = vmul.f32 %v8173_v25, %v4992_v34  ;;  %5968 = vxpose.xlu1.b32.cont [7/16] (narrow) %v5967_v6, 8  ;;  %v4561_v34 = vpop.f32.mrf.mxu1  ;;  %v3622_v59 = vpop.f32.mrf.mxu3 }
 0x48d   : > { %v3659_v45 = vadd.f32 %v3622_v59, %v7967_v42  ;;  %v5085_v42 = vmax.f32 %v5053_v58, 0.0 }
 0x48e   : > { %v5064_v43 = vadd.f32 %v8180_v28, %v5028_v1 }
 0x48f   : > { %5224 = vperm.xlu2 %5992, %v5216_v24  }
 0x490   : > { %v5096_v12 = vmax.f32 %v5064_v43, 0.0 }
 0x491   : > { %v4949_v11 = vpop.f32.mrf.mxu2 }
 0x492   : > { %v4993_v0 = vadd.f32 %v4949_v11, %v4595_v2  ;;  %v5969_v53 = vpack.i.bf16 %v5096_v12, %v5080_v56  ;;  %v3909_v56 = vpop.f32.mrf.mxu0 }
 0x494   : > { %v5029_v19 = vmul.f32 %v8173_v25, %v4993_v0  ;;  %5970 = vxpose.xlu1.b32.cont [8/16] (narrow) %v5969_v53, 8  ;;  %v4599_v0 = vadd.f32 %v4561_v34, %v3945_v57  ;;  %v4563_v36 = vpop.f32.mrf.mxu1 }
 0x496   : > { %v5065_v7 = vadd.f32 %v8180_v28, %v5029_v19  ;;  %v3625_v19 = vpop.f32.mrf.mxu3 }
 0x498   : > { %v5097_v15 = vmax.f32 %v5065_v7, 0.0  ;;  %v3946_v7 = vadd.f32 %v3909_v56, %v3659_v45  ;;  %v5232_v45 = vld [vmem:[%s8338_s9 + $0x8] sm:$0xff] }
 0x499   : > { %v4951_v46 = vpop.f32.mrf.mxu2  ;;  %5240 = vperm.xlu2 %5992, %v5232_v45  }
 0x49a   : > { %v4994_v62 = vadd.f32 %v4951_v46, %v4596_v10  ;;  %v5971_v37 = vpack.i.bf16 %v5097_v15, %v5081_v26  ;;  %v3912_v14 = vpop.f32.mrf.mxu0  ;;  %v3660_v15 = vadd.f32 %v3625_v19, %v7993_v49  ;;  %v4600_v46 = vadd.f32 %v4563_v36, %v3946_v7  ;;  %v5248_v36 = vld [vmem:[%s6293_s28 + $0x8] sm:$0xff]  ;;  %v5247_v7 = vld [vmem:[%s6293_s28] sm:$0xff] }
 0x49c   : > { %v5030_v30 = vmul.f32 %v8173_v25, %v4994_v62  ;;  %5972 = vxpose.xlu1.b32.cont [9/16] (narrow) %v5971_v37, 8  ;;  %v4566_v55 = vpop.f32.mrf.mxu1 }
 0x49e   : > { %v5066_v39 = vadd.f32 %v8180_v28, %v5030_v30  ;;  %v3947_v30 = vadd.f32 %v3912_v14, %v3660_v15 }
 0x4a0   : > { %v5098_v54 = vmax.f32 %v5066_v39, 0.0  ;;  %v3627_v39 = vpop.f32.mrf.mxu3  ;;  %v4601_v49 = vadd.f32 %v4566_v55, %v3947_v30  ;;  %v5250_v55 = vld [vmem:[%s6293_s28 + $0x18] sm:$0xff]  ;;  %s6089_s28 = sshra.s32 %s5279_s23, 4  ;;  %s6090_s28 = int_to_ptr.hbm [resolvable:$true] %s6089_s28 }
 0x4a1   : > { %v4954_v40 = vpop.f32.mrf.mxu2  ;;  %v3661_v32 = vadd.f32 %v3627_v39, %v8014_v23  ;;  %s6091_s30 = scalar_lea.hbm %s6090_s28, 16  ;;  %p6096_p0 = scmp.lt.s32.totalorder %s6090_s28, %s8339_s10 }
 0x4a2   : > { %v4995_v63 = vadd.f32 %v4954_v40, %v4597_v38  ;;  %v5973_v61 = vpack.i.bf16 %v5098_v54, %v5082_v31  ;;  %v3914_v54 = vpop.f32.mrf.mxu0  ;;  %p6092_p6 = scmp.ne.s32.totalorder %s6090_s28, %s6091_s30  ;;  %p6097_p1 = scmp.lt.s32.totalorder %s6095_s12, %s6091_s30 }
 0x4a3   : > { %v3948_v20 = vadd.f32 %v3914_v54, %v3661_v32 }
 0x4a4   : > { %v5031_v21 = vmul.f32 %v8173_v25, %v4995_v63  ;;  %5974 = vxpose.xlu1.b32.cont [10/16] (narrow) %v5973_v61, 8  ;;  %v5055_v61 = vadd.f32 %v8180_v28, %v5019_v16  ;;  %p6093_p9 = pnand %p6092_p6, %p6253_p11  ;;  %p6098_p3 = por %p6097_p1, %p6096_p0 }
 0x4a6   : > { %v5067_v8 = vadd.f32 %v8180_v28, %v5031_v21  ;;  %v4568_v21 = vpop.f32.mrf.mxu1  ;;  %p6094_p13 = pneg %p6093_p9 }
 0x4a7   : > { %v4602_v4 = vadd.f32 %v4568_v21, %v3948_v20 }
 0x4a8   : > { %v5099_v6 = vmax.f32 %v5067_v8, 0.0  ;;  %v5087_v8 = vmax.f32 %v5055_v61, 0.0  ;;  %p6099_p4 = pnand %p6098_p3, %p6094_p13 }
 0x4a9   : > { %v4956_v44 = vpop.f32.mrf.mxu2 }
 0x4aa   : > { %v4996_v1 = vadd.f32 %v4956_v44, %v4598_v9  ;;  %v5975_v43 = vpack.i.bf16 %v5099_v6, %v5083_v60  ;;  %v5056_v6 = vadd.f32 %v8180_v28, %v5020_v50 }
 0x4ac   : > { %v5032_v12 = vmul.f32 %v8173_v25, %v4996_v1  ;;  %5976 = vxpose.xlu1.b32.cont [11/16] (narrow) %v5975_v43, 8  ;;  %v5088_v44 = vmax.f32 %v5056_v6, 0.0 }
 0x4ae   : > { %v5068_v2 = vadd.f32 %v8180_v28, %v5032_v12 }
 0x4b0   : > { %v5100_v11 = vmax.f32 %v5068_v2, 0.0 }
 0x4b1   : > { %v4959_v53 = vpop.f32.mrf.mxu2 }
 0x4b2   : > { %v4997_v52 = vadd.f32 %v4959_v53, %v4599_v0  ;;  %v5977_v17 = vpack.i.bf16 %v5100_v11, %v5084_v3 }
 0x4b4   : > { %v5033_v33 = vmul.f32 %v8173_v25, %v4997_v52  ;;  %5978 = vxpose.xlu1.b32.cont [12/16] (narrow) %v5977_v17, 8  ;;  %v5236_v52 = vpop.permute.xlu0 %5235 }
 0x4b6   : > { %v5069_v26 = vadd.f32 %v8180_v28, %v5033_v33 }
 0x4b8   : > { %v5101_v10 = vmax.f32 %v5069_v26, 0.0 }
 0x4b9   : > { %v4961_v62 = vpop.f32.mrf.mxu2 }
 0x4ba   : > { %v4998_v37 = vadd.f32 %v4961_v62, %v4600_v46  ;;  %v5979_v41 = vpack.i.bf16 %v5101_v10, %v5085_v42 }
 0x4bc   : > { %v5034_v5 = vmul.f32 %v8173_v25, %v4998_v37  ;;  %5980 = vxpose.xlu1.b32.cont [13/16] (narrow) %v5979_v41, 8 }
 0x4be   : > { %v5070_v31 = vadd.f32 %v8180_v28, %v5034_v5 }
 0x4c0   : > { %v5102_v22 = vmax.f32 %v5070_v31, 0.0 }
 0x4c1   : > { %v4964_v38 = vpop.f32.mrf.mxu2 }
 0x4c2   : > { %v4999_v40 = vadd.f32 %v4964_v38, %v4601_v49  ;;  %v5981_v63 = vpack.i.bf16 %v5102_v22, %v5086_v13 }
 0x4c4   : > { %v5035_v48 = vmul.f32 %v8173_v25, %v4999_v40  ;;  %5982 = vxpose.xlu1.b32.cont [14/16] (narrow) %v5981_v63, 8 }
 0x4c6   : > { %v5071_v29 = vadd.f32 %v8180_v28, %v5035_v48 }
 0x4c8   : > { %v5103_v23 = vmax.f32 %v5071_v29, 0.0 }
 0x4c9   : > { %v4966_v60 = vpop.f32.mrf.mxu2 }
 0x4ca   : > { %v5000_v34 = vadd.f32 %v4966_v60, %v4602_v4  ;;  %v5983_v47 = vpack.i.bf16 %v5103_v23, %v5087_v8 }
 0x4cc   : > { %v5036_v9 = vmul.f32 %v8173_v25, %v5000_v34  ;;  %5984 = vxpose.xlu1.b32.cont [15/16] (narrow) %v5983_v47, 8 }
 0x4ce   : > { %v5072_v59 = vadd.f32 %v8180_v28, %v5036_v9  ;;  %v5815_v28 = vld [vmem:[%s8336_s7] sm:$0xff] }
 0x4d0   : > { %v5104_v1 = vmax.f32 %v5072_v59, 0.0 }
 0x4d2   : > { %v5985_v43 = vpack.i.bf16 %v5104_v1, %v5088_v44 }
 0x4d4   : > { %5986 = vxpose.xlu1.b32.end [16/16] (narrow) %v5985_v43, 8 }
 0x4e1   : > { %v5220_v11 = vpop.permute.xlu2 %5219 }
 0x4e9   : > { %v5225_v10 = vpop.permute.xlu2 %5224 }
 0x4f3   : > { %v5241_v30 = vpop.permute.xlu2 %5240 }
 0x500   : > { %v5987_v35 = vpop.trf.xlu1 }
 0x501   : > { %v5991_v57 = vunpack.i.h.bf16 %v5987_v35  ;;  %v5988_v12 = vunpack.i.l.bf16 %v5987_v35 }
 0x503   : > { %v5170_v2 = vpack.c.bf16 %v5991_v57, %v5991_v57  ;;  %v5169_v56 = vpack.c.bf16 %v5988_v12, %v5988_v12 }
 0x505   : > { %v5182_v3 = vsel %vm1626_vm10, %v5169_v56, 0  ;;  %v5185_v25 = vsel %vm1626_vm10, %v5170_v2, 0 }
 0x506   : > { %5194 = vmatpush.bf16.msrb.mxu3 %v5182_v3  ;;  %5208 = vmatpush.bf16.msra.mxu0 %v5185_v25 }
 0x509   : > { %5759 = vmatmul.msk.bf16.vlgmr.msrb.gmra.mxu3 %vm1577_vm11, %v5815_v28  ;;  %5760 = vmatmul.msk.bf16.vlgmr.msra.gmra.mxu0 %vm1577_vm11, %v5815_v28 }
 0x586   : > { %v5210_v0 = vpop.f32.mrf.mxu0 }
 0x587   : > { %v5228_v53 = vmul.f32 %v5220_v11, %v5210_v0 }
 0x589   : > { %v5244_v17 = vadd.f32 %v5236_v52, %v5228_v53 }
 0x58b   : > { %v5252_v33 = vadd.f32 %v5248_v36, %v5244_v17 }
 0x58c   : > { %v5196_v19 = vpop.f32.mrf.mxu3 }
 0x58d   : > { %v5227_v58 = vmul.f32 %v5220_v11, %v5196_v19  ;;  %v5256_v14 = vmax.f32 %v5252_v33, 0.0 }
 0x58e   : > { %v5212_v62 = vpop.f32.mrf.mxu0 }
 0x58f   : > { %v5243_v26 = vadd.f32 %v5236_v52, %v5227_v58  ;;  %v5230_v41 = vmul.f32 %v5225_v10, %v5212_v62 }
 0x591   : > { %v5251_v51 = vadd.f32 %v5247_v7, %v5243_v26  ;;  %v5246_v39 = vadd.f32 %v5241_v30, %v5230_v41 }
 0x593   : > { %v5255_v42 = vmax.f32 %v5251_v51, 0.0  ;;  %v5254_v13 = vadd.f32 %v5250_v55, %v5246_v39 }
 0x594   : > { %v5198_v46 = vpop.f32.mrf.mxu3 }
 0x595   : > { %v5259_v15 = vpack.c.bf16 %v5256_v14, %v5255_v42  ;;  %v5229_v37 = vmul.f32 %v5225_v10, %v5198_v46  ;;  %v5258_v49 = vmax.f32 %v5254_v13, 0.0 }
 0x597   : > { %5261 = vst [vmem:[%s379_s15] sm:$0xff] %v5259_v15  ;;  %v5245_v5 = vadd.f32 %v5241_v30, %v5229_v37 }
 0x599   : > { %v5253_v31 = vadd.f32 %v5249_v18, %v5245_v5 }
 0x59b   : > { %v5257_v16 = vmax.f32 %v5253_v31, 0.0 }
 0x59d   : > { %v5260_v32 = vpack.c.bf16 %v5258_v49, %v5257_v16 }
 0x59f   : > { %5262 = vst [vmem:[%s379_s15 + $0x8] sm:$0xff] %v5260_v32 }
 0x5a0   : > { %6102 = shalt.err (!%p6099_p4)
}
 0x5a1   : > { %s6146_s18 = smov 128   ;;  %s6147_s15 = smov 8  }
 0x5a2   : > { %5822 = dma.vmem_to_hbm [thread:$0]  (%p6253_p11), %s5277_s29, 256, %s5279_s23, %s5264_s17, %s6146_s18, %s6146_s18, %s6147_s15  }
 0x5a3 PF: > { %s5293_s24 = sand.u32 1, %s6129_s13   ;;  %p8469_p7 = scmp.ge.s32.totalorder %s6141_s16, 2 }
 0x5a4   : > { %s5294_s20 = scalar_lea.sflag [#allocation5], %s5293_s24 }
 0x5a5   : > { %p5829_p5 = pnand %p8469_p7, %p6257_p12 }
 0x5a7   : > { %p5830_p8 = pneg %p5829_p5 }
 0x5a9   : > { %6124 = dma.done.wait (%p5830_p8), %s5294_s20, 256  }
 0x5aa   : > { %6126 = vsyncadd (%p5830_p8), %s5294_s20, 4294967040  ;;  %s8470_s16 = sld [smem:[#allocation10_spill]]  ;;  %s8473_s13 = smov %s6133_s14 }
 0x5ab   : > { %s8471_s21 = sld [smem:[#allocation9_spill]] }
 0x5ac   : > { %s8472_s15 = sld [smem:[#allocation11_spill]] }
 0x5b0   : > { %p23_p10 = scmp.ge.s32.totalorder %s8470_s16, 4  }
 0x5b1   : > { %s8474_s14 = smov %s8471_s21 }
 0x5b2   :  { %25 = sbr.rel (!%p23_p10) target bundleno = 5 (0x5), region = 116 }
 0x5b7   :  { %5300 = vsyncpa [#allocation4], 1 }
 0x5b8   :  { %5302 = vsyncpa [#allocation4 + $0x1], 1 }
 0x5b9   :  { %5303 = vsyncpa [#allocation5], 1 }
 0x5ba   :  { %5305 = vsyncpa [#allocation5 + $0x1], 1 }

</bundles_post_ra>
